<compile_context>
chip_gen: v7x
topology: tpu7x:2x2x1
jax: 0.10.0
libtpu: 0.0.40
codegen_flags: <defaults>
</compile_context>

<pallas_src>
import functools

import jax
import jax.numpy as jnp
import numpy as np
from jax.experimental import pallas as pl
from jax.experimental.pallas import tpu as pltpu


# ---------------------------------------------------------------------------
# Small helpers
# ---------------------------------------------------------------------------
def _round_up(x: int, m: int) -> int:
    return ((x + m - 1) // m) * m


def _num_tensorcores_per_chip() -> int:
    """2 on v7x, 1 on v5e/v6e (best-effort; defaults to 1)."""
    try:
        kind = jax.devices()[0].device_kind.lower()
    except Exception:  # pragma: no cover
        return 1
    return 2 if ("v7" in kind or "7x" in kind) else 1


def _pick_time_chunk(n_lags: int, target: int = 32) -> int:
    """Largest divisor of n_lags that is <= target (bounds per-chunk scratch)."""
    if n_lags <= target:
        return n_lags
    for tc in range(target, 0, -1):
        if n_lags % tc == 0:
            return tc
    return n_lags


def _pad_gate_cols(w, H: int, HP: int):
    """(in, 4H) -> (in, 4HP): gate g's H columns placed at lane offset g*HP."""
    if H == HP:
        return w
    in_dim = w.shape[0]
    out = jnp.zeros((in_dim, 4 * HP), w.dtype)
    for g in range(4):
        out = out.at[:, g * HP:g * HP + H].set(w[:, g * H:(g + 1) * H])
    return out


def _pad_rows(w, H: int, HP: int):
    """(H, N) -> (HP, N) with zero rows (h/c pad lanes are zero anyway)."""
    if H == HP:
        return w
    return jnp.pad(w, ((0, HP - H), (0, 0)))


# ---------------------------------------------------------------------------
# Pallas kernel: stacked-LSTM recurrence over one (batch-tile, time-chunk)
# ---------------------------------------------------------------------------
def make_lstm_kernel(n_layers: int, tc: int, hp: int, input_dim: int, tb: int,
                     mxu_dtype):
    HP = hp
    unroll = True if tc <= 8 else 2   # partial unroll for long chunks

    def kernel(*refs):
        # refs: z (tc,tb,in), h0 (L,tb,HP), c0 (L,tb,HP),
        #       w_ih0 (in,4HP), w_hh0 (HP,4HP), b0 (1,4HP),
        #       [w_ih_l (HP,4HP), w_hh_l (HP,4HP), b_l (1,4HP)] * (L-1),
        #       out (tc,tb,HP),
        #       scratch: h_sc (L,tb,HP), c_sc (L,tb,HP), gates0_sc (tc,tb,4HP)
        idx = 0
        z_ref = refs[idx]; idx += 1
        h0_ref = refs[idx]; idx += 1
        c0_ref = refs[idx]; idx += 1
        w_ih0_ref = refs[idx]; idx += 1
        w_hh0_ref = refs[idx]; idx += 1
        b0_ref = refs[idx]; idx += 1
        upper = []
        for _ in range(n_layers - 1):
            upper.append((refs[idx], refs[idx + 1], refs[idx + 2]))
            idx += 3
        out_ref = refs[idx]; idx += 1
        h_sc = refs[idx]; idx += 1
        c_sc = refs[idx]; idx += 1
        gates0_sc = refs[idx]; idx += 1

        t_chunk = pl.program_id(1)

        # Initialize the persistent h/c state at the first time chunk of each
        # batch tile (time axis is the inner, "arbitrary" grid axis).
        @pl.when(t_chunk == 0)
        def _():
            h_sc[...] = h0_ref[...]
            c_sc[...] = c0_ref[...]

        # (1) Layer-0 input projection for the whole chunk: one bf16 matmul.
        #     Layer-0 bias folded in here (once per chunk, not per step).
        z2d = z_ref[...].reshape(tc * tb, input_dim).astype(mxu_dtype)
        g0 = jnp.dot(z2d, w_ih0_ref[...], preferred_element_type=jnp.float32)
        g0 = g0 + b0_ref[...]
        gates0_sc[...] = g0.reshape(tc, tb, 4 * HP)

        # (2) Hoist weights / bias broadcasts out of the time loop.
        w_hh0 = w_hh0_ref[...]
        w_ih_ups = [w[...] for (w, _, _) in upper]
        w_hh_ups = [w[...] for (_, w, _) in upper]
        b_ups = [jnp.broadcast_to(b[...], (tb, 4 * HP)) for (_, _, b) in upper]

        def cell(g, c_prev):
            # Gate blocks are lane-aligned: each slice is a whole-vreg select.
            i_g = jax.nn.sigmoid(g[:, 0 * HP:1 * HP])
            f_g = jax.nn.sigmoid(g[:, 1 * HP:2 * HP])
            g_g = jnp.tanh(g[:, 2 * HP:3 * HP])
            o_g = jax.nn.sigmoid(g[:, 3 * HP:4 * HP])
            c_new = f_g * c_prev + i_g * g_g      # pad lanes stay exactly 0
            h_new = o_g * jnp.tanh(c_new)
            return h_new, c_new

        def step(t, carry):
            hs, cs = carry
            new_h, new_c = [], []
            x = None
            for l in range(n_layers):
                h_prev = hs[l]
                c_prev = cs[l]
                h_bf = h_prev.astype(mxu_dtype)
                if l == 0:
                    # input half precomputed; recurrent half only.
                    g = gates0_sc[t] + jnp.dot(
                        h_bf, w_hh0, preferred_element_type=jnp.float32)
                else:
                    # two dots instead of concat + one dot (no XLU on the
                    # serial chain; second MXU push pipelines behind the first).
                    g = (jnp.dot(x.astype(mxu_dtype), w_ih_ups[l - 1],
                                 preferred_element_type=jnp.float32)
                         + jnp.dot(h_bf, w_hh_ups[l - 1],
                                   preferred_element_type=jnp.float32)
                         + b_ups[l - 1])
                h_new, c_new = cell(g, c_prev)
                new_h.append(h_new)
                new_c.append(c_new)
                x = h_new
            # lane-dense (tb, HP) store of tanh(h_top) for this timestep
            out_ref[t] = jnp.tanh(x)
            return (tuple(new_h), tuple(new_c))

        # Within-chunk state carried in registers (small: tb x HP per array;
        # cap tb in the wrapper for very large batch*hidden to avoid spills).
        h_init = tuple(h_sc[l] for l in range(n_layers))
        c_init = tuple(c_sc[l] for l in range(n_layers))
        hs, cs = jax.lax.fori_loop(0, tc, step, (h_init, c_init),
                                   unroll=unroll)

        # Persist state for the next time chunk.
        for l in range(n_layers):
            h_sc[l] = hs[l]
            c_sc[l] = cs[l]

    return kernel


# ---------------------------------------------------------------------------
# Plain-JAX glue: ResFNN initial-state networks (Sequential(ResFNN, Tanh()))
# ---------------------------------------------------------------------------
def resfnn_tanh(x, p, input_dim: int, hidden_dim: int):
    h = jax.nn.leaky_relu(x @ p["w1"].T + p["b1"], 0.01)
    if input_dim == hidden_dim:
        h = x + h
    h2 = jax.nn.leaky_relu(h @ p["w2"].T + p["b2"], 0.01)
    h2 = h + h2
    out = jnp.tanh(h2) @ p["w3"].T + p["b3"]
    return jnp.tanh(out)   # outer Tanh() from nn.Sequential(ResFNN, Tanh())


# ---------------------------------------------------------------------------
# Wrapper: full LSTMGenerator.forward (given pre-sampled noise z, z0)
# ---------------------------------------------------------------------------
def lstm_generator_forward(z, z0, params, *, n_layers: int, hidden_dim: int,
                           use_bf16_mxu: bool = True):
    batch, n_lags, input_dim = z.shape
    H = hidden_dim
    HP = _round_up(H, 128)                    # lane-aligned gate block width
    output_dim = params["linear_w"].shape[0]
    mxu_dtype = jnp.bfloat16 if use_bf16_mxu else jnp.float32

    # Initial hidden / cell states from the two ResFNN heads (tiny, one-off).
    h0_flat = resfnn_tanh(z0, params["initial_nn"], input_dim, H)
    c0_flat = resfnn_tanh(z0, params["initial_nn1"], input_dim, H)
    h0 = h0_flat.reshape(batch, n_layers, H).transpose(1, 0, 2)
    c0 = c0_flat.reshape(batch, n_layers, H).transpose(1, 0, 2)
    h0p = jnp.pad(h0, ((0, 0), (0, 0), (0, HP - H))).astype(jnp.float32)
    c0p = jnp.pad(c0, ((0, 0), (0, 0), (0, HP - H))).astype(jnp.float32)

    # time-major for the kernel
    z_tm = jnp.transpose(z, (1, 0, 2)).astype(jnp.float32)

    # Batch tile: split across the grid only on multi-TC chips (v7x).
    tb = batch
    if _num_tensorcores_per_chip() >= 2 and batch % 16 == 0:
        tb = batch // 2
    assert batch % tb == 0 and (tb % 8 == 0 or tb == batch)
    nb = batch // tb

    # Time chunk: bounds per-chunk scratch & enables z-in / act-out pipelining.
    tc = _pick_time_chunk(n_lags, 32)
    nt = n_lags // tc

    # --- weight prep: transpose, lane-align gate blocks, cast to bf16 -------
    lp0 = params["lstm"][0]
    w_ih0 = _pad_gate_cols(lp0["w_ih"].T, H, HP).astype(mxu_dtype)        # (in, 4HP)
    w_hh0 = _pad_rows(_pad_gate_cols(lp0["w_hh"].T, H, HP), H, HP).astype(mxu_dtype)
    b0 = _pad_gate_cols((lp0["b_ih"] + lp0["b_hh"]).reshape(1, 4 * H),
                        H, HP).astype(jnp.float32)

    inputs = [z_tm, h0p, c0p, w_ih0, w_hh0, b0]
    in_specs = [
        pl.BlockSpec((tc, tb, input_dim), lambda b, t: (t, b, 0)),
        pl.BlockSpec((n_layers, tb, HP), lambda b, t: (0, b, 0)),
        pl.BlockSpec((n_layers, tb, HP), lambda b, t: (0, b, 0)),
        pl.BlockSpec(w_ih0.shape, lambda b, t: (0, 0)),
        pl.BlockSpec(w_hh0.shape, lambda b, t: (0, 0)),
        pl.BlockSpec(b0.shape, lambda b, t: (0, 0)),
    ]
    for l in range(1, n_layers):
        lp = params["lstm"][l]
        w_ih = _pad_rows(_pad_gate_cols(lp["w_ih"].T, H, HP), H, HP).astype(mxu_dtype)
        w_hh = _pad_rows(_pad_gate_cols(lp["w_hh"].T, H, HP), H, HP).astype(mxu_dtype)
        b = _pad_gate_cols((lp["b_ih"] + lp["b_hh"]).reshape(1, 4 * H),
                           H, HP).astype(jnp.float32)
        inputs += [w_ih, w_hh, b]
        in_specs += [
            pl.BlockSpec((HP, 4 * HP), lambda b, t: (0, 0)),
            pl.BlockSpec((HP, 4 * HP), lambda b, t: (0, 0)),
            pl.BlockSpec((1, 4 * HP), lambda b, t: (0, 0)),
        ]

    # --- explicit scoped-VMEM limit (estimate with headroom, clamp to 64MiB) -
    wbytes = 2 if use_bf16_mxu else 4
    weight_bytes = (input_dim * 4 * HP + (2 * n_layers - 1) * HP * 4 * HP) * wbytes \
        + n_layers * 4 * HP * 4
    block_bytes = 2 * (tc * tb * input_dim * 4          # z (double-buffered)
                       + 2 * n_layers * tb * HP * 4     # h0, c0
                       + tc * tb * HP * 4               # out
                       + weight_bytes)
    scratch_bytes = 2 * n_layers * tb * HP * 4 + tc * tb * 4 * HP * 4
    vmem_limit = int(min(max(2 * (block_bytes + scratch_bytes), 32 << 20),
                         64 << 20))

    kernel = make_lstm_kernel(n_layers, tc, HP, input_dim, tb, mxu_dtype)

    act_tm = pl.pallas_call(
        kernel,
        out_shape=jax.ShapeDtypeStruct((n_lags, batch, HP), jnp.float32),
        grid=(nb, nt),
        in_specs=in_specs,
        out_specs=pl.BlockSpec((tc, tb, HP), lambda b, t: (t, b, 0)),
        scratch_shapes=[
            pltpu.VMEM((n_layers, tb, HP), jnp.float32),   # h state (persists)
            pltpu.VMEM((n_layers, tb, HP), jnp.float32),   # c state (persists)
            pltpu.VMEM((tc, tb, 4 * HP), jnp.float32),     # layer-0 gates/chunk
        ],
        compiler_params=pltpu.CompilerParams(
            dimension_semantics=("parallel", "arbitrary"),
            vmem_limit_bytes=vmem_limit),
    )(*inputs)

    # Tiny lane-sparse H -> output_dim projection done in XLA (kernel output
    # stays lane-dense at HP=128).
    w_out_p = jnp.pad(params["linear_w"].T, ((0, HP - H), (0, 0))).astype(jnp.float32)
    out_tm = jnp.einsum("tbh,ho->tbo", act_tm, w_out_p,
                        precision=jax.lax.Precision.HIGHEST)

    # back to PyTorch batch-first (batch, n_lags, output_dim)
    return jnp.transpose(out_tm, (1, 0, 2))


# ---------------------------------------------------------------------------
# Deterministic parameter initialization (PyTorch layouts; synthetic values)
# ---------------------------------------------------------------------------
def init_params(key, input_dim, output_dim, hidden_dim, n_layers):
    ks = iter(jax.random.split(key, 64))
    scale = 0.2

    def norm(shape):
        return (scale * jax.random.normal(next(ks), shape)).astype(jnp.float32)

    def resfnn_params():
        return {
            "w1": norm((hidden_dim, input_dim)),
            "b1": norm((hidden_dim,)),
            "w2": norm((hidden_dim, hidden_dim)),
            "b2": norm((hidden_dim,)),
            "w3": norm((hidden_dim * n_layers, hidden_dim)),
            "b3": norm((hidden_dim * n_layers,)),
        }

    lstm_layers = []
    for l in range(n_layers):
        in_l = input_dim if l == 0 else hidden_dim
        lstm_layers.append({
            "w_ih": norm((4 * hidden_dim, in_l)),       # PyTorch weight_ih_l{l}
            "w_hh": norm((4 * hidden_dim, hidden_dim)),  # PyTorch weight_hh_l{l}
            "b_ih": norm((4 * hidden_dim,)),
            "b_hh": norm((4 * hidden_dim,)),
        })

    return {
        "initial_nn": resfnn_params(),
        "initial_nn1": resfnn_params(),
        "lstm": lstm_layers,
        "linear_w": norm((output_dim, hidden_dim)),      # Linear(hidden, out, bias=False)
    }


# ---------------------------------------------------------------------------
# Pure-JAX reference for the forward pass (checks the kernel)
# ---------------------------------------------------------------------------
def lstm_generator_ref(z, z0, params, *, n_layers, hidden_dim):
    batch, n_lags, input_dim = z.shape
    H = hidden_dim
    h0_flat = resfnn_tanh(z0, params["initial_nn"], input_dim, H)
    c0_flat = resfnn_tanh(z0, params["initial_nn1"], input_dim, H)
    h = [h0_flat.reshape(batch, n_layers, H).transpose(1, 0, 2)[l]
         for l in range(n_layers)]
    c = [c0_flat.reshape(batch, n_layers, H).transpose(1, 0, 2)[l]
         for l in range(n_layers)]
    outs = []
    for t in range(n_lags):
        x = z[:, t]
        for l in range(n_layers):
            p = params["lstm"][l]
            gates = x @ p["w_ih"].T + h[l] @ p["w_hh"].T + p["b_ih"] + p["b_hh"]
            i_g = jax.nn.sigmoid(gates[:, :H])
            f_g = jax.nn.sigmoid(gates[:, H:2 * H])
            g_g = jnp.tanh(gates[:, 2 * H:3 * H])
            o_g = jax.nn.sigmoid(gates[:, 3 * H:])
            c[l] = f_g * c[l] + i_g * g_g
            h[l] = o_g * jnp.tanh(c[l])
            x = h[l]
        outs.append(jnp.tanh(x) @ params["linear_w"].T)
    return jnp.stack(outs, axis=1)


if __name__ == "__main__":
    # Small shapes consistent with the module's forward signature.
    batch_size = 8
    n_lags = 8
    input_dim = 4
    output_dim = 4
    hidden_dim = 32
    n_layers = 2
    noise_scale = 0.3  # BM=False path

    root = jax.random.PRNGKey(0)
    k_params, k_z, k_z0 = jax.random.split(root, 3)

    params = init_params(k_params, input_dim, output_dim, hidden_dim, n_layers)

    # z = noise_scale * randn(batch, n_lags, input_dim); BM=False -> no cumsum
    z = (noise_scale * jax.random.normal(k_z, (batch_size, n_lags, input_dim))
         ).astype(jnp.float32)
    # z0 = noise_scale * randn(batch, input_dim)
    z0 = (noise_scale * jax.random.normal(k_z0, (batch_size, input_dim))
          ).astype(jnp.float32)

    fwd = functools.partial(lstm_generator_forward,
                            n_layers=n_layers, hidden_dim=hidden_dim,
                            use_bf16_mxu=True)
    x = jax.jit(fwd)(z, z0, params)
    x = jax.block_until_ready(x)

    assert x.shape == (batch_size, n_lags, output_dim)

    x_ref = lstm_generator_ref(z, z0, params,
                               n_layers=n_layers, hidden_dim=hidden_dim)
    # bf16 MXU operands -> bf16-level tolerance (error compounds over n_lags).
    np.testing.assert_allclose(np.asarray(x), np.asarray(x_ref),
                               rtol=2e-2, atol=2e-2)

    print("KERNEL_OK")
</pallas_src>

<mosaic_0001>
module attributes {stable_mosaic.version = 11 : i64} {
  func.func @kernel(%arg0: i32, %arg1: i32, %arg2: memref<8x8x4xf32, #tpu.memory_space<vmem>>, %arg3: memref<2x8x128xf32, #tpu.memory_space<vmem>>, %arg4: memref<2x8x128xf32, #tpu.memory_space<vmem>>, %arg5: memref<4x512xbf16, #tpu.memory_space<vmem>>, %arg6: memref<128x512xbf16, #tpu.memory_space<vmem>>, %arg7: memref<1x512xf32, #tpu.memory_space<vmem>>, %arg8: memref<128x512xbf16, #tpu.memory_space<vmem>>, %arg9: memref<128x512xbf16, #tpu.memory_space<vmem>>, %arg10: memref<1x512xf32, #tpu.memory_space<vmem>>, %arg11: memref<8x8x128xf32, #tpu.memory_space<vmem>>, %arg12: memref<2x8x128xf32, #tpu.memory_space<vmem>>, %arg13: memref<2x8x128xf32, #tpu.memory_space<vmem>>, %arg14: memref<8x8x512xf32, #tpu.memory_space<vmem>>) attributes {dimension_semantics = [#tpu.dimension_semantics<parallel>, #tpu.dimension_semantics<arbitrary>], iteration_bounds = array<i64: 1, 1>, scalar_prefetch = 0 : i64, scratch_operands = 3 : i64, tpu.core_type = #tpu.core_type<tc>, window_params = [{transform_indices = @transform_0, window_bounds = array<i64: 8, 8, 4>}, {transform_indices = @transform_1, window_bounds = array<i64: 2, 8, 128>}, {transform_indices = @transform_2, window_bounds = array<i64: 2, 8, 128>}, {pipeline_mode = #tpu.pipeline_mode<synchronous>, transform_indices = @transform_3, window_bounds = array<i64: 4, 512>}, {pipeline_mode = #tpu.pipeline_mode<synchronous>, transform_indices = @transform_4, window_bounds = array<i64: 128, 512>}, {pipeline_mode = #tpu.pipeline_mode<synchronous>, transform_indices = @transform_5, window_bounds = array<i64: 1, 512>}, {pipeline_mode = #tpu.pipeline_mode<synchronous>, transform_indices = @transform_6, window_bounds = array<i64: 128, 512>}, {pipeline_mode = #tpu.pipeline_mode<synchronous>, transform_indices = @transform_7, window_bounds = array<i64: 128, 512>}, {pipeline_mode = #tpu.pipeline_mode<synchronous>, transform_indices = @transform_8, window_bounds = array<i64: 1, 512>}, {transform_indices = @transform_9, window_bounds = array<i64: 8, 8, 128>}]} {
    %c0_i32 = arith.constant 0 : i32
    %0 = arith.cmpi eq, %arg1, %c0_i32 : i32
    %1 = arith.extui %0 : i1 to i32
    %c0_i32_0 = arith.constant 0 : i32
    %2 = arith.cmpi ne, %1, %c0_i32_0 : i32
    scf.if %2 {
      %c0_146 = arith.constant 0 : index
      %c0_147 = arith.constant 0 : index
      %c0_148 = arith.constant 0 : index
      %575 = vector.load %arg3[%c0_146, %c0_147, %c0_148] : memref<2x8x128xf32, #tpu.memory_space<vmem>>, vector<2x8x128xf32>
      %c0_149 = arith.constant 0 : index
      %c0_150 = arith.constant 0 : index
      %c0_151 = arith.constant 0 : index
      %576 = vector.load %arg12[%c0_149, %c0_150, %c0_151] : memref<2x8x128xf32, #tpu.memory_space<vmem>>, vector<2x8x128xf32>
      tpu.vector_store %arg12[%c0_149, %c0_150, %c0_151], %575 {strides = array<i32>} : memref<2x8x128xf32, #tpu.memory_space<vmem>>, vector<2x8x128xf32>,
      %c0_152 = arith.constant 0 : index
      %c0_153 = arith.constant 0 : index
      %c0_154 = arith.constant 0 : index
      %577 = vector.load %arg4[%c0_152, %c0_153, %c0_154] : memref<2x8x128xf32, #tpu.memory_space<vmem>>, vector<2x8x128xf32>
      %c0_155 = arith.constant 0 : index
      %c0_156 = arith.constant 0 : index
      %c0_157 = arith.constant 0 : index
      %578 = vector.load %arg13[%c0_155, %c0_156, %c0_157] : memref<2x8x128xf32, #tpu.memory_space<vmem>>, vector<2x8x128xf32>
      tpu.vector_store %arg13[%c0_155, %c0_156, %c0_157], %577 {strides = array<i32>} : memref<2x8x128xf32, #tpu.memory_space<vmem>>, vector<2x8x128xf32>,
    } else {
    }
    %c0 = arith.constant 0 : index
    %c0_1 = arith.constant 0 : index
    %c0_2 = arith.constant 0 : index
    %3 = vector.load %arg2[%c0, %c0_1, %c0_2] : memref<8x8x4xf32, #tpu.memory_space<vmem>>, vector<8x8x4xf32>
    %4 = vector.shape_cast %3 : vector<8x8x4xf32> to vector<64x4xf32>
    %5 = arith.truncf %4 : vector<64x4xf32> to vector<64x4xbf16>
    %c0_3 = arith.constant 0 : index
    %c0_4 = arith.constant 0 : index
    %6 = vector.load %arg5[%c0_3, %c0_4] : memref<4x512xbf16, #tpu.memory_space<vmem>>, vector<4x512xbf16>
    %cst = arith.constant dense<0.000000e+00> : vector<64x512xf32>
    %7 = tpu.matmul %5, %6, %cst {dimension_numbers = #tpu.dot_dimension_numbers<[1], [0], [0], [1], [0, 0, 1, 1], [], []>} : vector<64x4xbf16>, vector<4x512xbf16>, vector<64x512xf32> -> vector<64x512xf32>
    %c0_5 = arith.constant 0 : index
    %c0_6 = arith.constant 0 : index
    %8 = vector.load %arg7[%c0_5, %c0_6] : memref<1x512xf32, #tpu.memory_space<vmem>>, vector<1x512xf32>
    %9 = vector.broadcast %8 : vector<1x512xf32> to vector<64x512xf32>
    %10 = arith.addf %7, %9 : vector<64x512xf32>
    %11 = vector.shape_cast %10 : vector<64x512xf32> to vector<8x8x512xf32>
    %c0_7 = arith.constant 0 : index
    %c0_8 = arith.constant 0 : index
    %c0_9 = arith.constant 0 : index
    %12 = vector.load %arg14[%c0_7, %c0_8, %c0_9] : memref<8x8x512xf32, #tpu.memory_space<vmem>>, vector<8x8x512xf32>
    tpu.vector_store %arg14[%c0_7, %c0_8, %c0_9], %11 {strides = array<i32>} : memref<8x8x512xf32, #tpu.memory_space<vmem>>, vector<8x8x512xf32>,
    %c0_10 = arith.constant 0 : index
    %c0_11 = arith.constant 0 : index
    %13 = vector.load %arg6[%c0_10, %c0_11] : memref<128x512xbf16, #tpu.memory_space<vmem>>, vector<128x512xbf16>
    %c0_12 = arith.constant 0 : index
    %c0_13 = arith.constant 0 : index
    %14 = vector.load %arg8[%c0_12, %c0_13] : memref<128x512xbf16, #tpu.memory_space<vmem>>, vector<128x512xbf16>
    %c0_14 = arith.constant 0 : index
    %c0_15 = arith.constant 0 : index
    %15 = vector.load %arg9[%c0_14, %c0_15] : memref<128x512xbf16, #tpu.memory_space<vmem>>, vector<128x512xbf16>
    %c0_16 = arith.constant 0 : index
    %c0_17 = arith.constant 0 : index
    %16 = vector.load %arg10[%c0_16, %c0_17] : memref<1x512xf32, #tpu.memory_space<vmem>>, vector<1x512xf32>
    %17 = vector.shape_cast %16 : vector<1x512xf32> to vector<1x512xf32>
    %18 = vector.broadcast %17 : vector<1x512xf32> to vector<8x512xf32>
    %c0_18 = arith.constant 0 : index
    %c0_19 = arith.constant 0 : index
    %c0_20 = arith.constant 0 : index
    %19 = vector.load %arg12[%c0_18, %c0_19, %c0_20] : memref<2x8x128xf32, #tpu.memory_space<vmem>>, vector<1x8x128xf32>
    %20 = vector.shape_cast %19 : vector<1x8x128xf32> to vector<8x128xf32>
    %c1 = arith.constant 1 : index
    %c0_21 = arith.constant 0 : index
    %c0_22 = arith.constant 0 : index
    %21 = vector.load %arg12[%c1, %c0_21, %c0_22] : memref<2x8x128xf32, #tpu.memory_space<vmem>>, vector<1x8x128xf32>
    %22 = vector.shape_cast %21 : vector<1x8x128xf32> to vector<8x128xf32>
    %c0_23 = arith.constant 0 : index
    %c0_24 = arith.constant 0 : index
    %c0_25 = arith.constant 0 : index
    %23 = vector.load %arg13[%c0_23, %c0_24, %c0_25] : memref<2x8x128xf32, #tpu.memory_space<vmem>>, vector<1x8x128xf32>
    %24 = vector.shape_cast %23 : vector<1x8x128xf32> to vector<8x128xf32>
    %c1_26 = arith.constant 1 : index
    %c0_27 = arith.constant 0 : index
    %c0_28 = arith.constant 0 : index
    %25 = vector.load %arg13[%c1_26, %c0_27, %c0_28] : memref<2x8x128xf32, #tpu.memory_space<vmem>>, vector<1x8x128xf32>
    %26 = vector.shape_cast %25 : vector<1x8x128xf32> to vector<8x128xf32>
    %c0_i32_29 = arith.constant 0 : i32
    %27 = arith.truncf %20 : vector<8x128xf32> to vector<8x128xbf16>
    %28 = arith.index_cast %c0_i32_29 : i32 to index
    %c0_30 = arith.constant 0 : index
    %c0_31 = arith.constant 0 : index
    %29 = vector.load %arg14[%28, %c0_30, %c0_31] : memref<8x8x512xf32, #tpu.memory_space<vmem>>, vector<1x8x512xf32>
    %30 = vector.shape_cast %29 : vector<1x8x512xf32> to vector<8x512xf32>
    %cst_32 = arith.constant dense<0.000000e+00> : vector<8x512xf32>
    %31 = tpu.matmul %27, %13, %cst_32 {dimension_numbers = #tpu.dot_dimension_numbers<[1], [0], [0], [1], [0, 0, 1, 1], [], []>} : vector<8x128xbf16>, vector<128x512xbf16>, vector<8x512xf32> -> vector<8x512xf32>
    %32 = arith.addf %30, %31 : vector<8x512xf32>
    %33 = vector.extract_strided_slice %32 {offsets = [0, 0], sizes = [8, 128], strides = [1, 1]} : vector<8x512xf32> to vector<8x128xf32>
    %34 = arith.negf %33 : vector<8x128xf32>
    %35 = math.exp %34 : vector<8x128xf32>
    %cst_33 = arith.constant 1.000000e+00 : f32
    %36 = vector.broadcast %cst_33 : f32 to vector<8x128xf32>
    %37 = arith.addf %36, %35 : vector<8x128xf32>
    %38 = arith.divf %36, %37 : vector<8x128xf32>
    %39 = vector.extract_strided_slice %32 {offsets = [0, 128], sizes = [8, 128], strides = [1, 1]} : vector<8x512xf32> to vector<8x128xf32>
    %40 = arith.negf %39 : vector<8x128xf32>
    %41 = math.exp %40 : vector<8x128xf32>
    %cst_34 = arith.constant 1.000000e+00 : f32
    %42 = vector.broadcast %cst_34 : f32 to vector<8x128xf32>
    %43 = arith.addf %42, %41 : vector<8x128xf32>
    %44 = arith.divf %42, %43 : vector<8x128xf32>
    %45 = vector.extract_strided_slice %32 {offsets = [0, 256], sizes = [8, 128], strides = [1, 1]} : vector<8x512xf32> to vector<8x128xf32>
    %46 = math.tanh %45 : vector<8x128xf32>
    %47 = vector.extract_strided_slice %32 {offsets = [0, 384], sizes = [8, 128], strides = [1, 1]} : vector<8x512xf32> to vector<8x128xf32>
    %48 = arith.negf %47 : vector<8x128xf32>
    %49 = math.exp %48 : vector<8x128xf32>
    %cst_35 = arith.constant 1.000000e+00 : f32
    %50 = vector.broadcast %cst_35 : f32 to vector<8x128xf32>
    %51 = arith.addf %50, %49 : vector<8x128xf32>
    %52 = arith.divf %50, %51 : vector<8x128xf32>
    %53 = arith.mulf %44, %24 : vector<8x128xf32>
    %54 = arith.mulf %38, %46 : vector<8x128xf32>
    %55 = arith.addf %53, %54 : vector<8x128xf32>
    %56 = math.tanh %55 : vector<8x128xf32>
    %57 = arith.mulf %52, %56 : vector<8x128xf32>
    %58 = arith.truncf %22 : vector<8x128xf32> to vector<8x128xbf16>
    %59 = arith.truncf %57 : vector<8x128xf32> to vector<8x128xbf16>
    %cst_36 = arith.constant dense<0.000000e+00> : vector<8x512xf32>
    %60 = tpu.matmul %59, %14, %cst_36 {dimension_numbers = #tpu.dot_dimension_numbers<[1], [0], [0], [1], [0, 0, 1, 1], [], []>} : vector<8x128xbf16>, vector<128x512xbf16>, vector<8x512xf32> -> vector<8x512xf32>
    %cst_37 = arith.constant dense<0.000000e+00> : vector<8x512xf32>
    %61 = tpu.matmul %58, %15, %cst_37 {dimension_numbers = #tpu.dot_dimension_numbers<[1], [0], [0], [1], [0, 0, 1, 1], [], []>} : vector<8x128xbf16>, vector<128x512xbf16>, vector<8x512xf32> -> vector<8x512xf32>
    %62 = arith.addf %60, %61 : vector<8x512xf32>
    %63 = arith.addf %62, %18 : vector<8x512xf32>
    %64 = vector.extract_strided_slice %63 {offsets = [0, 0], sizes = [8, 128], strides = [1, 1]} : vector<8x512xf32> to vector<8x128xf32>
    %65 = arith.negf %64 : vector<8x128xf32>
    %66 = math.exp %65 : vector<8x128xf32>
    %cst_38 = arith.constant 1.000000e+00 : f32
    %67 = vector.broadcast %cst_38 : f32 to vector<8x128xf32>
    %68 = arith.addf %67, %66 : vector<8x128xf32>
    %69 = arith.divf %67, %68 : vector<8x128xf32>
    %70 = vector.extract_strided_slice %63 {offsets = [0, 128], sizes = [8, 128], strides = [1, 1]} : vector<8x512xf32> to vector<8x128xf32>
    %71 = arith.negf %70 : vector<8x128xf32>
    %72 = math.exp %71 : vector<8x128xf32>
    %cst_39 = arith.constant 1.000000e+00 : f32
    %73 = vector.broadcast %cst_39 : f32 to vector<8x128xf32>
    %74 = arith.addf %73, %72 : vector<8x128xf32>
    %75 = arith.divf %73, %74 : vector<8x128xf32>
    %76 = vector.extract_strided_slice %63 {offsets = [0, 256], sizes = [8, 128], strides = [1, 1]} : vector<8x512xf32> to vector<8x128xf32>
    %77 = math.tanh %76 : vector<8x128xf32>
    %78 = vector.extract_strided_slice %63 {offsets = [0, 384], sizes = [8, 128], strides = [1, 1]} : vector<8x512xf32> to vector<8x128xf32>
    %79 = arith.negf %78 : vector<8x128xf32>
    %80 = math.exp %79 : vector<8x128xf32>
    %cst_40 = arith.constant 1.000000e+00 : f32
    %81 = vector.broadcast %cst_40 : f32 to vector<8x128xf32>
    %82 = arith.addf %81, %80 : vector<8x128xf32>
    %83 = arith.divf %81, %82 : vector<8x128xf32>
    %84 = arith.mulf %75, %26 : vector<8x128xf32>
    %85 = arith.mulf %69, %77 : vector<8x128xf32>
    %86 = arith.addf %84, %85 : vector<8x128xf32>
    %87 = math.tanh %86 : vector<8x128xf32>
    %88 = arith.mulf %83, %87 : vector<8x128xf32>
    %89 = math.tanh %88 : vector<8x128xf32>
    %90 = arith.index_cast %c0_i32_29 : i32 to index
    %c0_41 = arith.constant 0 : index
    %c0_42 = arith.constant 0 : index
    %91 = vector.load %arg11[%90, %c0_41, %c0_42] : memref<8x8x128xf32, #tpu.memory_space<vmem>>, vector<1x8x128xf32>
    %92 = vector.shape_cast %91 : vector<1x8x128xf32> to vector<8x128xf32>
    %93 = vector.shape_cast %89 : vector<8x128xf32> to vector<1x8x128xf32>
    tpu.vector_store %arg11[%90, %c0_41, %c0_42], %93 {strides = array<i32>} : memref<8x8x128xf32, #tpu.memory_space<vmem>>, vector<1x8x128xf32>,
    %c1_i32 = arith.constant 1 : i32
    %94 = arith.truncf %57 : vector<8x128xf32> to vector<8x128xbf16>
    %95 = arith.index_cast %c1_i32 : i32 to index
    %c0_43 = arith.constant 0 : index
    %c0_44 = arith.constant 0 : index
    %96 = vector.load %arg14[%95, %c0_43, %c0_44] : memref<8x8x512xf32, #tpu.memory_space<vmem>>, vector<1x8x512xf32>
    %97 = vector.shape_cast %96 : vector<1x8x512xf32> to vector<8x512xf32>
    %cst_45 = arith.constant dense<0.000000e+00> : vector<8x512xf32>
    %98 = tpu.matmul %94, %13, %cst_45 {dimension_numbers = #tpu.dot_dimension_numbers<[1], [0], [0], [1], [0, 0, 1, 1], [], []>} : vector<8x128xbf16>, vector<128x512xbf16>, vector<8x512xf32> -> vector<8x512xf32>
    %99 = arith.addf %97, %98 : vector<8x512xf32>
    %100 = vector.extract_strided_slice %99 {offsets = [0, 0], sizes = [8, 128], strides = [1, 1]} : vector<8x512xf32> to vector<8x128xf32>
    %101 = arith.negf %100 : vector<8x128xf32>
    %102 = math.exp %101 : vector<8x128xf32>
    %cst_46 = arith.constant 1.000000e+00 : f32
    %103 = vector.broadcast %cst_46 : f32 to vector<8x128xf32>
    %104 = arith.addf %103, %102 : vector<8x128xf32>
    %105 = arith.divf %103, %104 : vector<8x128xf32>
    %106 = vector.extract_strided_slice %99 {offsets = [0, 128], sizes = [8, 128], strides = [1, 1]} : vector<8x512xf32> to vector<8x128xf32>
    %107 = arith.negf %106 : vector<8x128xf32>
    %108 = math.exp %107 : vector<8x128xf32>
    %cst_47 = arith.constant 1.000000e+00 : f32
    %109 = vector.broadcast %cst_47 : f32 to vector<8x128xf32>
    %110 = arith.addf %109, %108 : vector<8x128xf32>
    %111 = arith.divf %109, %110 : vector<8x128xf32>
    %112 = vector.extract_strided_slice %99 {offsets = [0, 256], sizes = [8, 128], strides = [1, 1]} : vector<8x512xf32> to vector<8x128xf32>
    %113 = math.tanh %112 : vector<8x128xf32>
    %114 = vector.extract_strided_slice %99 {offsets = [0, 384], sizes = [8, 128], strides = [1, 1]} : vector<8x512xf32> to vector<8x128xf32>
    %115 = arith.negf %114 : vector<8x128xf32>
    %116 = math.exp %115 : vector<8x128xf32>
    %cst_48 = arith.constant 1.000000e+00 : f32
    %117 = vector.broadcast %cst_48 : f32 to vector<8x128xf32>
    %118 = arith.addf %117, %116 : vector<8x128xf32>
    %119 = arith.divf %117, %118 : vector<8x128xf32>
    %120 = arith.mulf %111, %55 : vector<8x128xf32>
    %121 = arith.mulf %105, %113 : vector<8x128xf32>
    %122 = arith.addf %120, %121 : vector<8x128xf32>
    %123 = math.tanh %122 : vector<8x128xf32>
    %124 = arith.mulf %119, %123 : vector<8x128xf32>
    %125 = arith.truncf %88 : vector<8x128xf32> to vector<8x128xbf16>
    %126 = arith.truncf %124 : vector<8x128xf32> to vector<8x128xbf16>
    %cst_49 = arith.constant dense<0.000000e+00> : vector<8x512xf32>
    %127 = tpu.matmul %126, %14, %cst_49 {dimension_numbers = #tpu.dot_dimension_numbers<[1], [0], [0], [1], [0, 0, 1, 1], [], []>} : vector<8x128xbf16>, vector<128x512xbf16>, vector<8x512xf32> -> vector<8x512xf32>
    %cst_50 = arith.constant dense<0.000000e+00> : vector<8x512xf32>
    %128 = tpu.matmul %125, %15, %cst_50 {dimension_numbers = #tpu.dot_dimension_numbers<[1], [0], [0], [1], [0, 0, 1, 1], [], []>} : vector<8x128xbf16>, vector<128x512xbf16>, vector<8x512xf32> -> vector<8x512xf32>
    %129 = arith.addf %127, %128 : vector<8x512xf32>
    %130 = arith.addf %129, %18 : vector<8x512xf32>
    %131 = vector.extract_strided_slice %130 {offsets = [0, 0], sizes = [8, 128], strides = [1, 1]} : vector<8x512xf32> to vector<8x128xf32>
    %132 = arith.negf %131 : vector<8x128xf32>
    %133 = math.exp %132 : vector<8x128xf32>
    %cst_51 = arith.constant 1.000000e+00 : f32
    %134 = vector.broadcast %cst_51 : f32 to vector<8x128xf32>
    %135 = arith.addf %134, %133 : vector<8x128xf32>
    %136 = arith.divf %134, %135 : vector<8x128xf32>
    %137 = vector.extract_strided_slice %130 {offsets = [0, 128], sizes = [8, 128], strides = [1, 1]} : vector<8x512xf32> to vector<8x128xf32>
    %138 = arith.negf %137 : vector<8x128xf32>
    %139 = math.exp %138 : vector<8x128xf32>
    %cst_52 = arith.constant 1.000000e+00 : f32
    %140 = vector.broadcast %cst_52 : f32 to vector<8x128xf32>
    %141 = arith.addf %140, %139 : vector<8x128xf32>
    %142 = arith.divf %140, %141 : vector<8x128xf32>
    %143 = vector.extract_strided_slice %130 {offsets = [0, 256], sizes = [8, 128], strides = [1, 1]} : vector<8x512xf32> to vector<8x128xf32>
    %144 = math.tanh %143 : vector<8x128xf32>
    %145 = vector.extract_strided_slice %130 {offsets = [0, 384], sizes = [8, 128], strides = [1, 1]} : vector<8x512xf32> to vector<8x128xf32>
    %146 = arith.negf %145 : vector<8x128xf32>
    %147 = math.exp %146 : vector<8x128xf32>
    %cst_53 = arith.constant 1.000000e+00 : f32
    %148 = vector.broadcast %cst_53 : f32 to vector<8x128xf32>
    %149 = arith.addf %148, %147 : vector<8x128xf32>
    %150 = arith.divf %148, %149 : vector<8x128xf32>
    %151 = arith.mulf %142, %86 : vector<8x128xf32>
    %152 = arith.mulf %136, %144 : vector<8x128xf32>
    %153 = arith.addf %151, %152 : vector<8x128xf32>
    %154 = math.tanh %153 : vector<8x128xf32>
    %155 = arith.mulf %150, %154 : vector<8x128xf32>
    %156 = math.tanh %155 : vector<8x128xf32>
    %157 = arith.index_cast %c1_i32 : i32 to index
    %c0_54 = arith.constant 0 : index
    %c0_55 = arith.constant 0 : index
    %158 = vector.load %arg11[%157, %c0_54, %c0_55] : memref<8x8x128xf32, #tpu.memory_space<vmem>>, vector<1x8x128xf32>
    %159 = vector.shape_cast %158 : vector<1x8x128xf32> to vector<8x128xf32>
    %160 = vector.shape_cast %156 : vector<8x128xf32> to vector<1x8x128xf32>
    tpu.vector_store %arg11[%157, %c0_54, %c0_55], %160 {strides = array<i32>} : memref<8x8x128xf32, #tpu.memory_space<vmem>>, vector<1x8x128xf32>,
    %c2_i32 = arith.constant 2 : i32
    %161 = arith.truncf %124 : vector<8x128xf32> to vector<8x128xbf16>
    %162 = arith.index_cast %c2_i32 : i32 to index
    %c0_56 = arith.constant 0 : index
    %c0_57 = arith.constant 0 : index
    %163 = vector.load %arg14[%162, %c0_56, %c0_57] : memref<8x8x512xf32, #tpu.memory_space<vmem>>, vector<1x8x512xf32>
    %164 = vector.shape_cast %163 : vector<1x8x512xf32> to vector<8x512xf32>
    %cst_58 = arith.constant dense<0.000000e+00> : vector<8x512xf32>
    %165 = tpu.matmul %161, %13, %cst_58 {dimension_numbers = #tpu.dot_dimension_numbers<[1], [0], [0], [1], [0, 0, 1, 1], [], []>} : vector<8x128xbf16>, vector<128x512xbf16>, vector<8x512xf32> -> vector<8x512xf32>
    %166 = arith.addf %164, %165 : vector<8x512xf32>
    %167 = vector.extract_strided_slice %166 {offsets = [0, 0], sizes = [8, 128], strides = [1, 1]} : vector<8x512xf32> to vector<8x128xf32>
    %168 = arith.negf %167 : vector<8x128xf32>
    %169 = math.exp %168 : vector<8x128xf32>
    %cst_59 = arith.constant 1.000000e+00 : f32
    %170 = vector.broadcast %cst_59 : f32 to vector<8x128xf32>
    %171 = arith.addf %170, %169 : vector<8x128xf32>
    %172 = arith.divf %170, %171 : vector<8x128xf32>
    %173 = vector.extract_strided_slice %166 {offsets = [0, 128], sizes = [8, 128], strides = [1, 1]} : vector<8x512xf32> to vector<8x128xf32>
    %174 = arith.negf %173 : vector<8x128xf32>
    %175 = math.exp %174 : vector<8x128xf32>
    %cst_60 = arith.constant 1.000000e+00 : f32
    %176 = vector.broadcast %cst_60 : f32 to vector<8x128xf32>
    %177 = arith.addf %176, %175 : vector<8x128xf32>
    %178 = arith.divf %176, %177 : vector<8x128xf32>
    %179 = vector.extract_strided_slice %166 {offsets = [0, 256], sizes = [8, 128], strides = [1, 1]} : vector<8x512xf32> to vector<8x128xf32>
    %180 = math.tanh %179 : vector<8x128xf32>
    %181 = vector.extract_strided_slice %166 {offsets = [0, 384], sizes = [8, 128], strides = [1, 1]} : vector<8x512xf32> to vector<8x128xf32>
    %182 = arith.negf %181 : vector<8x128xf32>
    %183 = math.exp %182 : vector<8x128xf32>
    %cst_61 = arith.constant 1.000000e+00 : f32
    %184 = vector.broadcast %cst_61 : f32 to vector<8x128xf32>
    %185 = arith.addf %184, %183 : vector<8x128xf32>
    %186 = arith.divf %184, %185 : vector<8x128xf32>
    %187 = arith.mulf %178, %122 : vector<8x128xf32>
    %188 = arith.mulf %172, %180 : vector<8x128xf32>
    %189 = arith.addf %187, %188 : vector<8x128xf32>
    %190 = math.tanh %189 : vector<8x128xf32>
    %191 = arith.mulf %186, %190 : vector<8x128xf32>
    %192 = arith.truncf %155 : vector<8x128xf32> to vector<8x128xbf16>
    %193 = arith.truncf %191 : vector<8x128xf32> to vector<8x128xbf16>
    %cst_62 = arith.constant dense<0.000000e+00> : vector<8x512xf32>
    %194 = tpu.matmul %193, %14, %cst_62 {dimension_numbers = #tpu.dot_dimension_numbers<[1], [0], [0], [1], [0, 0, 1, 1], [], []>} : vector<8x128xbf16>, vector<128x512xbf16>, vector<8x512xf32> -> vector<8x512xf32>
    %cst_63 = arith.constant dense<0.000000e+00> : vector<8x512xf32>
    %195 = tpu.matmul %192, %15, %cst_63 {dimension_numbers = #tpu.dot_dimension_numbers<[1], [0], [0], [1], [0, 0, 1, 1], [], []>} : vector<8x128xbf16>, vector<128x512xbf16>, vector<8x512xf32> -> vector<8x512xf32>
    %196 = arith.addf %194, %195 : vector<8x512xf32>
    %197 = arith.addf %196, %18 : vector<8x512xf32>
    %198 = vector.extract_strided_slice %197 {offsets = [0, 0], sizes = [8, 128], strides = [1, 1]} : vector<8x512xf32> to vector<8x128xf32>
    %199 = arith.negf %198 : vector<8x128xf32>
    %200 = math.exp %199 : vector<8x128xf32>
    %cst_64 = arith.constant 1.000000e+00 : f32
    %201 = vector.broadcast %cst_64 : f32 to vector<8x128xf32>
    %202 = arith.addf %201, %200 : vector<8x128xf32>
    %203 = arith.divf %201, %202 : vector<8x128xf32>
    %204 = vector.extract_strided_slice %197 {offsets = [0, 128], sizes = [8, 128], strides = [1, 1]} : vector<8x512xf32> to vector<8x128xf32>
    %205 = arith.negf %204 : vector<8x128xf32>
    %206 = math.exp %205 : vector<8x128xf32>
    %cst_65 = arith.constant 1.000000e+00 : f32
    %207 = vector.broadcast %cst_65 : f32 to vector<8x128xf32>
    %208 = arith.addf %207, %206 : vector<8x128xf32>
    %209 = arith.divf %207, %208 : vector<8x128xf32>
    %210 = vector.extract_strided_slice %197 {offsets = [0, 256], sizes = [8, 128], strides = [1, 1]} : vector<8x512xf32> to vector<8x128xf32>
    %211 = math.tanh %210 : vector<8x128xf32>
    %212 = vector.extract_strided_slice %197 {offsets = [0, 384], sizes = [8, 128], strides = [1, 1]} : vector<8x512xf32> to vector<8x128xf32>
    %213 = arith.negf %212 : vector<8x128xf32>
    %214 = math.exp %213 : vector<8x128xf32>
    %cst_66 = arith.constant 1.000000e+00 : f32
    %215 = vector.broadcast %cst_66 : f32 to vector<8x128xf32>
    %216 = arith.addf %215, %214 : vector<8x128xf32>
    %217 = arith.divf %215, %216 : vector<8x128xf32>
    %218 = arith.mulf %209, %153 : vector<8x128xf32>
    %219 = arith.mulf %203, %211 : vector<8x128xf32>
    %220 = arith.addf %218, %219 : vector<8x128xf32>
    %221 = math.tanh %220 : vector<8x128xf32>
    %222 = arith.mulf %217, %221 : vector<8x128xf32>
    %223 = math.tanh %222 : vector<8x128xf32>
    %224 = arith.index_cast %c2_i32 : i32 to index
    %c0_67 = arith.constant 0 : index
    %c0_68 = arith.constant 0 : index
    %225 = vector.load %arg11[%224, %c0_67, %c0_68] : memref<8x8x128xf32, #tpu.memory_space<vmem>>, vector<1x8x128xf32>
    %226 = vector.shape_cast %225 : vector<1x8x128xf32> to vector<8x128xf32>
    %227 = vector.shape_cast %223 : vector<8x128xf32> to vector<1x8x128xf32>
    tpu.vector_store %arg11[%224, %c0_67, %c0_68], %227 {strides = array<i32>} : memref<8x8x128xf32, #tpu.memory_space<vmem>>, vector<1x8x128xf32>,
    %c3_i32 = arith.constant 3 : i32
    %228 = arith.truncf %191 : vector<8x128xf32> to vector<8x128xbf16>
    %229 = arith.index_cast %c3_i32 : i32 to index
    %c0_69 = arith.constant 0 : index
    %c0_70 = arith.constant 0 : index
    %230 = vector.load %arg14[%229, %c0_69, %c0_70] : memref<8x8x512xf32, #tpu.memory_space<vmem>>, vector<1x8x512xf32>
    %231 = vector.shape_cast %230 : vector<1x8x512xf32> to vector<8x512xf32>
    %cst_71 = arith.constant dense<0.000000e+00> : vector<8x512xf32>
    %232 = tpu.matmul %228, %13, %cst_71 {dimension_numbers = #tpu.dot_dimension_numbers<[1], [0], [0], [1], [0, 0, 1, 1], [], []>} : vector<8x128xbf16>, vector<128x512xbf16>, vector<8x512xf32> -> vector<8x512xf32>
    %233 = arith.addf %231, %232 : vector<8x512xf32>
    %234 = vector.extract_strided_slice %233 {offsets = [0, 0], sizes = [8, 128], strides = [1, 1]} : vector<8x512xf32> to vector<8x128xf32>
    %235 = arith.negf %234 : vector<8x128xf32>
    %236 = math.exp %235 : vector<8x128xf32>
    %cst_72 = arith.constant 1.000000e+00 : f32
    %237 = vector.broadcast %cst_72 : f32 to vector<8x128xf32>
    %238 = arith.addf %237, %236 : vector<8x128xf32>
    %239 = arith.divf %237, %238 : vector<8x128xf32>
    %240 = vector.extract_strided_slice %233 {offsets = [0, 128], sizes = [8, 128], strides = [1, 1]} : vector<8x512xf32> to vector<8x128xf32>
    %241 = arith.negf %240 : vector<8x128xf32>
    %242 = math.exp %241 : vector<8x128xf32>
    %cst_73 = arith.constant 1.000000e+00 : f32
    %243 = vector.broadcast %cst_73 : f32 to vector<8x128xf32>
    %244 = arith.addf %243, %242 : vector<8x128xf32>
    %245 = arith.divf %243, %244 : vector<8x128xf32>
    %246 = vector.extract_strided_slice %233 {offsets = [0, 256], sizes = [8, 128], strides = [1, 1]} : vector<8x512xf32> to vector<8x128xf32>
    %247 = math.tanh %246 : vector<8x128xf32>
    %248 = vector.extract_strided_slice %233 {offsets = [0, 384], sizes = [8, 128], strides = [1, 1]} : vector<8x512xf32> to vector<8x128xf32>
    %249 = arith.negf %248 : vector<8x128xf32>
    %250 = math.exp %249 : vector<8x128xf32>
    %cst_74 = arith.constant 1.000000e+00 : f32
    %251 = vector.broadcast %cst_74 : f32 to vector<8x128xf32>
    %252 = arith.addf %251, %250 : vector<8x128xf32>
    %253 = arith.divf %251, %252 : vector<8x128xf32>
    %254 = arith.mulf %245, %189 : vector<8x128xf32>
    %255 = arith.mulf %239, %247 : vector<8x128xf32>
    %256 = arith.addf %254, %255 : vector<8x128xf32>
    %257 = math.tanh %256 : vector<8x128xf32>
    %258 = arith.mulf %253, %257 : vector<8x128xf32>
    %259 = arith.truncf %222 : vector<8x128xf32> to vector<8x128xbf16>
    %260 = arith.truncf %258 : vector<8x128xf32> to vector<8x128xbf16>
    %cst_75 = arith.constant dense<0.000000e+00> : vector<8x512xf32>
    %261 = tpu.matmul %260, %14, %cst_75 {dimension_numbers = #tpu.dot_dimension_numbers<[1], [0], [0], [1], [0, 0, 1, 1], [], []>} : vector<8x128xbf16>, vector<128x512xbf16>, vector<8x512xf32> -> vector<8x512xf32>
    %cst_76 = arith.constant dense<0.000000e+00> : vector<8x512xf32>
    %262 = tpu.matmul %259, %15, %cst_76 {dimension_numbers = #tpu.dot_dimension_numbers<[1], [0], [0], [1], [0, 0, 1, 1], [], []>} : vector<8x128xbf16>, vector<128x512xbf16>, vector<8x512xf32> -> vector<8x512xf32>
    %263 = arith.addf %261, %262 : vector<8x512xf32>
    %264 = arith.addf %263, %18 : vector<8x512xf32>
    %265 = vector.extract_strided_slice %264 {offsets = [0, 0], sizes = [8, 128], strides = [1, 1]} : vector<8x512xf32> to vector<8x128xf32>
    %266 = arith.negf %265 : vector<8x128xf32>
    %267 = math.exp %266 : vector<8x128xf32>
    %cst_77 = arith.constant 1.000000e+00 : f32
    %268 = vector.broadcast %cst_77 : f32 to vector<8x128xf32>
    %269 = arith.addf %268, %267 : vector<8x128xf32>
    %270 = arith.divf %268, %269 : vector<8x128xf32>
    %271 = vector.extract_strided_slice %264 {offsets = [0, 128], sizes = [8, 128], strides = [1, 1]} : vector<8x512xf32> to vector<8x128xf32>
    %272 = arith.negf %271 : vector<8x128xf32>
    %273 = math.exp %272 : vector<8x128xf32>
    %cst_78 = arith.constant 1.000000e+00 : f32
    %274 = vector.broadcast %cst_78 : f32 to vector<8x128xf32>
    %275 = arith.addf %274, %273 : vector<8x128xf32>
    %276 = arith.divf %274, %275 : vector<8x128xf32>
    %277 = vector.extract_strided_slice %264 {offsets = [0, 256], sizes = [8, 128], strides = [1, 1]} : vector<8x512xf32> to vector<8x128xf32>
    %278 = math.tanh %277 : vector<8x128xf32>
    %279 = vector.extract_strided_slice %264 {offsets = [0, 384], sizes = [8, 128], strides = [1, 1]} : vector<8x512xf32> to vector<8x128xf32>
    %280 = arith.negf %279 : vector<8x128xf32>
    %281 = math.exp %280 : vector<8x128xf32>
    %cst_79 = arith.constant 1.000000e+00 : f32
    %282 = vector.broadcast %cst_79 : f32 to vector<8x128xf32>
    %283 = arith.addf %282, %281 : vector<8x128xf32>
    %284 = arith.divf %282, %283 : vector<8x128xf32>
    %285 = arith.mulf %276, %220 : vector<8x128xf32>
    %286 = arith.mulf %270, %278 : vector<8x128xf32>
    %287 = arith.addf %285, %286 : vector<8x128xf32>
    %288 = math.tanh %287 : vector<8x128xf32>
    %289 = arith.mulf %284, %288 : vector<8x128xf32>
    %290 = math.tanh %289 : vector<8x128xf32>
    %291 = arith.index_cast %c3_i32 : i32 to index
    %c0_80 = arith.constant 0 : index
    %c0_81 = arith.constant 0 : index
    %292 = vector.load %arg11[%291, %c0_80, %c0_81] : memref<8x8x128xf32, #tpu.memory_space<vmem>>, vector<1x8x128xf32>
    %293 = vector.shape_cast %292 : vector<1x8x128xf32> to vector<8x128xf32>
    %294 = vector.shape_cast %290 : vector<8x128xf32> to vector<1x8x128xf32>
    tpu.vector_store %arg11[%291, %c0_80, %c0_81], %294 {strides = array<i32>} : memref<8x8x128xf32, #tpu.memory_space<vmem>>, vector<1x8x128xf32>,
    %c4_i32 = arith.constant 4 : i32
    %295 = arith.truncf %258 : vector<8x128xf32> to vector<8x128xbf16>
    %296 = arith.index_cast %c4_i32 : i32 to index
    %c0_82 = arith.constant 0 : index
    %c0_83 = arith.constant 0 : index
    %297 = vector.load %arg14[%296, %c0_82, %c0_83] : memref<8x8x512xf32, #tpu.memory_space<vmem>>, vector<1x8x512xf32>
    %298 = vector.shape_cast %297 : vector<1x8x512xf32> to vector<8x512xf32>
    %cst_84 = arith.constant dense<0.000000e+00> : vector<8x512xf32>
    %299 = tpu.matmul %295, %13, %cst_84 {dimension_numbers = #tpu.dot_dimension_numbers<[1], [0], [0], [1], [0, 0, 1, 1], [], []>} : vector<8x128xbf16>, vector<128x512xbf16>, vector<8x512xf32> -> vector<8x512xf32>
    %300 = arith.addf %298, %299 : vector<8x512xf32>
    %301 = vector.extract_strided_slice %300 {offsets = [0, 0], sizes = [8, 128], strides = [1, 1]} : vector<8x512xf32> to vector<8x128xf32>
    %302 = arith.negf %301 : vector<8x128xf32>
    %303 = math.exp %302 : vector<8x128xf32>
    %cst_85 = arith.constant 1.000000e+00 : f32
    %304 = vector.broadcast %cst_85 : f32 to vector<8x128xf32>
    %305 = arith.addf %304, %303 : vector<8x128xf32>
    %306 = arith.divf %304, %305 : vector<8x128xf32>
    %307 = vector.extract_strided_slice %300 {offsets = [0, 128], sizes = [8, 128], strides = [1, 1]} : vector<8x512xf32> to vector<8x128xf32>
    %308 = arith.negf %307 : vector<8x128xf32>
    %309 = math.exp %308 : vector<8x128xf32>
    %cst_86 = arith.constant 1.000000e+00 : f32
    %310 = vector.broadcast %cst_86 : f32 to vector<8x128xf32>
    %311 = arith.addf %310, %309 : vector<8x128xf32>
    %312 = arith.divf %310, %311 : vector<8x128xf32>
    %313 = vector.extract_strided_slice %300 {offsets = [0, 256], sizes = [8, 128], strides = [1, 1]} : vector<8x512xf32> to vector<8x128xf32>
    %314 = math.tanh %313 : vector<8x128xf32>
    %315 = vector.extract_strided_slice %300 {offsets = [0, 384], sizes = [8, 128], strides = [1, 1]} : vector<8x512xf32> to vector<8x128xf32>
    %316 = arith.negf %315 : vector<8x128xf32>
    %317 = math.exp %316 : vector<8x128xf32>
    %cst_87 = arith.constant 1.000000e+00 : f32
    %318 = vector.broadcast %cst_87 : f32 to vector<8x128xf32>
    %319 = arith.addf %318, %317 : vector<8x128xf32>
    %320 = arith.divf %318, %319 : vector<8x128xf32>
    %321 = arith.mulf %312, %256 : vector<8x128xf32>
    %322 = arith.mulf %306, %314 : vector<8x128xf32>
    %323 = arith.addf %321, %322 : vector<8x128xf32>
    %324 = math.tanh %323 : vector<8x128xf32>
    %325 = arith.mulf %320, %324 : vector<8x128xf32>
    %326 = arith.truncf %289 : vector<8x128xf32> to vector<8x128xbf16>
    %327 = arith.truncf %325 : vector<8x128xf32> to vector<8x128xbf16>
    %cst_88 = arith.constant dense<0.000000e+00> : vector<8x512xf32>
    %328 = tpu.matmul %327, %14, %cst_88 {dimension_numbers = #tpu.dot_dimension_numbers<[1], [0], [0], [1], [0, 0, 1, 1], [], []>} : vector<8x128xbf16>, vector<128x512xbf16>, vector<8x512xf32> -> vector<8x512xf32>
    %cst_89 = arith.constant dense<0.000000e+00> : vector<8x512xf32>
    %329 = tpu.matmul %326, %15, %cst_89 {dimension_numbers = #tpu.dot_dimension_numbers<[1], [0], [0], [1], [0, 0, 1, 1], [], []>} : vector<8x128xbf16>, vector<128x512xbf16>, vector<8x512xf32> -> vector<8x512xf32>
    %330 = arith.addf %328, %329 : vector<8x512xf32>
    %331 = arith.addf %330, %18 : vector<8x512xf32>
    %332 = vector.extract_strided_slice %331 {offsets = [0, 0], sizes = [8, 128], strides = [1, 1]} : vector<8x512xf32> to vector<8x128xf32>
    %333 = arith.negf %332 : vector<8x128xf32>
    %334 = math.exp %333 : vector<8x128xf32>
    %cst_90 = arith.constant 1.000000e+00 : f32
    %335 = vector.broadcast %cst_90 : f32 to vector<8x128xf32>
    %336 = arith.addf %335, %334 : vector<8x128xf32>
    %337 = arith.divf %335, %336 : vector<8x128xf32>
    %338 = vector.extract_strided_slice %331 {offsets = [0, 128], sizes = [8, 128], strides = [1, 1]} : vector<8x512xf32> to vector<8x128xf32>
    %339 = arith.negf %338 : vector<8x128xf32>
    %340 = math.exp %339 : vector<8x128xf32>
    %cst_91 = arith.constant 1.000000e+00 : f32
    %341 = vector.broadcast %cst_91 : f32 to vector<8x128xf32>
    %342 = arith.addf %341, %340 : vector<8x128xf32>
    %343 = arith.divf %341, %342 : vector<8x128xf32>
    %344 = vector.extract_strided_slice %331 {offsets = [0, 256], sizes = [8, 128], strides = [1, 1]} : vector<8x512xf32> to vector<8x128xf32>
    %345 = math.tanh %344 : vector<8x128xf32>
    %346 = vector.extract_strided_slice %331 {offsets = [0, 384], sizes = [8, 128], strides = [1, 1]} : vector<8x512xf32> to vector<8x128xf32>
    %347 = arith.negf %346 : vector<8x128xf32>
    %348 = math.exp %347 : vector<8x128xf32>
    %cst_92 = arith.constant 1.000000e+00 : f32
    %349 = vector.broadcast %cst_92 : f32 to vector<8x128xf32>
    %350 = arith.addf %349, %348 : vector<8x128xf32>
    %351 = arith.divf %349, %350 : vector<8x128xf32>
    %352 = arith.mulf %343, %287 : vector<8x128xf32>
    %353 = arith.mulf %337, %345 : vector<8x128xf32>
    %354 = arith.addf %352, %353 : vector<8x128xf32>
    %355 = math.tanh %354 : vector<8x128xf32>
    %356 = arith.mulf %351, %355 : vector<8x128xf32>
    %357 = math.tanh %356 : vector<8x128xf32>
    %358 = arith.index_cast %c4_i32 : i32 to index
    %c0_93 = arith.constant 0 : index
    %c0_94 = arith.constant 0 : index
    %359 = vector.load %arg11[%358, %c0_93, %c0_94] : memref<8x8x128xf32, #tpu.memory_space<vmem>>, vector<1x8x128xf32>
    %360 = vector.shape_cast %359 : vector<1x8x128xf32> to vector<8x128xf32>
    %361 = vector.shape_cast %357 : vector<8x128xf32> to vector<1x8x128xf32>
    tpu.vector_store %arg11[%358, %c0_93, %c0_94], %361 {strides = array<i32>} : memref<8x8x128xf32, #tpu.memory_space<vmem>>, vector<1x8x128xf32>,
    %c5_i32 = arith.constant 5 : i32
    %362 = arith.truncf %325 : vector<8x128xf32> to vector<8x128xbf16>
    %363 = arith.index_cast %c5_i32 : i32 to index
    %c0_95 = arith.constant 0 : index
    %c0_96 = arith.constant 0 : index
    %364 = vector.load %arg14[%363, %c0_95, %c0_96] : memref<8x8x512xf32, #tpu.memory_space<vmem>>, vector<1x8x512xf32>
    %365 = vector.shape_cast %364 : vector<1x8x512xf32> to vector<8x512xf32>
    %cst_97 = arith.constant dense<0.000000e+00> : vector<8x512xf32>
    %366 = tpu.matmul %362, %13, %cst_97 {dimension_numbers = #tpu.dot_dimension_numbers<[1], [0], [0], [1], [0, 0, 1, 1], [], []>} : vector<8x128xbf16>, vector<128x512xbf16>, vector<8x512xf32> -> vector<8x512xf32>
    %367 = arith.addf %365, %366 : vector<8x512xf32>
    %368 = vector.extract_strided_slice %367 {offsets = [0, 0], sizes = [8, 128], strides = [1, 1]} : vector<8x512xf32> to vector<8x128xf32>
    %369 = arith.negf %368 : vector<8x128xf32>
    %370 = math.exp %369 : vector<8x128xf32>
    %cst_98 = arith.constant 1.000000e+00 : f32
    %371 = vector.broadcast %cst_98 : f32 to vector<8x128xf32>
    %372 = arith.addf %371, %370 : vector<8x128xf32>
    %373 = arith.divf %371, %372 : vector<8x128xf32>
    %374 = vector.extract_strided_slice %367 {offsets = [0, 128], sizes = [8, 128], strides = [1, 1]} : vector<8x512xf32> to vector<8x128xf32>
    %375 = arith.negf %374 : vector<8x128xf32>
    %376 = math.exp %375 : vector<8x128xf32>
    %cst_99 = arith.constant 1.000000e+00 : f32
    %377 = vector.broadcast %cst_99 : f32 to vector<8x128xf32>
    %378 = arith.addf %377, %376 : vector<8x128xf32>
    %379 = arith.divf %377, %378 : vector<8x128xf32>
    %380 = vector.extract_strided_slice %367 {offsets = [0, 256], sizes = [8, 128], strides = [1, 1]} : vector<8x512xf32> to vector<8x128xf32>
    %381 = math.tanh %380 : vector<8x128xf32>
    %382 = vector.extract_strided_slice %367 {offsets = [0, 384], sizes = [8, 128], strides = [1, 1]} : vector<8x512xf32> to vector<8x128xf32>
    %383 = arith.negf %382 : vector<8x128xf32>
    %384 = math.exp %383 : vector<8x128xf32>
    %cst_100 = arith.constant 1.000000e+00 : f32
    %385 = vector.broadcast %cst_100 : f32 to vector<8x128xf32>
    %386 = arith.addf %385, %384 : vector<8x128xf32>
    %387 = arith.divf %385, %386 : vector<8x128xf32>
    %388 = arith.mulf %379, %323 : vector<8x128xf32>
    %389 = arith.mulf %373, %381 : vector<8x128xf32>
    %390 = arith.addf %388, %389 : vector<8x128xf32>
    %391 = math.tanh %390 : vector<8x128xf32>
    %392 = arith.mulf %387, %391 : vector<8x128xf32>
    %393 = arith.truncf %356 : vector<8x128xf32> to vector<8x128xbf16>
    %394 = arith.truncf %392 : vector<8x128xf32> to vector<8x128xbf16>
    %cst_101 = arith.constant dense<0.000000e+00> : vector<8x512xf32>
    %395 = tpu.matmul %394, %14, %cst_101 {dimension_numbers = #tpu.dot_dimension_numbers<[1], [0], [0], [1], [0, 0, 1, 1], [], []>} : vector<8x128xbf16>, vector<128x512xbf16>, vector<8x512xf32> -> vector<8x512xf32>
    %cst_102 = arith.constant dense<0.000000e+00> : vector<8x512xf32>
    %396 = tpu.matmul %393, %15, %cst_102 {dimension_numbers = #tpu.dot_dimension_numbers<[1], [0], [0], [1], [0, 0, 1, 1], [], []>} : vector<8x128xbf16>, vector<128x512xbf16>, vector<8x512xf32> -> vector<8x512xf32>
    %397 = arith.addf %395, %396 : vector<8x512xf32>
    %398 = arith.addf %397, %18 : vector<8x512xf32>
    %399 = vector.extract_strided_slice %398 {offsets = [0, 0], sizes = [8, 128], strides = [1, 1]} : vector<8x512xf32> to vector<8x128xf32>
    %400 = arith.negf %399 : vector<8x128xf32>
    %401 = math.exp %400 : vector<8x128xf32>
    %cst_103 = arith.constant 1.000000e+00 : f32
    %402 = vector.broadcast %cst_103 : f32 to vector<8x128xf32>
    %403 = arith.addf %402, %401 : vector<8x128xf32>
    %404 = arith.divf %402, %403 : vector<8x128xf32>
    %405 = vector.extract_strided_slice %398 {offsets = [0, 128], sizes = [8, 128], strides = [1, 1]} : vector<8x512xf32> to vector<8x128xf32>
    %406 = arith.negf %405 : vector<8x128xf32>
    %407 = math.exp %406 : vector<8x128xf32>
    %cst_104 = arith.constant 1.000000e+00 : f32
    %408 = vector.broadcast %cst_104 : f32 to vector<8x128xf32>
    %409 = arith.addf %408, %407 : vector<8x128xf32>
    %410 = arith.divf %408, %409 : vector<8x128xf32>
    %411 = vector.extract_strided_slice %398 {offsets = [0, 256], sizes = [8, 128], strides = [1, 1]} : vector<8x512xf32> to vector<8x128xf32>
    %412 = math.tanh %411 : vector<8x128xf32>
    %413 = vector.extract_strided_slice %398 {offsets = [0, 384], sizes = [8, 128], strides = [1, 1]} : vector<8x512xf32> to vector<8x128xf32>
    %414 = arith.negf %413 : vector<8x128xf32>
    %415 = math.exp %414 : vector<8x128xf32>
    %cst_105 = arith.constant 1.000000e+00 : f32
    %416 = vector.broadcast %cst_105 : f32 to vector<8x128xf32>
    %417 = arith.addf %416, %415 : vector<8x128xf32>
    %418 = arith.divf %416, %417 : vector<8x128xf32>
    %419 = arith.mulf %410, %354 : vector<8x128xf32>
    %420 = arith.mulf %404, %412 : vector<8x128xf32>
    %421 = arith.addf %419, %420 : vector<8x128xf32>
    %422 = math.tanh %421 : vector<8x128xf32>
    %423 = arith.mulf %418, %422 : vector<8x128xf32>
    %424 = math.tanh %423 : vector<8x128xf32>
    %425 = arith.index_cast %c5_i32 : i32 to index
    %c0_106 = arith.constant 0 : index
    %c0_107 = arith.constant 0 : index
    %426 = vector.load %arg11[%425, %c0_106, %c0_107] : memref<8x8x128xf32, #tpu.memory_space<vmem>>, vector<1x8x128xf32>
    %427 = vector.shape_cast %426 : vector<1x8x128xf32> to vector<8x128xf32>
    %428 = vector.shape_cast %424 : vector<8x128xf32> to vector<1x8x128xf32>
    tpu.vector_store %arg11[%425, %c0_106, %c0_107], %428 {strides = array<i32>} : memref<8x8x128xf32, #tpu.memory_space<vmem>>, vector<1x8x128xf32>,
    %c6_i32 = arith.constant 6 : i32
    %429 = arith.truncf %392 : vector<8x128xf32> to vector<8x128xbf16>
    %430 = arith.index_cast %c6_i32 : i32 to index
    %c0_108 = arith.constant 0 : index
    %c0_109 = arith.constant 0 : index
    %431 = vector.load %arg14[%430, %c0_108, %c0_109] : memref<8x8x512xf32, #tpu.memory_space<vmem>>, vector<1x8x512xf32>
    %432 = vector.shape_cast %431 : vector<1x8x512xf32> to vector<8x512xf32>
    %cst_110 = arith.constant dense<0.000000e+00> : vector<8x512xf32>
    %433 = tpu.matmul %429, %13, %cst_110 {dimension_numbers = #tpu.dot_dimension_numbers<[1], [0], [0], [1], [0, 0, 1, 1], [], []>} : vector<8x128xbf16>, vector<128x512xbf16>, vector<8x512xf32> -> vector<8x512xf32>
    %434 = arith.addf %432, %433 : vector<8x512xf32>
    %435 = vector.extract_strided_slice %434 {offsets = [0, 0], sizes = [8, 128], strides = [1, 1]} : vector<8x512xf32> to vector<8x128xf32>
    %436 = arith.negf %435 : vector<8x128xf32>
    %437 = math.exp %436 : vector<8x128xf32>
    %cst_111 = arith.constant 1.000000e+00 : f32
    %438 = vector.broadcast %cst_111 : f32 to vector<8x128xf32>
    %439 = arith.addf %438, %437 : vector<8x128xf32>
    %440 = arith.divf %438, %439 : vector<8x128xf32>
    %441 = vector.extract_strided_slice %434 {offsets = [0, 128], sizes = [8, 128], strides = [1, 1]} : vector<8x512xf32> to vector<8x128xf32>
    %442 = arith.negf %441 : vector<8x128xf32>
    %443 = math.exp %442 : vector<8x128xf32>
    %cst_112 = arith.constant 1.000000e+00 : f32
    %444 = vector.broadcast %cst_112 : f32 to vector<8x128xf32>
    %445 = arith.addf %444, %443 : vector<8x128xf32>
    %446 = arith.divf %444, %445 : vector<8x128xf32>
    %447 = vector.extract_strided_slice %434 {offsets = [0, 256], sizes = [8, 128], strides = [1, 1]} : vector<8x512xf32> to vector<8x128xf32>
    %448 = math.tanh %447 : vector<8x128xf32>
    %449 = vector.extract_strided_slice %434 {offsets = [0, 384], sizes = [8, 128], strides = [1, 1]} : vector<8x512xf32> to vector<8x128xf32>
    %450 = arith.negf %449 : vector<8x128xf32>
    %451 = math.exp %450 : vector<8x128xf32>
    %cst_113 = arith.constant 1.000000e+00 : f32
    %452 = vector.broadcast %cst_113 : f32 to vector<8x128xf32>
    %453 = arith.addf %452, %451 : vector<8x128xf32>
    %454 = arith.divf %452, %453 : vector<8x128xf32>
    %455 = arith.mulf %446, %390 : vector<8x128xf32>
    %456 = arith.mulf %440, %448 : vector<8x128xf32>
    %457 = arith.addf %455, %456 : vector<8x128xf32>
    %458 = math.tanh %457 : vector<8x128xf32>
    %459 = arith.mulf %454, %458 : vector<8x128xf32>
    %460 = arith.truncf %423 : vector<8x128xf32> to vector<8x128xbf16>
    %461 = arith.truncf %459 : vector<8x128xf32> to vector<8x128xbf16>
    %cst_114 = arith.constant dense<0.000000e+00> : vector<8x512xf32>
    %462 = tpu.matmul %461, %14, %cst_114 {dimension_numbers = #tpu.dot_dimension_numbers<[1], [0], [0], [1], [0, 0, 1, 1], [], []>} : vector<8x128xbf16>, vector<128x512xbf16>, vector<8x512xf32> -> vector<8x512xf32>
    %cst_115 = arith.constant dense<0.000000e+00> : vector<8x512xf32>
    %463 = tpu.matmul %460, %15, %cst_115 {dimension_numbers = #tpu.dot_dimension_numbers<[1], [0], [0], [1], [0, 0, 1, 1], [], []>} : vector<8x128xbf16>, vector<128x512xbf16>, vector<8x512xf32> -> vector<8x512xf32>
    %464 = arith.addf %462, %463 : vector<8x512xf32>
    %465 = arith.addf %464, %18 : vector<8x512xf32>
    %466 = vector.extract_strided_slice %465 {offsets = [0, 0], sizes = [8, 128], strides = [1, 1]} : vector<8x512xf32> to vector<8x128xf32>
    %467 = arith.negf %466 : vector<8x128xf32>
    %468 = math.exp %467 : vector<8x128xf32>
    %cst_116 = arith.constant 1.000000e+00 : f32
    %469 = vector.broadcast %cst_116 : f32 to vector<8x128xf32>
    %470 = arith.addf %469, %468 : vector<8x128xf32>
    %471 = arith.divf %469, %470 : vector<8x128xf32>
    %472 = vector.extract_strided_slice %465 {offsets = [0, 128], sizes = [8, 128], strides = [1, 1]} : vector<8x512xf32> to vector<8x128xf32>
    %473 = arith.negf %472 : vector<8x128xf32>
    %474 = math.exp %473 : vector<8x128xf32>
    %cst_117 = arith.constant 1.000000e+00 : f32
    %475 = vector.broadcast %cst_117 : f32 to vector<8x128xf32>
    %476 = arith.addf %475, %474 : vector<8x128xf32>
    %477 = arith.divf %475, %476 : vector<8x128xf32>
    %478 = vector.extract_strided_slice %465 {offsets = [0, 256], sizes = [8, 128], strides = [1, 1]} : vector<8x512xf32> to vector<8x128xf32>
    %479 = math.tanh %478 : vector<8x128xf32>
    %480 = vector.extract_strided_slice %465 {offsets = [0, 384], sizes = [8, 128], strides = [1, 1]} : vector<8x512xf32> to vector<8x128xf32>
    %481 = arith.negf %480 : vector<8x128xf32>
    %482 = math.exp %481 : vector<8x128xf32>
    %cst_118 = arith.constant 1.000000e+00 : f32
    %483 = vector.broadcast %cst_118 : f32 to vector<8x128xf32>
    %484 = arith.addf %483, %482 : vector<8x128xf32>
    %485 = arith.divf %483, %484 : vector<8x128xf32>
    %486 = arith.mulf %477, %421 : vector<8x128xf32>
    %487 = arith.mulf %471, %479 : vector<8x128xf32>
    %488 = arith.addf %486, %487 : vector<8x128xf32>
    %489 = math.tanh %488 : vector<8x128xf32>
    %490 = arith.mulf %485, %489 : vector<8x128xf32>
    %491 = math.tanh %490 : vector<8x128xf32>
    %492 = arith.index_cast %c6_i32 : i32 to index
    %c0_119 = arith.constant 0 : index
    %c0_120 = arith.constant 0 : index
    %493 = vector.load %arg11[%492, %c0_119, %c0_120] : memref<8x8x128xf32, #tpu.memory_space<vmem>>, vector<1x8x128xf32>
    %494 = vector.shape_cast %493 : vector<1x8x128xf32> to vector<8x128xf32>
    %495 = vector.shape_cast %491 : vector<8x128xf32> to vector<1x8x128xf32>
    tpu.vector_store %arg11[%492, %c0_119, %c0_120], %495 {strides = array<i32>} : memref<8x8x128xf32, #tpu.memory_space<vmem>>, vector<1x8x128xf32>,
    %c7_i32 = arith.constant 7 : i32
    %496 = arith.truncf %459 : vector<8x128xf32> to vector<8x128xbf16>
    %497 = arith.index_cast %c7_i32 : i32 to index
    %c0_121 = arith.constant 0 : index
    %c0_122 = arith.constant 0 : index
    %498 = vector.load %arg14[%497, %c0_121, %c0_122] : memref<8x8x512xf32, #tpu.memory_space<vmem>>, vector<1x8x512xf32>
    %499 = vector.shape_cast %498 : vector<1x8x512xf32> to vector<8x512xf32>
    %cst_123 = arith.constant dense<0.000000e+00> : vector<8x512xf32>
    %500 = tpu.matmul %496, %13, %cst_123 {dimension_numbers = #tpu.dot_dimension_numbers<[1], [0], [0], [1], [0, 0, 1, 1], [], []>} : vector<8x128xbf16>, vector<128x512xbf16>, vector<8x512xf32> -> vector<8x512xf32>
    %501 = arith.addf %499, %500 : vector<8x512xf32>
    %502 = vector.extract_strided_slice %501 {offsets = [0, 0], sizes = [8, 128], strides = [1, 1]} : vector<8x512xf32> to vector<8x128xf32>
    %503 = arith.negf %502 : vector<8x128xf32>
    %504 = math.exp %503 : vector<8x128xf32>
    %cst_124 = arith.constant 1.000000e+00 : f32
    %505 = vector.broadcast %cst_124 : f32 to vector<8x128xf32>
    %506 = arith.addf %505, %504 : vector<8x128xf32>
    %507 = arith.divf %505, %506 : vector<8x128xf32>
    %508 = vector.extract_strided_slice %501 {offsets = [0, 128], sizes = [8, 128], strides = [1, 1]} : vector<8x512xf32> to vector<8x128xf32>
    %509 = arith.negf %508 : vector<8x128xf32>
    %510 = math.exp %509 : vector<8x128xf32>
    %cst_125 = arith.constant 1.000000e+00 : f32
    %511 = vector.broadcast %cst_125 : f32 to vector<8x128xf32>
    %512 = arith.addf %511, %510 : vector<8x128xf32>
    %513 = arith.divf %511, %512 : vector<8x128xf32>
    %514 = vector.extract_strided_slice %501 {offsets = [0, 256], sizes = [8, 128], strides = [1, 1]} : vector<8x512xf32> to vector<8x128xf32>
    %515 = math.tanh %514 : vector<8x128xf32>
    %516 = vector.extract_strided_slice %501 {offsets = [0, 384], sizes = [8, 128], strides = [1, 1]} : vector<8x512xf32> to vector<8x128xf32>
    %517 = arith.negf %516 : vector<8x128xf32>
    %518 = math.exp %517 : vector<8x128xf32>
    %cst_126 = arith.constant 1.000000e+00 : f32
    %519 = vector.broadcast %cst_126 : f32 to vector<8x128xf32>
    %520 = arith.addf %519, %518 : vector<8x128xf32>
    %521 = arith.divf %519, %520 : vector<8x128xf32>
    %522 = arith.mulf %513, %457 : vector<8x128xf32>
    %523 = arith.mulf %507, %515 : vector<8x128xf32>
    %524 = arith.addf %522, %523 : vector<8x128xf32>
    %525 = math.tanh %524 : vector<8x128xf32>
    %526 = arith.mulf %521, %525 : vector<8x128xf32>
    %527 = arith.truncf %490 : vector<8x128xf32> to vector<8x128xbf16>
    %528 = arith.truncf %526 : vector<8x128xf32> to vector<8x128xbf16>
    %cst_127 = arith.constant dense<0.000000e+00> : vector<8x512xf32>
    %529 = tpu.matmul %528, %14, %cst_127 {dimension_numbers = #tpu.dot_dimension_numbers<[1], [0], [0], [1], [0, 0, 1, 1], [], []>} : vector<8x128xbf16>, vector<128x512xbf16>, vector<8x512xf32> -> vector<8x512xf32>
    %cst_128 = arith.constant dense<0.000000e+00> : vector<8x512xf32>
    %530 = tpu.matmul %527, %15, %cst_128 {dimension_numbers = #tpu.dot_dimension_numbers<[1], [0], [0], [1], [0, 0, 1, 1], [], []>} : vector<8x128xbf16>, vector<128x512xbf16>, vector<8x512xf32> -> vector<8x512xf32>
    %531 = arith.addf %529, %530 : vector<8x512xf32>
    %532 = arith.addf %531, %18 : vector<8x512xf32>
    %533 = vector.extract_strided_slice %532 {offsets = [0, 0], sizes = [8, 128], strides = [1, 1]} : vector<8x512xf32> to vector<8x128xf32>
    %534 = arith.negf %533 : vector<8x128xf32>
    %535 = math.exp %534 : vector<8x128xf32>
    %cst_129 = arith.constant 1.000000e+00 : f32
    %536 = vector.broadcast %cst_129 : f32 to vector<8x128xf32>
    %537 = arith.addf %536, %535 : vector<8x128xf32>
    %538 = arith.divf %536, %537 : vector<8x128xf32>
    %539 = vector.extract_strided_slice %532 {offsets = [0, 128], sizes = [8, 128], strides = [1, 1]} : vector<8x512xf32> to vector<8x128xf32>
    %540 = arith.negf %539 : vector<8x128xf32>
    %541 = math.exp %540 : vector<8x128xf32>
    %cst_130 = arith.constant 1.000000e+00 : f32
    %542 = vector.broadcast %cst_130 : f32 to vector<8x128xf32>
    %543 = arith.addf %542, %541 : vector<8x128xf32>
    %544 = arith.divf %542, %543 : vector<8x128xf32>
    %545 = vector.extract_strided_slice %532 {offsets = [0, 256], sizes = [8, 128], strides = [1, 1]} : vector<8x512xf32> to vector<8x128xf32>
    %546 = math.tanh %545 : vector<8x128xf32>
    %547 = vector.extract_strided_slice %532 {offsets = [0, 384], sizes = [8, 128], strides = [1, 1]} : vector<8x512xf32> to vector<8x128xf32>
    %548 = arith.negf %547 : vector<8x128xf32>
    %549 = math.exp %548 : vector<8x128xf32>
    %cst_131 = arith.constant 1.000000e+00 : f32
    %550 = vector.broadcast %cst_131 : f32 to vector<8x128xf32>
    %551 = arith.addf %550, %549 : vector<8x128xf32>
    %552 = arith.divf %550, %551 : vector<8x128xf32>
    %553 = arith.mulf %544, %488 : vector<8x128xf32>
    %554 = arith.mulf %538, %546 : vector<8x128xf32>
    %555 = arith.addf %553, %554 : vector<8x128xf32>
    %556 = math.tanh %555 : vector<8x128xf32>
    %557 = arith.mulf %552, %556 : vector<8x128xf32>
    %558 = math.tanh %557 : vector<8x128xf32>
    %559 = arith.index_cast %c7_i32 : i32 to index
    %c0_132 = arith.constant 0 : index
    %c0_133 = arith.constant 0 : index
    %560 = vector.load %arg11[%559, %c0_132, %c0_133] : memref<8x8x128xf32, #tpu.memory_space<vmem>>, vector<1x8x128xf32>
    %561 = vector.shape_cast %560 : vector<1x8x128xf32> to vector<8x128xf32>
    %562 = vector.shape_cast %558 : vector<8x128xf32> to vector<1x8x128xf32>
    tpu.vector_store %arg11[%559, %c0_132, %c0_133], %562 {strides = array<i32>} : memref<8x8x128xf32, #tpu.memory_space<vmem>>, vector<1x8x128xf32>,
    %c8_i32 = arith.constant 8 : i32
    %c0_134 = arith.constant 0 : index
    %c0_135 = arith.constant 0 : index
    %c0_136 = arith.constant 0 : index
    %563 = vector.load %arg12[%c0_134, %c0_135, %c0_136] : memref<2x8x128xf32, #tpu.memory_space<vmem>>, vector<1x8x128xf32>
    %564 = vector.shape_cast %563 : vector<1x8x128xf32> to vector<8x128xf32>
    %565 = vector.shape_cast %526 : vector<8x128xf32> to vector<1x8x128xf32>
    tpu.vector_store %arg12[%c0_134, %c0_135, %c0_136], %565 {strides = array<i32>} : memref<2x8x128xf32, #tpu.memory_space<vmem>>, vector<1x8x128xf32>,
    %c0_137 = arith.constant 0 : index
    %c0_138 = arith.constant 0 : index
    %c0_139 = arith.constant 0 : index
    %566 = vector.load %arg13[%c0_137, %c0_138, %c0_139] : memref<2x8x128xf32, #tpu.memory_space<vmem>>, vector<1x8x128xf32>
    %567 = vector.shape_cast %566 : vector<1x8x128xf32> to vector<8x128xf32>
    %568 = vector.shape_cast %524 : vector<8x128xf32> to vector<1x8x128xf32>
    tpu.vector_store %arg13[%c0_137, %c0_138, %c0_139], %568 {strides = array<i32>} : memref<2x8x128xf32, #tpu.memory_space<vmem>>, vector<1x8x128xf32>,
    %c1_140 = arith.constant 1 : index
    %c0_141 = arith.constant 0 : index
    %c0_142 = arith.constant 0 : index
    %569 = vector.load %arg12[%c1_140, %c0_141, %c0_142] : memref<2x8x128xf32, #tpu.memory_space<vmem>>, vector<1x8x128xf32>
    %570 = vector.shape_cast %569 : vector<1x8x128xf32> to vector<8x128xf32>
    %571 = vector.shape_cast %557 : vector<8x128xf32> to vector<1x8x128xf32>
    tpu.vector_store %arg12[%c1_140, %c0_141, %c0_142], %571 {strides = array<i32>} : memref<2x8x128xf32, #tpu.memory_space<vmem>>, vector<1x8x128xf32>,
    %c1_143 = arith.constant 1 : index
    %c0_144 = arith.constant 0 : index
    %c0_145 = arith.constant 0 : index
    %572 = vector.load %arg13[%c1_143, %c0_144, %c0_145] : memref<2x8x128xf32, #tpu.memory_space<vmem>>, vector<1x8x128xf32>
    %573 = vector.shape_cast %572 : vector<1x8x128xf32> to vector<8x128xf32>
    %574 = vector.shape_cast %555 : vector<8x128xf32> to vector<1x8x128xf32>
    tpu.vector_store %arg13[%c1_143, %c0_144, %c0_145], %574 {strides = array<i32>} : memref<2x8x128xf32, #tpu.memory_space<vmem>>, vector<1x8x128xf32>,
    return
  }
  func.func @transform_0(%arg0: i32, %arg1: i32) -> (i32, i32, i32) {
    %c0_i32 = arith.constant 0 : i32
    %c0_i32_0 = arith.constant 0 : i32
    return %arg1, %arg0, %c0_i32 : i32, i32, i32
  }
  func.func @transform_1(%arg0: i32, %arg1: i32) -> (i32, i32, i32) {
    %c0_i32 = arith.constant 0 : i32
    %c0_i32_0 = arith.constant 0 : i32
    %c0_i32_1 = arith.constant 0 : i32
    return %c0_i32, %arg0, %c0_i32_0 : i32, i32, i32
  }
  func.func @transform_2(%arg0: i32, %arg1: i32) -> (i32, i32, i32) {
    %c0_i32 = arith.constant 0 : i32
    %c0_i32_0 = arith.constant 0 : i32
    %c0_i32_1 = arith.constant 0 : i32
    return %c0_i32, %arg0, %c0_i32_0 : i32, i32, i32
  }
  func.func @transform_3(%arg0: i32, %arg1: i32) -> (i32, i32) {
    %c0_i32 = arith.constant 0 : i32
    %c0_i32_0 = arith.constant 0 : i32
    %c0_i32_1 = arith.constant 0 : i32
    return %c0_i32, %c0_i32_0 : i32, i32
  }
  func.func @transform_4(%arg0: i32, %arg1: i32) -> (i32, i32) {
    %c0_i32 = arith.constant 0 : i32
    %c0_i32_0 = arith.constant 0 : i32
    %c0_i32_1 = arith.constant 0 : i32
    return %c0_i32, %c0_i32_0 : i32, i32
  }
  func.func @transform_5(%arg0: i32, %arg1: i32) -> (i32, i32) {
    %c0_i32 = arith.constant 0 : i32
    %c0_i32_0 = arith.constant 0 : i32
    %c0_i32_1 = arith.constant 0 : i32
    return %c0_i32, %c0_i32_0 : i32, i32
  }
  func.func @transform_6(%arg0: i32, %arg1: i32) -> (i32, i32) {
    %c0_i32 = arith.constant 0 : i32
    %c0_i32_0 = arith.constant 0 : i32
    %c0_i32_1 = arith.constant 0 : i32
    return %c0_i32, %c0_i32_0 : i32, i32
  }
  func.func @transform_7(%arg0: i32, %arg1: i32) -> (i32, i32) {
    %c0_i32 = arith.constant 0 : i32
    %c0_i32_0 = arith.constant 0 : i32
    %c0_i32_1 = arith.constant 0 : i32
    return %c0_i32, %c0_i32_0 : i32, i32
  }
  func.func @transform_8(%arg0: i32, %arg1: i32) -> (i32, i32) {
    %c0_i32 = arith.constant 0 : i32
    %c0_i32_0 = arith.constant 0 : i32
    %c0_i32_1 = arith.constant 0 : i32
    return %c0_i32, %c0_i32_0 : i32, i32
  }
  func.func @transform_9(%arg0: i32, %arg1: i32) -> (i32, i32, i32) {
    %c0_i32 = arith.constant 0 : i32
    %c0_i32_0 = arith.constant 0 : i32
    return %arg1, %arg0, %c0_i32 : i32, i32, i32
  }
}

</mosaic_0001>

<bundles_post_ra>
// kernel: lstm_generator_forward.1
= control target key start
LH: loop header
LB: loop body
LE: loop exit
PB: predicated region body
PF: predicated region fallthrough
CT: control target
= control target key end

     0   :  { %v60_v0 = vlaneseq  ;;  %v4181_v2 = vmov 1983009808   ;;  %v6825_v4 = vmov 0   ;;  %vm111_vm0 = vcmask 1041408   ;;  %s6815_s3 = inlined_call_operand.vmem [shape: bf16[4,512], index: 3, kind: input, shape index: {}]   ;;  %s6816_s4 = inlined_call_operand.vmem [shape: bf16[128,512], index: 4, kind: input, shape index: {}]   ;;  %s6817_s0 = inlined_call_operand.vmem [shape: f32[8,8,4], index: 0, kind: input, shape index: {}]   ;;  %s6818_s1 = inlined_call_operand.vmem [shape: f32[2,8,128], index: 1, kind: input, shape index: {}]   ;;  %s6819_s7 = inlined_call_operand.vmem [shape: bf16[128,512], index: 7, kind: input, shape index: {}]   ;;  %s6820_s6 = inlined_call_operand.vmem [shape: bf16[128,512], index: 6, kind: input, shape index: {}]   ;;  %s6821_s5 = inlined_call_operand.vmem [shape: f32[1,512], index: 5, kind: input, shape index: {}]   ;;  %s6822_s2 = inlined_call_operand.vmem [shape: f32[2,8,128], index: 2, kind: input, shape index: {}]   ;;  %s6823_s8 = inlined_call_operand.vmem [shape: f32[1,512], index: 8, kind: input, shape index: {}]   ;;  %s6824_s9 = inlined_call_operand.vmem [shape: f32[8,8,128], index: 9, kind: output, shape index: {}]  }
   0x1   :  { %v57_v1 = vld [vmem:[%s6815_s3] sm:$0xff]  ;;  %v83_v3 = vunpack.c.l.s4 %v4181_v2  ;;  %156 = vmatprep.mubr.bf16.mxu0 %v6825_v4  ;;  %229 = vmatprep.mubr.bf16.mxu1 %v6825_v4  ;;  %v46_v12 = vld [vmem:[%s6817_s0 + $0x8] sm:$0xff]  ;;  %vm98_vm1 = vcmask 31744   ;;  %v47_v26 = vld [vmem:[%s6817_s0 + $0x10] sm:$0xff] }
   0x2   :  { %v4238_v5 = vshrl.u32 %v60_v0, 7  ;;  %v81_v7 = vcombine.high %v57_v1, %v57_v1  ;;  %v45_v11 = vld [vmem:[%s6817_s0] sm:$0xff]  ;;  %v4255_v18 = vld [vmem:[%s6816_s4 + $0xc] ss:$16 sps:$4 sm:$0xff]   ;;  %v4265_v21 = vld [vmem:[%s6816_s4 + $0x8] ss:$16 sps:$4 sm:$0xff]  }
   0x3   :  { %v84_v6 = vunpack.c.0.s8 %v83_v3  ;;  %v4250_v13 = vld [vmem:[%s6816_s4 + $0x4] ss:$16 sps:$4 sm:$0xff]   ;;  %v53_v19 = vpack.c.bf16 %v46_v12, %v45_v11  ;;  %v4260_v20 = vld [vmem:[%s6816_s4] ss:$16 sps:$4 sm:$0xff]   ;;  %v4277_v23 = vld [vmem:[%s6816_s4 + $0x2c] ss:$16 sps:$4 sm:$0xff]  }
   0x4   :  { %7097 = vst [vmem:[#allocation5_spill] sm:$0xff] %v4238_v5  ;;  %v4272_v22 = vld [vmem:[%s6816_s4 + $0x24] ss:$16 sps:$4 sm:$0xff]   ;;  %v4282_v24 = vld [vmem:[%s6816_s4 + $0x20] ss:$16 sps:$4 sm:$0xff]   ;;  %v48_v27 = vld [vmem:[%s6817_s0 + $0x18] sm:$0xff] }
   0x5   :  { %v87_v8 = vsub.s32 %v84_v6, %v4238_v5  ;;  %v4287_v25 = vld [vmem:[%s6816_s4 + $0x28] ss:$16 sps:$4 sm:$0xff]   ;;  %v4302_v28 = vld [vmem:[%s6816_s4 + $0x44] ss:$16 sps:$4 sm:$0xff]   ;;  %v4309_v29 = vld [vmem:[%s6816_s4 + $0x4c] ss:$16 sps:$4 sm:$0xff]   ;;  %v54_v30 = vpack.c.bf16 %v48_v27, %v47_v26 }
   0x6   :  { %v4316_v31 = vld [vmem:[%s6816_s4 + $0x40] ss:$16 sps:$4 sm:$0xff]   ;;  %v4321_v32 = vld [vmem:[%s6816_s4 + $0x48] ss:$16 sps:$4 sm:$0xff]   ;;  %v4328_v33 = vld [vmem:[%s6816_s4 + $0x64] ss:$16 sps:$4 sm:$0xff]  }
   0x7   :  { %v88_v9 = vrot.slane %v57_v1, %v87_v8  ;;  %v95_v10 = vrot.slane %v81_v7, %v87_v8  ;;  %v4335_v34 = vld [vmem:[%s6816_s4 + $0x6c] ss:$16 sps:$4 sm:$0xff]   ;;  %v4340_v35 = vld [vmem:[%s6816_s4 + $0x60] ss:$16 sps:$4 sm:$0xff]   ;;  %v4347_v36 = vld [vmem:[%s6816_s4 + $0x68] ss:$16 sps:$4 sm:$0xff]  }
   0x8   :  { %v49_v37 = vld [vmem:[%s6817_s0 + $0x20] sm:$0xff]  ;;  %v50_v38 = vld [vmem:[%s6817_s0 + $0x28] sm:$0xff]  ;;  %v51_v48 = vld [vmem:[%s6817_s0 + $0x30] sm:$0xff] }
   0x9   :  { %v96_v14 = vcombine.high %v88_v9, %v88_v9  ;;  %v97_v15 = vcombine.high %v95_v10, %v95_v10  ;;  %v113_v16 = vsel %vm111_vm0, %v88_v9, 0  ;;  %v119_v17 = vsel %vm111_vm0, %v95_v10, 0  ;;  %v4362_v39 = vld [vmem:[%s6816_s4 + $0x84] ss:$16 sps:$4 sm:$0xff]   ;;  %v4367_v40 = vld [vmem:[%s6816_s4 + $0x8c] ss:$16 sps:$4 sm:$0xff]  }
   0xa   :  { %v55_v41 = vpack.c.bf16 %v50_v38, %v49_v37  ;;  %v4376_v42 = vld [vmem:[%s6816_s4 + $0x80] ss:$16 sps:$4 sm:$0xff]   ;;  %v4381_v43 = vld [vmem:[%s6816_s4 + $0x88] ss:$16 sps:$4 sm:$0xff]   ;;  %v4388_v44 = vld [vmem:[%s6816_s4 + $0xa4] ss:$16 sps:$4 sm:$0xff]  }
   0xb   :  { %3409 = vmatprep.subr.msk.bf16.mxu0 %vm111_vm0, %v96_v14  ;;  %3414 = vmatprep.subr.msk.bf16.mxu1 %vm111_vm0, %v97_v15  ;;  %v4393_v45 = vld [vmem:[%s6816_s4 + $0xac] ss:$16 sps:$4 sm:$0xff]   ;;  %v4400_v46 = vld [vmem:[%s6816_s4 + $0xa0] ss:$16 sps:$4 sm:$0xff]   ;;  %v4407_v47 = vld [vmem:[%s6816_s4 + $0xa8] ss:$16 sps:$4 sm:$0xff]  }
   0xc   :  { %125 = vmatpush1.bf16.msra.mxu0 %v113_v16  ;;  %198 = vmatpush1.bf16.msra.mxu1 %v119_v17  ;;  %v52_v49 = vld [vmem:[%s6817_s0 + $0x38] sm:$0xff]  ;;  %v4420_v50 = vld [vmem:[%s6816_s4 + $0xc4] ss:$16 sps:$4 sm:$0xff]   ;;  %v4434_v53 = vld [vmem:[%s6816_s4 + $0xc0] ss:$16 sps:$4 sm:$0xff]  }
   0xd   :  { %591 = vmatprep.subr.bf16.mxu0 %v4250_v13  ;;  %632 = vmatprep.subr.bf16.mxu1 %v4255_v18  ;;  %v4425_v51 = vld [vmem:[%s6816_s4 + $0xcc] ss:$16 sps:$4 sm:$0xff]   ;;  %v56_v52 = vpack.c.bf16 %v52_v49, %v51_v48  ;;  %v4439_v54 = vld [vmem:[%s6816_s4 + $0xc8] ss:$16 sps:$4 sm:$0xff]   ;;  %v4446_v55 = vld [vmem:[%s6816_s4 + $0xe4] ss:$16 sps:$4 sm:$0xff]  }
   0xe   :  { %v4451_v56 = vld [vmem:[%s6816_s4 + $0xec] ss:$16 sps:$4 sm:$0xff]   ;;  %v4460_v57 = vld [vmem:[%s6816_s4 + $0xe0] ss:$16 sps:$4 sm:$0xff]   ;;  %v4465_v58 = vld [vmem:[%s6816_s4 + $0xe8] ss:$16 sps:$4 sm:$0xff]  }
   0xf   :  { %3410 = vmatmul.mubr.msk.bf16.vlgmr.msra.gmra.mrb[0].mxu0 %vm98_vm1, %v53_v19  ;;  %3415 = vmatmul.mubr.msk.bf16.vlgmr.msra.gmra.mrb[0].mxu1 %vm98_vm1, %v53_v19  ;;  %v37_v59 = vld [vmem:[%s6818_s1] sm:$0xff]  ;;  %v4486_v62 = vld [vmem:[%s6819_s7 + $0xc] ss:$16 sps:$4 sm:$0xff]   ;;  %v4497_v0 = vld [vmem:[%s6819_s7 + $0x8] ss:$16 sps:$4 sm:$0xff]  }
  0x10   :  { %592 = vmatpush1.bf16.msra.mxu0 %v4260_v20  ;;  %633 = vmatpush1.bf16.msra.mxu1 %v4265_v21  ;;  %v426_v60 = vpack.c.bf16 %v37_v59, %v37_v59  ;;  %v4481_v61 = vld [vmem:[%s6819_s7 + $0x4] ss:$16 sps:$4 sm:$0xff]   ;;  %v4492_v63 = vld [vmem:[%s6819_s7] ss:$16 sps:$4 sm:$0xff]   ;;  %v4510_v2 = vld [vmem:[%s6819_s7 + $0x2c] ss:$16 sps:$4 sm:$0xff]  }
  0x11   :  { %593 = vmatprep.subr.bf16.mxu0 %v4272_v22  ;;  %634 = vmatprep.subr.bf16.mxu1 %v4277_v23  ;;  %v4505_v1 = vld [vmem:[%s6819_s7 + $0x24] ss:$16 sps:$4 sm:$0xff]   ;;  %v4515_v3 = vld [vmem:[%s6819_s7 + $0x20] ss:$16 sps:$4 sm:$0xff]   ;;  %v4521_v6 = vld [vmem:[%s6819_s7 + $0x28] ss:$16 sps:$4 sm:$0xff]  }
  0x12   :  { %166 = vmatprep.mubr.bf16.mxu0 %v6825_v4  ;;  %239 = vmatprep.mubr.bf16.mxu1 %v6825_v4  ;;  %v4529_v7 = vld [vmem:[%s6819_s7 + $0x44] ss:$16 sps:$4 sm:$0xff]   ;;  %v4534_v8 = vld [vmem:[%s6819_s7 + $0x4c] ss:$16 sps:$4 sm:$0xff]   ;;  %v4539_v9 = vld [vmem:[%s6819_s7 + $0x40] ss:$16 sps:$4 sm:$0xff]  }
  0x13   :  { %7098 = vst [vmem:[#allocation6_spill] sm:$0xff] %v4529_v7  ;;  %7099 = vst [vmem:[#allocation7_spill] sm:$0xff] %v4534_v8  ;;  %v4545_v10 = vld [vmem:[%s6819_s7 + $0x48] ss:$16 sps:$4 sm:$0xff]   ;;  %v4553_v11 = vld [vmem:[%s6819_s7 + $0x64] ss:$16 sps:$4 sm:$0xff]  }
  0x14   :  { %594 = vmatpush1.bf16.msra.mxu0 %v4282_v24  ;;  %635 = vmatpush1.bf16.msra.mxu1 %v4287_v25  ;;  %7100 = vst [vmem:[#allocation8_spill] sm:$0xff] %v4539_v9  ;;  %7101 = vst [vmem:[#allocation9_spill] sm:$0xff] %v4545_v10  ;;  %v4558_v12 = vld [vmem:[%s6819_s7 + $0x6c] ss:$16 sps:$4 sm:$0xff]   ;;  %v4563_v14 = vld [vmem:[%s6819_s7 + $0x60] ss:$16 sps:$4 sm:$0xff]  }
  0x15   :  { %595 = vmatprep.subr.bf16.mxu0 %v4302_v28  ;;  %636 = vmatprep.subr.bf16.mxu1 %v4309_v29  ;;  %7102 = vst [vmem:[#allocation10_spill] sm:$0xff] %v4553_v11  ;;  %7103 = vst [vmem:[#allocation11_spill] sm:$0xff] %v4558_v12  ;;  %v4569_v15 = vld [vmem:[%s6819_s7 + $0x68] ss:$16 sps:$4 sm:$0xff]   ;;  %v4577_v16 = vld [vmem:[%s6819_s7 + $0x84] ss:$16 sps:$4 sm:$0xff]  }
  0x16   :  { %7104 = vst [vmem:[#allocation12_spill] sm:$0xff] %v4563_v14  ;;  %7105 = vst [vmem:[#allocation13_spill] sm:$0xff] %v4569_v15  ;;  %v4582_v17 = vld [vmem:[%s6819_s7 + $0x8c] ss:$16 sps:$4 sm:$0xff]   ;;  %v4588_v19 = vld [vmem:[%s6819_s7 + $0x80] ss:$16 sps:$4 sm:$0xff]  }
  0x17   :  { %3411 = vmatmul.mubr.msk.bf16.gmra.mrb[4].mxu0 %vm98_vm1, %v54_v30  ;;  %3416 = vmatmul.mubr.msk.bf16.gmra.mrb[4].mxu1 %vm98_vm1, %v54_v30  ;;  %7106 = vst [vmem:[#allocation14_spill] sm:$0xff] %v4577_v16  ;;  %7107 = vst [vmem:[#allocation15_spill] sm:$0xff] %v4582_v17  ;;  %v4594_v26 = vld [vmem:[%s6819_s7 + $0x88] ss:$16 sps:$4 sm:$0xff]   ;;  %v4601_v27 = vld [vmem:[%s6819_s7 + $0xa4] ss:$16 sps:$4 sm:$0xff]  }
  0x18   :  { %596 = vmatpush1.bf16.msra.mxu0 %v4316_v31  ;;  %637 = vmatpush1.bf16.msra.mxu1 %v4321_v32  ;;  %7108 = vst [vmem:[#allocation16_spill] sm:$0xff] %v4588_v19  ;;  %7109 = vst [vmem:[#allocation17_spill] sm:$0xff] %v4594_v26  ;;  %v4606_v30 = vld [vmem:[%s6819_s7 + $0xac] ss:$16 sps:$4 sm:$0xff]   ;;  %v4611_v37 = vld [vmem:[%s6819_s7 + $0xa0] ss:$16 sps:$4 sm:$0xff]  }
  0x19   :  { %597 = vmatprep.subr.bf16.mxu0 %v4328_v33  ;;  %638 = vmatprep.subr.bf16.mxu1 %v4335_v34  ;;  %7110 = vst [vmem:[#allocation18_spill] sm:$0xff] %v4601_v27  ;;  %7111 = vst [vmem:[#allocation19_spill] sm:$0xff] %v4606_v30  ;;  %v4617_v38 = vld [vmem:[%s6819_s7 + $0xa8] ss:$16 sps:$4 sm:$0xff]   ;;  %v4630_v48 = vld [vmem:[%s6819_s7 + $0xcc] ss:$16 sps:$4 sm:$0xff]  }
  0x1a   :  { %176 = vmatprep.mubr.bf16.mxu0 %v6825_v4  ;;  %249 = vmatprep.mubr.bf16.mxu1 %v6825_v4  ;;  %7112 = vst [vmem:[#allocation20_spill] sm:$0xff] %v4611_v37  ;;  %7113 = vst [vmem:[#allocation21_spill] sm:$0xff] %v4617_v38  ;;  %v4635_v49 = vld [vmem:[%s6819_s7 + $0xc0] ss:$16 sps:$4 sm:$0xff]   ;;  %v4649_v59 = vld [vmem:[%s6819_s7 + $0xe4] ss:$16 sps:$4 sm:$0xff]  }
  0x1b   :  { %7115 = vst [vmem:[#allocation23_spill] sm:$0xff] %v4630_v48  ;;  %7116 = vst [vmem:[#allocation24_spill] sm:$0xff] %v4635_v49 }
  0x1c   :  { %598 = vmatpush1.bf16.msra.mxu0 %v4340_v35  ;;  %639 = vmatpush1.bf16.msra.mxu1 %v4347_v36  ;;  %7118 = vst [vmem:[#allocation26_spill] sm:$0xff] %v4649_v59 }
  0x1d   :  { %599 = vmatprep.subr.bf16.mxu0 %v4362_v39  ;;  %640 = vmatprep.subr.bf16.mxu1 %v4367_v40 }
  0x1f   :  { %3412 = vmatmul.mubr.msk.bf16.gmra.mrb[8].mxu0 %vm98_vm1, %v55_v41  ;;  %3417 = vmatmul.mubr.msk.bf16.gmra.mrb[8].mxu1 %vm98_vm1, %v55_v41  ;;  %v4625_v41 = vld [vmem:[%s6819_s7 + $0xc4] ss:$16 sps:$4 sm:$0xff]  }
  0x20   :  { %600 = vmatpush1.bf16.msra.mxu0 %v4376_v42  ;;  %641 = vmatpush1.bf16.msra.mxu1 %v4381_v43  ;;  %7114 = vst [vmem:[#allocation22_spill] sm:$0xff] %v4625_v41 }
  0x21   :  { %601 = vmatprep.subr.bf16.mxu0 %v4388_v44  ;;  %642 = vmatprep.subr.bf16.mxu1 %v4393_v45 }
  0x22   :  { %186 = vmatprep.mubr.bf16.mxu0 %v6825_v4  ;;  %259 = vmatprep.mubr.bf16.mxu1 %v6825_v4 }
  0x24   :  { %602 = vmatpush1.bf16.msra.mxu0 %v4400_v46  ;;  %643 = vmatpush1.bf16.msra.mxu1 %v4407_v47 }
  0x25   :  { %603 = vmatprep.subr.bf16.mxu0 %v4420_v50  ;;  %644 = vmatprep.subr.bf16.mxu1 %v4425_v51 }
  0x27   :  { %3413 = vmatmul.mubr.msk.bf16.gmra.mrb[12].mxu0 %vm98_vm1, %v56_v52  ;;  %3418 = vmatmul.mubr.msk.bf16.gmra.mrb[12].mxu1 %vm98_vm1, %v56_v52  ;;  %v4641_v52 = vld [vmem:[%s6819_s7 + $0xc8] ss:$16 sps:$4 sm:$0xff]  }
  0x28   :  { %604 = vmatpush1.bf16.msra.mxu0 %v4434_v53  ;;  %645 = vmatpush1.bf16.msra.mxu1 %v4439_v54  ;;  %7117 = vst [vmem:[#allocation25_spill] sm:$0xff] %v4641_v52 }
  0x29   :  { %605 = vmatprep.subr.bf16.mxu0 %v4446_v55  ;;  %646 = vmatprep.subr.bf16.mxu1 %v4451_v56 }
  0x2a   :  { %623 = vmatprep.mubr.bf16.mxu0 %v6825_v4  ;;  %664 = vmatprep.mubr.bf16.mxu1 %v6825_v4 }
  0x2c   :  { %606 = vmatpush1.bf16.msra.mxu0 %v4460_v57  ;;  %647 = vmatpush1.bf16.msra.mxu1 %v4465_v58 }
  0x2d   :  { %863 = vmatprep.subr.bf16.mxu0 %v4481_v61  ;;  %904 = vmatprep.subr.bf16.mxu1 %v4486_v62 }
  0x2f   :  { %624 = vmatmul.mubr.bf16.vlgmr.msra.gmra.mrb[16].mxu0 %v426_v60  ;;  %665 = vmatmul.mubr.bf16.vlgmr.msra.gmra.mrb[16].mxu1 %v426_v60  ;;  %v4654_v60 = vld [vmem:[%s6819_s7 + $0xec] ss:$16 sps:$4 sm:$0xff]  }
  0x30   :  { %895 = vmatprep.mubr.bf16.mxu0 %v6825_v4  ;;  %936 = vmatprep.mubr.bf16.mxu1 %v6825_v4  ;;  %7119 = vst [vmem:[#allocation27_spill] sm:$0xff] %v4654_v60  ;;  %v4659_v4 = vld [vmem:[%s6819_s7 + $0xe0] ss:$16 sps:$4 sm:$0xff]  }
  0x31   :  { %864 = vmatpush1.bf16.msra.mxu0 %v4492_v63  ;;  %905 = vmatpush1.bf16.msra.mxu1 %v4497_v0  ;;  %7120 = vst [vmem:[#allocation28_spill] sm:$0xff] %v4659_v4 }
  0x32   :  { %865 = vmatprep.subr.bf16.mxu0 %v4505_v1  ;;  %906 = vmatprep.subr.bf16.mxu1 %v4510_v2 }
  0x35   :  { %866 = vmatpush1.bf16.msra.mxu0 %v4515_v3  ;;  %907 = vmatpush1.bf16.msra.mxu1 %v4521_v6 }
  0x36   :  { %867 = vmatprep.subr.bf16.mxu0 %v4529_v7  ;;  %908 = vmatprep.subr.bf16.mxu1 %v4534_v8 }
  0x39   :  { %868 = vmatpush1.bf16.msra.mxu0 %v4539_v9  ;;  %909 = vmatpush1.bf16.msra.mxu1 %v4545_v10 }
  0x3a   :  { %869 = vmatprep.subr.bf16.mxu0 %v4553_v11  ;;  %910 = vmatprep.subr.bf16.mxu1 %v4558_v12 }
  0x3d   :  { %870 = vmatpush1.bf16.msra.mxu0 %v4563_v14  ;;  %911 = vmatpush1.bf16.msra.mxu1 %v4569_v15 }
  0x3e   :  { %871 = vmatprep.subr.bf16.mxu0 %v4577_v16  ;;  %912 = vmatprep.subr.bf16.mxu1 %v4582_v17 }
  0x41   :  { %872 = vmatpush1.bf16.msra.mxu0 %v4588_v19  ;;  %913 = vmatpush1.bf16.msra.mxu1 %v4594_v26 }
  0x42   :  { %873 = vmatprep.subr.bf16.mxu0 %v4601_v27  ;;  %914 = vmatprep.subr.bf16.mxu1 %v4606_v30 }
  0x45   :  { %874 = vmatpush1.bf16.msra.mxu0 %v4611_v37  ;;  %915 = vmatpush1.bf16.msra.mxu1 %v4617_v38  ;;  %v4808_v38 = vld [vmem:[%s6820_s6 + $0xa0] ss:$16 sps:$4 sm:$0xff]  }
  0x46   :  { %875 = vmatprep.subr.bf16.mxu0 %v4625_v41  ;;  %916 = vmatprep.subr.bf16.mxu1 %v4630_v48  ;;  %v4681_v41 = vld [vmem:[%s6820_s6 + $0xc] ss:$16 sps:$4 sm:$0xff]   ;;  %7145 = vst [vmem:[#allocation52_spill] sm:$0xff] %v4808_v38 }
  0x47   :  { %7123 = vst [vmem:[#allocation31_spill] sm:$0xff] %v4681_v41 }
  0x49   :  { %876 = vmatpush1.bf16.msra.mxu0 %v4635_v49  ;;  %917 = vmatpush1.bf16.msra.mxu1 %v4641_v52  ;;  %v4665_v52 = vld [vmem:[%s6819_s7 + $0xe8] ss:$16 sps:$4 sm:$0xff]  }
  0x4a   :  { %877 = vmatprep.subr.bf16.mxu0 %v4649_v59  ;;  %7121 = vst [vmem:[#allocation29_spill] sm:$0xff] %v4665_v52  ;;  %918 = vmatprep.subr.bf16.mxu1 %v4654_v60  ;;  %v38_v49 = vld [vmem:[%s6818_s1 + $0x8] sm:$0xff]  ;;  %v4676_v59 = vld [vmem:[%s6820_s6 + $0x4] ss:$16 sps:$4 sm:$0xff]  }
  0x4b   :  { %v701_v48 = vpack.c.bf16 %v38_v49, %v38_v49  ;;  %7122 = vst [vmem:[#allocation30_spill] sm:$0xff] %v4676_v59  ;;  %v4692_v49 = vld [vmem:[%s6820_s6 + $0x8] ss:$16 sps:$4 sm:$0xff]   ;;  %v4731_v60 = vld [vmem:[%s6820_s6 + $0x4c] ss:$16 sps:$4 sm:$0xff]  }
  0x4c   :  { %7125 = vst [vmem:[#allocation33_spill] sm:$0xff] %v4692_v49  ;;  %7132 = vst [vmem:[#allocation39_spill] sm:$0xff] %v4731_v60 }
  0x4d   :  { %878 = vmatpush1.bf16.msra.mxu0 %v4659_v4  ;;  %919 = vmatpush1.bf16.msra.mxu1 %v4665_v52  ;;  %v4687_v4 = vld [vmem:[%s6820_s6] ss:$16 sps:$4 sm:$0xff]   ;;  %v7126_v52 = vmov 0  }
  0x4e   :  { %1105 = vmatprep.subr.bf16.mxu0 %v4676_v59  ;;  %7124 = vst [vmem:[#allocation32_spill] sm:$0xff] %v4687_v4  ;;  %1146 = vmatprep.subr.bf16.mxu1 %v4681_v41  ;;  %v4706_v59 = vld [vmem:[%s6820_s6 + $0x2c] ss:$16 sps:$4 sm:$0xff]   ;;  %v4711_v41 = vld [vmem:[%s6820_s6 + $0x20] ss:$16 sps:$4 sm:$0xff]  }
  0x4f   :  { %7128 = vst [vmem:[#allocation35_spill] sm:$0xff] %v4706_v59  ;;  %7129 = vst [vmem:[#allocation36_spill] sm:$0xff] %v4711_v41 }
  0x50   :  { %896 = vmatmul.mubr.bf16.vlgmr.msra.gmra.mrb[20].mxu0 %v701_v48  ;;  %937 = vmatmul.mubr.bf16.vlgmr.msra.gmra.mrb[20].mxu1 %v701_v48  ;;  %v4701_v48 = vld [vmem:[%s6820_s6 + $0x24] ss:$16 sps:$4 sm:$0xff]  }
  0x51   :  { %1137 = vmatprep.mubr.bf16.mxu0 %v7126_v52  ;;  %1106 = vmatpush1.bf16.msra.mxu0 %v4687_v4  ;;  %7127 = vst [vmem:[#allocation34_spill] sm:$0xff] %v4701_v48  ;;  %v4716_v4 = vld [vmem:[%s6820_s6 + $0x28] ss:$16 sps:$4 sm:$0xff]  }
  0x52   :  { %1147 = vmatpush1.bf16.msra.mxu1 %v4692_v49  ;;  %7130 = vst [vmem:[#allocation37_spill] sm:$0xff] %v4716_v4  ;;  %1178 = vmatprep.mubr.bf16.mxu1 %v7126_v52  ;;  %v4726_v49 = vld [vmem:[%s6820_s6 + $0x44] ss:$16 sps:$4 sm:$0xff]  }
  0x53   :  { %1107 = vmatprep.subr.bf16.mxu0 %v4701_v48  ;;  %1148 = vmatprep.subr.bf16.mxu1 %v4706_v59  ;;  %7131 = vst [vmem:[#allocation38_spill] sm:$0xff] %v4726_v49  ;;  %v4736_v48 = vld [vmem:[%s6820_s6 + $0x40] ss:$16 sps:$4 sm:$0xff]   ;;  %v4755_v59 = vld [vmem:[%s6820_s6 + $0x6c] ss:$16 sps:$4 sm:$0xff]  }
  0x54   :  { %7133 = vst [vmem:[#allocation40_spill] sm:$0xff] %v4736_v48  ;;  %7136 = vst [vmem:[#allocation43_spill] sm:$0xff] %v4755_v59 }
  0x55   :  { %1108 = vmatpush1.bf16.msra.mxu0 %v4711_v41  ;;  %v4741_v41 = vld [vmem:[%s6820_s6 + $0x48] ss:$16 sps:$4 sm:$0xff]  }
  0x56   :  { %1149 = vmatpush1.bf16.msra.mxu1 %v4716_v4  ;;  %7134 = vst [vmem:[#allocation41_spill] sm:$0xff] %v4741_v41  ;;  %1109 = vmatprep.subr.bf16.mxu0 %v4726_v49  ;;  %v4750_v4 = vld [vmem:[%s6820_s6 + $0x64] ss:$16 sps:$4 sm:$0xff]   ;;  %v4760_v49 = vld [vmem:[%s6820_s6 + $0x60] ss:$16 sps:$4 sm:$0xff]  }
  0x57   :  { %1150 = vmatprep.subr.bf16.mxu1 %v4731_v60  ;;  %7135 = vst [vmem:[#allocation42_spill] sm:$0xff] %v4750_v4  ;;  %7137 = vst [vmem:[#allocation44_spill] sm:$0xff] %v4760_v49  ;;  %v4779_v60 = vld [vmem:[%s6820_s6 + $0x8c] ss:$16 sps:$4 sm:$0xff]  }
  0x58   :  { %7140 = vst [vmem:[#allocation47_spill] sm:$0xff] %v4779_v60 }
  0x59   :  { %1110 = vmatpush1.bf16.msra.mxu0 %v4736_v48  ;;  %v4765_v48 = vld [vmem:[%s6820_s6 + $0x68] ss:$16 sps:$4 sm:$0xff]  }
  0x5a   :  { %1151 = vmatpush1.bf16.msra.mxu1 %v4741_v41  ;;  %7138 = vst [vmem:[#allocation45_spill] sm:$0xff] %v4765_v48  ;;  %1111 = vmatprep.subr.bf16.mxu0 %v4750_v4  ;;  %v4774_v41 = vld [vmem:[%s6820_s6 + $0x84] ss:$16 sps:$4 sm:$0xff]   ;;  %v4784_v4 = vld [vmem:[%s6820_s6 + $0x80] ss:$16 sps:$4 sm:$0xff]  }
  0x5b   :  { %1152 = vmatprep.subr.bf16.mxu1 %v4755_v59  ;;  %7139 = vst [vmem:[#allocation46_spill] sm:$0xff] %v4774_v41  ;;  %7141 = vst [vmem:[#allocation48_spill] sm:$0xff] %v4784_v4  ;;  %v4801_v59 = vld [vmem:[%s6820_s6 + $0xac] ss:$16 sps:$4 sm:$0xff]  }
  0x5c   :  { %7144 = vst [vmem:[#allocation51_spill] sm:$0xff] %v4801_v59 }
  0x5d   :  { %1112 = vmatpush1.bf16.msra.mxu0 %v4760_v49  ;;  %v4789_v49 = vld [vmem:[%s6820_s6 + $0x88] ss:$16 sps:$4 sm:$0xff]  }
  0x5e   :  { %1153 = vmatpush1.bf16.msra.mxu1 %v4765_v48  ;;  %7142 = vst [vmem:[#allocation49_spill] sm:$0xff] %v4789_v49  ;;  %v4794_v48 = vld [vmem:[%s6820_s6 + $0xa4] ss:$16 sps:$4 sm:$0xff]   ;;  %1113 = vmatprep.subr.bf16.mxu0 %v4774_v41  ;;  %v4813_v41 = vld [vmem:[%s6820_s6 + $0xa8] ss:$16 sps:$4 sm:$0xff]  }
  0x5f   :  { %7143 = vst [vmem:[#allocation50_spill] sm:$0xff] %v4794_v48  ;;  %1154 = vmatprep.subr.bf16.mxu1 %v4779_v60  ;;  %7146 = vst [vmem:[#allocation53_spill] sm:$0xff] %v4813_v41  ;;  %v6894_v60 = vsub.s32 0, %v4238_v5 }
  0x61   :  { %1114 = vmatpush1.bf16.msra.mxu0 %v4784_v4  ;;  %v4820_v4 = vld [vmem:[%s6820_s6 + $0xc4] ss:$16 sps:$4 sm:$0xff]  }
  0x62   :  { %1155 = vmatpush1.bf16.msra.mxu1 %v4789_v49  ;;  %1115 = vmatprep.subr.bf16.mxu0 %v4794_v48  ;;  %7147 = vst [vmem:[#allocation54_spill] sm:$0xff] %v4820_v4  ;;  %v4825_v49 = vld [vmem:[%s6820_s6 + $0xcc] ss:$16 sps:$4 sm:$0xff]   ;;  %v4832_v48 = vld [vmem:[%s6820_s6 + $0xc0] ss:$16 sps:$4 sm:$0xff]  }
  0x63   :  { %1156 = vmatprep.subr.bf16.mxu1 %v4801_v59  ;;  %7148 = vst [vmem:[#allocation55_spill] sm:$0xff] %v4825_v49  ;;  %7149 = vst [vmem:[#allocation56_spill] sm:$0xff] %v4832_v48  ;;  %v4837_v59 = vld [vmem:[%s6820_s6 + $0xc8] ss:$16 sps:$4 sm:$0xff]  }
  0x64   :  { %7150 = vst [vmem:[#allocation57_spill] sm:$0xff] %v4837_v59 }
  0x65   :  { %1116 = vmatpush1.bf16.msra.mxu0 %v4808_v38  ;;  %v4844_v38 = vld [vmem:[%s6820_s6 + $0xe4] ss:$16 sps:$4 sm:$0xff]  }
  0x66   :  { %1157 = vmatpush1.bf16.msra.mxu1 %v4813_v41  ;;  %1117 = vmatprep.subr.bf16.mxu0 %v4820_v4  ;;  %7151 = vst [vmem:[#allocation58_spill] sm:$0xff] %v4844_v38  ;;  %v4849_v41 = vld [vmem:[%s6820_s6 + $0xec] ss:$16 sps:$4 sm:$0xff]   ;;  %v4856_v4 = vld [vmem:[%s6820_s6 + $0xe0] ss:$16 sps:$4 sm:$0xff]  }
  0x67   :  { %1158 = vmatprep.subr.bf16.mxu1 %v4825_v49  ;;  %7152 = vst [vmem:[#allocation59_spill] sm:$0xff] %v4849_v41  ;;  %7153 = vst [vmem:[#allocation60_spill] sm:$0xff] %v4856_v4  ;;  %v4861_v49 = vld [vmem:[%s6820_s6 + $0xe8] ss:$16 sps:$4 sm:$0xff]  }
  0x68   :  { %7154 = vst [vmem:[#allocation61_spill] sm:$0xff] %v4861_v49 }
  0x69   :  { %1118 = vmatpush1.bf16.msra.mxu0 %v4832_v48  ;;  %v6893_v48 = vsub.s32 3, %v4238_v5 }
  0x6a   :  { %1159 = vmatpush1.bf16.msra.mxu1 %v4837_v59  ;;  %1119 = vmatprep.subr.bf16.mxu0 %v4844_v38  ;;  %v6888_v59 = vsub.s32 2, %v4238_v5  ;;  %v58_v38 = vld [vmem:[%s6821_s5] sm:$0xf] }
  0x6b   :  { %1160 = vmatprep.subr.bf16.mxu1 %v4849_v41  ;;  %v6899_v41 = vsub.s32 1, %v4238_v5  ;;  %v63_v37 = vrot.slane %v58_v38, %v6894_v60 }
  0x6d   :  { %1120 = vmatpush1.bf16.msra.mxu0 %v4856_v4  ;;  %v4878_v4 = vrot.slane %v58_v38, %v6888_v59  ;;  %v67_v26 = vrot.slane %v58_v38, %v6899_v41 }
  0x6e   :  { %1161 = vmatpush1.bf16.msra.mxu1 %v4861_v49  ;;  %1222 = vmatprep.subr.bf16.mxu0 %v4250_v13 }
  0x6f   :  { %1263 = vmatprep.subr.bf16.mxu1 %v4255_v18  ;;  %v4886_v18 = vrot.slane %v58_v38, %v6893_v48 }
  0xe2   :  { %v4880_v49 = vpop.f32.mrb[0].mxu0  ;;  %v4882_v13 = vpop.f32.mrb[0].mxu1 }
  0xe3   :  { %v160_v30 = vpop.f32.mrb[1].mxu0  ;;  %v233_v27 = vpop.f32.mrb[1].mxu1 }
  0xe4   :  { %v162_v19 = vpop.f32.mrb[2].mxu0  ;;  %v235_v17 = vpop.f32.mrb[2].mxu1 }
  0xe5   :  { %v4892_v59 = vadd.f32 %v162_v19, %v63_v37  ;;  %v164_v16 = vpop.f32.mrb[3].mxu0  ;;  %v4895_v15 = vadd.f32 %v235_v17, %v4878_v4  ;;  %v237_v14 = vpop.f32.mrb[3].mxu1 }
  0xe6   :  { %v4897_v12 = vadd.f32 %v164_v16, %v67_v26  ;;  %v4900_v48 = vadd.f32 %v237_v14, %v4886_v18 }
  0xe7   :  { %7155 = vst [vmem:[#allocation62_spill] sm:$0xff] %v4892_v59  ;;  %7156 = vst [vmem:[#allocation63_spill] sm:$0xff] %v4895_v15 }
  0xe8   :  { %7157 = vst [vmem:[#allocation64_spill] sm:$0xff] %v4897_v12  ;;  %7158 = vst [vmem:[#allocation65_spill] sm:$0xff] %v4900_v48 }
  0xea   :  { %v168_v60 = vpop.f32.mrb[4].mxu0  ;;  %v241_v11 = vpop.f32.mrb[4].mxu1 }
  0xeb   :  { %v4902_v10 = vadd.f32 %v168_v60, %v63_v37  ;;  %v170_v5 = vpop.f32.mrb[5].mxu0  ;;  %v4905_v38 = vadd.f32 %v241_v11, %v4878_v4  ;;  %v243_v19 = vpop.f32.mrb[5].mxu1 }
  0xec   :  { %v4907_v41 = vadd.f32 %v170_v5, %v67_v26  ;;  %v172_v59 = vpop.f32.mrb[6].mxu0  ;;  %v4910_v17 = vadd.f32 %v243_v19, %v4886_v18  ;;  %v245_v16 = vpop.f32.mrb[6].mxu1 }
  0xed   :  { %7159 = vst [vmem:[#allocation66_spill] sm:$0xff] %v4902_v10  ;;  %7160 = vst [vmem:[#allocation67_spill] sm:$0xff] %v4905_v38  ;;  %v4912_v12 = vadd.f32 %v172_v59, %v63_v37  ;;  %v174_v14 = vpop.f32.mrb[7].mxu0  ;;  %v4915_v48 = vadd.f32 %v245_v16, %v4878_v4  ;;  %v247_v60 = vpop.f32.mrb[7].mxu1 }
  0xee   :  { %7161 = vst [vmem:[#allocation68_spill] sm:$0xff] %v4907_v41  ;;  %7162 = vst [vmem:[#allocation69_spill] sm:$0xff] %v4910_v17  ;;  %v4917_v10 = vadd.f32 %v174_v14, %v67_v26  ;;  %v4920_v11 = vadd.f32 %v247_v60, %v4886_v18 }
  0xef   :  { %7163 = vst [vmem:[#allocation70_spill] sm:$0xff] %v4912_v12  ;;  %7164 = vst [vmem:[#allocation71_spill] sm:$0xff] %v4915_v48 }
  0xf0   :  { %7165 = vst [vmem:[#allocation72_spill] sm:$0xff] %v4917_v10  ;;  %7166 = vst [vmem:[#allocation73_spill] sm:$0xff] %v4920_v11 }
  0xf2   :  { %v178_v38 = vpop.f32.mrb[8].mxu0  ;;  %v251_v5 = vpop.f32.mrb[8].mxu1 }
  0xf3   :  { %v4922_v41 = vadd.f32 %v178_v38, %v63_v37  ;;  %v180_v15 = vpop.f32.mrb[9].mxu0  ;;  %v4925_v19 = vadd.f32 %v251_v5, %v4878_v4  ;;  %v253_v59 = vpop.f32.mrb[9].mxu1 }
  0xf4   :  { %v4927_v12 = vadd.f32 %v180_v15, %v67_v26  ;;  %v182_v17 = vpop.f32.mrb[10].mxu0  ;;  %v4930_v16 = vadd.f32 %v253_v59, %v4886_v18  ;;  %v255_v14 = vpop.f32.mrb[10].mxu1 }
  0xf5   :  { %7167 = vst [vmem:[#allocation74_spill] sm:$0xff] %v4922_v41  ;;  %7168 = vst [vmem:[#allocation75_spill] sm:$0xff] %v4925_v19  ;;  %v4932_v10 = vadd.f32 %v182_v17, %v63_v37  ;;  %v184_v60 = vpop.f32.mrb[11].mxu0  ;;  %v4935_v11 = vadd.f32 %v255_v14, %v4878_v4  ;;  %v257_v38 = vpop.f32.mrb[11].mxu1 }
  0xf6   :  { %7169 = vst [vmem:[#allocation76_spill] sm:$0xff] %v4927_v12  ;;  %7170 = vst [vmem:[#allocation77_spill] sm:$0xff] %v4930_v16  ;;  %v4937_v41 = vadd.f32 %v184_v60, %v67_v26  ;;  %v4940_v5 = vadd.f32 %v257_v38, %v4886_v18 }
  0xf7   :  { %7171 = vst [vmem:[#allocation78_spill] sm:$0xff] %v4932_v10  ;;  %7172 = vst [vmem:[#allocation79_spill] sm:$0xff] %v4935_v11 }
  0xf8   :  { %7173 = vst [vmem:[#allocation80_spill] sm:$0xff] %v4937_v41  ;;  %7174 = vst [vmem:[#allocation81_spill] sm:$0xff] %v4940_v5 }
  0xfa   :  { %v188_v19 = vpop.f32.mrb[12].mxu0  ;;  %v261_v15 = vpop.f32.mrb[12].mxu1 }
  0xfb   :  { %v4942_v12 = vadd.f32 %v188_v19, %v63_v37  ;;  %v190_v48 = vpop.f32.mrb[13].mxu0  ;;  %v4945_v59 = vadd.f32 %v261_v15, %v4878_v4  ;;  %v263_v17 = vpop.f32.mrb[13].mxu1 }
  0xfc   :  { %v4947_v10 = vadd.f32 %v190_v48, %v67_v26  ;;  %v192_v16 = vpop.f32.mrb[14].mxu0  ;;  %v4950_v14 = vadd.f32 %v263_v17, %v4886_v18  ;;  %v265_v60 = vpop.f32.mrb[14].mxu1  ;;  %v159_v48 = vadd.f32 %v4880_v49, %v63_v37  ;;  %v161_v17 = vadd.f32 %v160_v30, %v67_v26 }
  0xfd   :  { %7175 = vst [vmem:[#allocation82_spill] sm:$0xff] %v4942_v12  ;;  %7176 = vst [vmem:[#allocation83_spill] sm:$0xff] %v4945_v59  ;;  %v4952_v41 = vadd.f32 %v192_v16, %v63_v37  ;;  %v194_v38 = vpop.f32.mrb[15].mxu0  ;;  %v4955_v5 = vadd.f32 %v265_v60, %v4878_v4  ;;  %v267_v19 = vpop.f32.mrb[15].mxu1 }
  0xfe   :  { %7177 = vst [vmem:[#allocation84_spill] sm:$0xff] %v4947_v10  ;;  %7178 = vst [vmem:[#allocation85_spill] sm:$0xff] %v4950_v14  ;;  %v4957_v12 = vadd.f32 %v194_v38, %v67_v26  ;;  %v4960_v15 = vadd.f32 %v267_v19, %v4886_v18  ;;  %v232_v10 = vadd.f32 %v4882_v13, %v4878_v4 }
  0xff   :  { %7179 = vst [vmem:[#allocation86_spill] sm:$0xff] %v4952_v41  ;;  %7180 = vst [vmem:[#allocation87_spill] sm:$0xff] %v4955_v5  ;;  %v234_v14 = vadd.f32 %v233_v27, %v4886_v18 }
 0x100   :  { %7181 = vst [vmem:[#allocation88_spill] sm:$0xff] %v4957_v12  ;;  %7182 = vst [vmem:[#allocation89_spill] sm:$0xff] %v4960_v15 }
 0x102   :  { %v625_v16 = vpop.f32.mrb[16].mxu0  ;;  %v666_v41 = vpop.f32.mrb[16].mxu1 }
 0x103   :  { %v673_v59 = vadd.f32 %v625_v16, %v159_v48  ;;  %v675_v11 = vadd.f32 %v666_v41, %v232_v10  ;;  %v627_v60 = vpop.f32.mrb[17].mxu0  ;;  %v668_v5 = vpop.f32.mrb[17].mxu1 }
 0x104   :  { %v674_v9 = vadd.f32 %v627_v60, %v161_v17  ;;  %v676_v38 = vadd.f32 %v668_v5, %v234_v14  ;;  %v629_v12 = vpop.f32.mrb[18].mxu0  ;;  %v670_v8 = vpop.f32.mrb[18].mxu1 }
 0x105   :  { %v3451_v19 = vmul.f32 -1.442695, %v673_v59  ;;  %v630_v15 = vpop.f32.mrb[19].mxu0  ;;  %v671_v7 = vpop.f32.mrb[19].mxu1  ;;  %v41_v8 = vld [vmem:[%s6822_s2] sm:$0xff] }
 0x106   :  { %v3452_v37 = vmul.f32 -1.442695, %v674_v9  ;;  %v3453_v4 = vmul.f32 -1.442695, %v676_v38 }
 0x107   :  { %3717 = vpow2.f32 %v3451_v19 }
 0x108   :  { %3719 = vpow2.f32 %v3452_v37 }
 0x109   :  { %3721 = vpow2.f32 %v3453_v4 }
 0x10a   :  { %3723 = vtanh.f32 %v675_v11 }
 0x111   :  { %v3718_v26 = vpop.eup %3717 }
 0x112   :  { %v3720_v30 = vpop.eup %3719  ;;  %v680_v27 = vadd.f32 1.0, %v3718_v26 }
 0x113   :  { %v686_v49 = vadd.f32 1.0, %v3720_v30  ;;  %v3722_v10 = vpop.eup %3721 }
 0x114   :  { %3725 = vrcp.f32 %v680_v27  ;;  %v3724_v41 = vpop.eup %3723  ;;  %v693_v13 = vadd.f32 1.0, %v3722_v10 }
 0x115   :  { %3727 = vrcp.f32 %v686_v49 }
 0x116   :  { %3729 = vrcp.f32 %v693_v13 }
 0x11e   :  { %v3726_v12 = vpop.eup %3725 }
 0x11f   :  { %v3728_v7 = vpop.eup %3727  ;;  %v697_v9 = vmul.f32 %v3726_v12, %v3724_v41 }
 0x120   :  { %v696_v18 = vmul.f32 %v3728_v7, %v41_v8  ;;  %v3730_v11 = vpop.eup %3729 }
 0x122   :  { %v4969_v5 = vadd.f32 %v697_v9, %v696_v18 }
 0x124   :  { %3731 = vtanh.f32 %v4969_v5 }
 0x12e   :  { %v3732_v59 = vpop.eup %3731 }
 0x12f   :  { %v700_v14 = vmul.f32 %v3732_v59, %v3730_v11 }
 0x131   :  { %v702_v15 = vpack.c.bf16 %v700_v14, %v700_v14 }
 0x133   :  { %1138 = vmatmul.mubr.bf16.vlgmr.msra.gmra.mrb[24].mxu0 %v702_v15  ;;  %1179 = vmatmul.mubr.bf16.vlgmr.msra.gmra.mrb[24].mxu1 %v702_v15 }
 0x134   :  { %1223 = vmatpush1.bf16.msra.mxu0 %v4260_v20  ;;  %1264 = vmatpush1.bf16.msra.mxu1 %v4265_v21  ;;  %v7183_v20 = vld [vmem:[#allocation6_spill] sm:$0xff]  ;;  %v7184_v21 = vld [vmem:[#allocation7_spill] sm:$0xff] }
 0x135   :  { %1224 = vmatprep.subr.bf16.mxu0 %v4272_v22  ;;  %1265 = vmatprep.subr.bf16.mxu1 %v4277_v23  ;;  %v7185_v22 = vld [vmem:[#allocation8_spill] sm:$0xff]  ;;  %v7186_v23 = vld [vmem:[#allocation9_spill] sm:$0xff] }
 0x136   :  { %1254 = vmatprep.mubr.bf16.mxu0 %v7126_v52  ;;  %1295 = vmatprep.mubr.bf16.mxu1 %v7126_v52 }
 0x138   :  { %1225 = vmatpush1.bf16.msra.mxu0 %v4282_v24  ;;  %1266 = vmatpush1.bf16.msra.mxu1 %v4287_v25  ;;  %v7187_v24 = vld [vmem:[#allocation10_spill] sm:$0xff]  ;;  %v7188_v25 = vld [vmem:[#allocation11_spill] sm:$0xff] }
 0x139   :  { %1226 = vmatprep.subr.bf16.mxu0 %v4302_v28  ;;  %1267 = vmatprep.subr.bf16.mxu1 %v4309_v29  ;;  %v7189_v28 = vld [vmem:[#allocation12_spill] sm:$0xff]  ;;  %v7190_v29 = vld [vmem:[#allocation13_spill] sm:$0xff] }
 0x13c   :  { %1227 = vmatpush1.bf16.msra.mxu0 %v4316_v31  ;;  %1268 = vmatpush1.bf16.msra.mxu1 %v4321_v32  ;;  %v7191_v31 = vld [vmem:[#allocation14_spill] sm:$0xff]  ;;  %v7192_v32 = vld [vmem:[#allocation15_spill] sm:$0xff] }
 0x13d   :  { %1228 = vmatprep.subr.bf16.mxu0 %v4328_v33  ;;  %1269 = vmatprep.subr.bf16.mxu1 %v4335_v34  ;;  %v7193_v33 = vld [vmem:[#allocation16_spill] sm:$0xff]  ;;  %v7194_v34 = vld [vmem:[#allocation17_spill] sm:$0xff] }
 0x140   :  { %1229 = vmatpush1.bf16.msra.mxu0 %v4340_v35  ;;  %1270 = vmatpush1.bf16.msra.mxu1 %v4347_v36  ;;  %v897_v35 = vpop.f32.mrb[20].mxu0  ;;  %v7195_v36 = vld [vmem:[#allocation18_spill] sm:$0xff] }
 0x141   :  { %1230 = vmatprep.subr.bf16.mxu0 %v4362_v39  ;;  %1271 = vmatprep.subr.bf16.mxu1 %v4367_v40  ;;  %v7196_v39 = vld [vmem:[#allocation19_spill] sm:$0xff]  ;;  %v899_v40 = vpop.f32.mrb[21].mxu0 }
 0x144   :  { %1231 = vmatpush1.bf16.msra.mxu0 %v4376_v42  ;;  %1272 = vmatpush1.bf16.msra.mxu1 %v4381_v43  ;;  %v938_v42 = vpop.f32.mrb[20].mxu1  ;;  %v901_v43 = vpop.f32.mrb[22].mxu0 }
 0x145   :  { %1232 = vmatprep.subr.bf16.mxu0 %v4388_v44  ;;  %1273 = vmatprep.subr.bf16.mxu1 %v4393_v45  ;;  %v940_v44 = vpop.f32.mrb[21].mxu1  ;;  %v902_v45 = vpop.f32.mrb[23].mxu0  ;;  %v7214_v43 = vld [vmem:[#allocation62_spill] sm:$0xff] }
 0x146   :  { %v7215_v45 = vld [vmem:[#allocation63_spill] sm:$0xff] }
 0x148   :  { %1233 = vmatpush1.bf16.msra.mxu0 %v4400_v46  ;;  %1274 = vmatpush1.bf16.msra.mxu1 %v4407_v47  ;;  %v942_v46 = vpop.f32.mrb[22].mxu1  ;;  %v7197_v47 = vld [vmem:[#allocation20_spill] sm:$0xff] }
 0x149   :  { %1234 = vmatprep.subr.bf16.mxu0 %v4420_v50  ;;  %1275 = vmatprep.subr.bf16.mxu1 %v4425_v51  ;;  %v7198_v50 = vld [vmem:[#allocation21_spill] sm:$0xff]  ;;  %v943_v51 = vpop.f32.mrb[23].mxu1 }
 0x14c   :  { %1235 = vmatpush1.bf16.msra.mxu0 %v4434_v53  ;;  %1276 = vmatpush1.bf16.msra.mxu1 %v4439_v54  ;;  %v7199_v53 = vld [vmem:[#allocation22_spill] sm:$0xff]  ;;  %v7200_v54 = vld [vmem:[#allocation23_spill] sm:$0xff] }
 0x14d   :  { %1236 = vmatprep.subr.bf16.mxu0 %v4446_v55  ;;  %1277 = vmatprep.subr.bf16.mxu1 %v4451_v56  ;;  %v7201_v55 = vld [vmem:[#allocation24_spill] sm:$0xff]  ;;  %v7202_v56 = vld [vmem:[#allocation25_spill] sm:$0xff] }
 0x150   :  { %1237 = vmatpush1.bf16.msra.mxu0 %v4460_v57  ;;  %1278 = vmatpush1.bf16.msra.mxu1 %v4465_v58  ;;  %v7203_v57 = vld [vmem:[#allocation26_spill] sm:$0xff]  ;;  %v7204_v58 = vld [vmem:[#allocation27_spill] sm:$0xff] }
 0x151   :  { %1334 = vmatprep.subr.bf16.mxu0 %v4481_v61  ;;  %1375 = vmatprep.subr.bf16.mxu1 %v4486_v62  ;;  %v7205_v61 = vld [vmem:[#allocation28_spill] sm:$0xff]  ;;  %v7206_v62 = vld [vmem:[#allocation29_spill] sm:$0xff] }
 0x153   :  { %1255 = vmatmul.mubr.bf16.vlgmr.msra.gmra.mrb[28].mxu0 %v702_v15  ;;  %1296 = vmatmul.mubr.bf16.vlgmr.msra.gmra.mrb[28].mxu1 %v702_v15 }
 0x154   :  { %1335 = vmatpush1.bf16.msra.mxu0 %v4492_v63  ;;  %1376 = vmatpush1.bf16.msra.mxu1 %v4497_v0  ;;  %v7207_v63 = vld [vmem:[#allocation30_spill] sm:$0xff]  ;;  %v7208_v0 = vld [vmem:[#allocation31_spill] sm:$0xff] }
 0x155   :  { %1336 = vmatprep.subr.bf16.mxu0 %v4505_v1  ;;  %1377 = vmatprep.subr.bf16.mxu1 %v4510_v2  ;;  %v398_v1 = vld [vmem:[%s6823_s8] sm:$0xf] }
 0x156   :  { %1366 = vmatprep.mubr.bf16.mxu0 %v7126_v52  ;;  %1407 = vmatprep.mubr.bf16.mxu1 %v7126_v52  ;;  %v7209_v2 = vld [vmem:[#allocation5_spill] sm:$0xff] }
 0x157   :  { %v7211_v16 = vsub.s32 1, %v7209_v2  ;;  %v7212_v13 = vsub.s32 3, %v7209_v2  ;;  %v7213_v59 = vsub.s32 2, %v7209_v2 }
 0x158   :  { %1337 = vmatpush1.bf16.msra.mxu0 %v4515_v3  ;;  %1378 = vmatpush1.bf16.msra.mxu1 %v4521_v6  ;;  %v7210_v3 = vsub.s32 0, %v7209_v2 }
 0x159   :  { %1338 = vmatprep.subr.bf16.mxu0 %v7183_v20  ;;  %1379 = vmatprep.subr.bf16.mxu1 %v7184_v21  ;;  %v5049_v60 = vrot.slane %v398_v1, %v7211_v16  ;;  %v5055_v18 = vrot.slane %v398_v1, %v7212_v13  ;;  %v5060_v14 = vrot.slane %v398_v1, %v7213_v59  ;;  %v7219_v59 = vld [vmem:[#allocation33_spill] sm:$0xff] }
 0x15a   :  { %v5045_v6 = vrot.slane %v398_v1, %v7210_v3  ;;  %v7216_v3 = vld [vmem:[#allocation64_spill] sm:$0xff] }
 0x15c   :  { %1339 = vmatpush1.bf16.msra.mxu0 %v7185_v22  ;;  %1380 = vmatpush1.bf16.msra.mxu1 %v7186_v23 }
 0x15d   :  { %1340 = vmatprep.subr.bf16.mxu0 %v7187_v24  ;;  %1381 = vmatprep.subr.bf16.mxu1 %v7188_v25 }
 0x160   :  { %1341 = vmatpush1.bf16.msra.mxu0 %v7189_v28  ;;  %1382 = vmatpush1.bf16.msra.mxu1 %v7190_v29  ;;  %v42_v29 = vld [vmem:[%s6822_s2 + $0x8] sm:$0xff] }
 0x161   :  { %1342 = vmatprep.subr.bf16.mxu0 %v7191_v31  ;;  %1383 = vmatprep.subr.bf16.mxu1 %v7192_v32 }
 0x164   :  { %1343 = vmatpush1.bf16.msra.mxu0 %v7193_v33  ;;  %1384 = vmatpush1.bf16.msra.mxu1 %v7194_v34 }
 0x165   :  { %1344 = vmatprep.subr.bf16.mxu0 %v7195_v36  ;;  %1385 = vmatprep.subr.bf16.mxu1 %v7196_v39 }
 0x168   :  { %1345 = vmatpush1.bf16.msra.mxu0 %v7197_v47  ;;  %1386 = vmatpush1.bf16.msra.mxu1 %v7198_v50 }
 0x169   :  { %1346 = vmatprep.subr.bf16.mxu0 %v7199_v53  ;;  %1387 = vmatprep.subr.bf16.mxu1 %v7200_v54 }
 0x16c   :  { %1347 = vmatpush1.bf16.msra.mxu0 %v7201_v55  ;;  %1388 = vmatpush1.bf16.msra.mxu1 %v7202_v56 }
 0x16d   :  { %1348 = vmatprep.subr.bf16.mxu0 %v7203_v57  ;;  %1389 = vmatprep.subr.bf16.mxu1 %v7204_v58 }
 0x170   :  { %1349 = vmatpush1.bf16.msra.mxu0 %v7205_v61  ;;  %1390 = vmatpush1.bf16.msra.mxu1 %v7206_v62 }
 0x171   :  { %1416 = vmatprep.subr.bf16.mxu0 %v7207_v63  ;;  %1457 = vmatprep.subr.bf16.mxu1 %v7208_v0 }
 0x206   :  { %v1139_v48 = vpop.f32.mrb[24].mxu0  ;;  %v1180_v17 = vpop.f32.mrb[24].mxu1 }
 0x207   :  { %v1140_v38 = vadd.f32 %v1139_v48, %v897_v35  ;;  %v1181_v19 = vadd.f32 %v1180_v17, %v938_v42  ;;  %v1141_v37 = vpop.f32.mrb[25].mxu0  ;;  %v1182_v4 = vpop.f32.mrb[25].mxu1  ;;  %v7217_v17 = vld [vmem:[#allocation65_spill] sm:$0xff] }
 0x208   :  { %v1142_v26 = vadd.f32 %v1141_v37, %v899_v40  ;;  %v1183_v30 = vadd.f32 %v1182_v4, %v940_v44  ;;  %v1143_v27 = vpop.f32.mrb[26].mxu0  ;;  %v1184_v49 = vpop.f32.mrb[26].mxu1 }
 0x209   :  { %v1187_v10 = vadd.f32 %v1140_v38, %v5045_v6  ;;  %v1144_v41 = vpop.f32.mrb[27].mxu0  ;;  %v1185_v8 = vpop.f32.mrb[27].mxu1  ;;  %v1189_v20 = vadd.f32 %v1181_v19, %v5060_v14 }
 0x20a   :  { %v1188_v12 = vadd.f32 %v1142_v26, %v5049_v60  ;;  %v1190_v11 = vadd.f32 %v1183_v30, %v5055_v18 }
 0x20b   :  { %v3518_v7 = vmul.f32 -1.442695, %v1187_v10 }
 0x20c   :  { %v3519_v9 = vmul.f32 -1.442695, %v1188_v12  ;;  %v3520_v15 = vmul.f32 -1.442695, %v1190_v11  ;;  %v7218_v11 = vld [vmem:[#allocation32_spill] sm:$0xff] }
 0x20d   :  { %3733 = vpow2.f32 %v3518_v7 }
 0x20e   :  { %3735 = vpow2.f32 %v3519_v9 }
 0x20f   :  { %3737 = vpow2.f32 %v3520_v15  ;;  %v7220_v15 = vld [vmem:[#allocation34_spill] sm:$0xff] }
 0x210   :  { %3739 = vtanh.f32 %v1189_v20  ;;  %v7221_v20 = vld [vmem:[#allocation35_spill] sm:$0xff] }
 0x217   :  { %v3734_v21 = vpop.eup %3733 }
 0x218   :  { %v3736_v22 = vpop.eup %3735  ;;  %v1194_v23 = vadd.f32 1.0, %v3734_v21  ;;  %v7222_v21 = vld [vmem:[#allocation36_spill] sm:$0xff] }
 0x219   :  { %v1200_v24 = vadd.f32 1.0, %v3736_v22  ;;  %v3738_v25 = vpop.eup %3737  ;;  %v7223_v22 = vld [vmem:[#allocation37_spill] sm:$0xff] }
 0x21a   :  { %3741 = vrcp.f32 %v1194_v23  ;;  %v3740_v28 = vpop.eup %3739  ;;  %v1207_v34 = vadd.f32 1.0, %v3738_v25  ;;  %v7225_v25 = vld [vmem:[#allocation39_spill] sm:$0xff] }
 0x21b   :  { %3743 = vrcp.f32 %v1200_v24  ;;  %v7224_v24 = vld [vmem:[#allocation38_spill] sm:$0xff] }
 0x21c   :  { %3745 = vrcp.f32 %v1207_v34 }
 0x224   :  { %v3742_v31 = vpop.eup %3741 }
 0x225   :  { %v3744_v32 = vpop.eup %3743  ;;  %v1211_v33 = vmul.f32 %v3742_v31, %v3740_v28 }
 0x226   :  { %v1210_v35 = vmul.f32 %v3744_v32, %v42_v29  ;;  %v1256_v40 = vpop.f32.mrb[28].mxu0  ;;  %v1297_v42 = vpop.f32.mrb[28].mxu1  ;;  %v7226_v32 = vld [vmem:[#allocation40_spill] sm:$0xff] }
 0x227   :  { %v1304_v44 = vadd.f32 %v1256_v40, %v7214_v43  ;;  %v1306_v46 = vadd.f32 %v1297_v42, %v7215_v45  ;;  %v1258_v51 = vpop.f32.mrb[29].mxu0  ;;  %v1299_v1 = vpop.f32.mrb[29].mxu1  ;;  %v7228_v42 = vld [vmem:[#allocation42_spill] sm:$0xff]  ;;  %v7229_v43 = vld [vmem:[#allocation43_spill] sm:$0xff] }
 0x228   :  { %v5068_v2 = vadd.f32 %v1211_v33, %v1210_v35  ;;  %v1305_v48 = vadd.f32 %v1258_v51, %v7216_v3  ;;  %v1307_v16 = vadd.f32 %v1299_v1, %v7217_v17  ;;  %v1260_v38 = vpop.f32.mrb[30].mxu0  ;;  %v1301_v19 = vpop.f32.mrb[30].mxu1  ;;  %v7227_v33 = vld [vmem:[#allocation41_spill] sm:$0xff]  ;;  %v7232_v1 = vld [vmem:[#allocation46_spill] sm:$0xff]  ;;  %v7233_v3 = vld [vmem:[#allocation47_spill] sm:$0xff] }
 0x229   :  { %v3521_v37 = vmul.f32 -1.442695, %v1304_v44  ;;  %v1261_v4 = vpop.f32.mrb[31].mxu0  ;;  %v1302_v26 = vpop.f32.mrb[31].mxu1  ;;  %v7231_v51 = vld [vmem:[#allocation45_spill] sm:$0xff]  ;;  %v7238_v38 = vld [vmem:[#allocation52_spill] sm:$0xff] }
 0x22a   :  { %v3522_v30 = vmul.f32 -1.442695, %v1305_v48  ;;  %3747 = vtanh.f32 %v5068_v2  ;;  %v3523_v27 = vmul.f32 -1.442695, %v1307_v16  ;;  %v3746_v49 = vpop.eup %3745  ;;  %v7234_v48 = vld [vmem:[#allocation48_spill] sm:$0xff]  ;;  %v7235_v17 = vld [vmem:[#allocation49_spill] sm:$0xff] }
 0x22b   :  { %3749 = vpow2.f32 %v3521_v37  ;;  %v7236_v16 = vld [vmem:[#allocation50_spill] sm:$0xff]  ;;  %v7239_v19 = vld [vmem:[#allocation53_spill] sm:$0xff]  ;;  %v7241_v4 = vld [vmem:[#allocation55_spill] sm:$0xff] }
 0x22c   :  { %3751 = vpow2.f32 %v3522_v30  ;;  %v7240_v37 = vld [vmem:[#allocation54_spill] sm:$0xff] }
 0x22d   :  { %3753 = vtanh.f32 %v1306_v46  ;;  %v7230_v46 = vld [vmem:[#allocation44_spill] sm:$0xff] }
 0x22e   :  { %3755 = vpow2.f32 %v3523_v27  ;;  %v7242_v27 = vld [vmem:[#allocation56_spill] sm:$0xff] }
 0x234   :  { %v3748_v10 = vpop.eup %3747 }
 0x235   :  { %v3750_v41 = vpop.eup %3749  ;;  %v1214_v8 = vmul.f32 %v3748_v10, %v3746_v49  ;;  %v7243_v49 = vld [vmem:[#allocation57_spill] sm:$0xff]  ;;  %v7244_v10 = vld [vmem:[#allocation58_spill] sm:$0xff] }
 0x236   :  { %v3752_v12 = vpop.eup %3751  ;;  %v1311_v7 = vadd.f32 1.0, %v3750_v41  ;;  %v7245_v41 = vld [vmem:[#allocation59_spill] sm:$0xff] }
 0x237   :  { %v1317_v9 = vadd.f32 1.0, %v3752_v12  ;;  %3757 = vtanh.f32 %v1214_v8  ;;  %v1332_v13 = vpack.c.bf16 %v1214_v8, %v1214_v8  ;;  %v3754_v23 = vpop.eup %3753  ;;  %v7246_v12 = vld [vmem:[#allocation60_spill] sm:$0xff] }
 0x238   :  { %3759 = vrcp.f32 %v1311_v7  ;;  %v3756_v28 = vpop.eup %3755  ;;  %v7247_v7 = vld [vmem:[#allocation61_spill] sm:$0xff] }
 0x239   :  { %3761 = vrcp.f32 %v1317_v9  ;;  %1367 = vmatmul.mubr.bf16.vlgmr.msra.gmra.mrb[32].mxu0 %v1332_v13  ;;  %1408 = vmatmul.mubr.bf16.vlgmr.msra.gmra.mrb[32].mxu1 %v1332_v13  ;;  %v1324_v40 = vadd.f32 1.0, %v3756_v28  ;;  %v5117_v13 = vld [vmem:[%s6816_s4 + $0x4] ss:$16 sps:$4 sm:$0xff]   ;;  %v5181_v28 = vld [vmem:[%s6816_s4 + $0x40] ss:$16 sps:$4 sm:$0xff]  }
 0x23a   :  { %1417 = vmatpush1.bf16.msra.mxu0 %v7218_v11  ;;  %1458 = vmatpush1.bf16.msra.mxu1 %v7219_v59  ;;  %v5123_v11 = vld [vmem:[%s6816_s4 + $0xc] ss:$16 sps:$4 sm:$0xff]   ;;  %v5131_v59 = vld [vmem:[%s6816_s4] ss:$16 sps:$4 sm:$0xff]  }
 0x23b   :  { %1418 = vmatprep.subr.bf16.mxu0 %v7220_v15  ;;  %1459 = vmatprep.subr.bf16.mxu1 %v7221_v20  ;;  %3763 = vrcp.f32 %v1324_v40  ;;  %v5137_v15 = vld [vmem:[%s6816_s4 + $0x8] ss:$16 sps:$4 sm:$0xff]   ;;  %v5143_v20 = vld [vmem:[%s6816_s4 + $0x24] ss:$16 sps:$4 sm:$0xff]   ;;  %v5223_v40 = vld [vmem:[%s6816_s4 + $0x8c] ss:$16 sps:$4 sm:$0xff]  }
 0x23c   :  { %1448 = vmatprep.mubr.bf16.mxu0 %v7126_v52  ;;  %1489 = vmatprep.mubr.bf16.mxu1 %v7126_v52  ;;  %7248 = vst [vmem:[#allocation6_spill] sm:$0xff] %v5223_v40 }
 0x23e   :  { %1419 = vmatpush1.bf16.msra.mxu0 %v7222_v21  ;;  %1460 = vmatpush1.bf16.msra.mxu1 %v7223_v22  ;;  %v5149_v21 = vld [vmem:[%s6816_s4 + $0x2c] ss:$16 sps:$4 sm:$0xff]   ;;  %v5157_v22 = vld [vmem:[%s6816_s4 + $0x20] ss:$16 sps:$4 sm:$0xff]  }
 0x23f   :  { %1420 = vmatprep.subr.bf16.mxu0 %v7224_v24  ;;  %1461 = vmatprep.subr.bf16.mxu1 %v7225_v25  ;;  %v5169_v24 = vld [vmem:[%s6816_s4 + $0x44] ss:$16 sps:$4 sm:$0xff]   ;;  %v5175_v25 = vld [vmem:[%s6816_s4 + $0x4c] ss:$16 sps:$4 sm:$0xff]  }
 0x241   :  { %v3758_v29 = vpop.eup %3757 }
 0x242   :  { %v3760_v31 = vpop.eup %3759  ;;  %1216 = vst [vmem:[%s6824_s9] sm:$0xff] %v3758_v29  ;;  %1421 = vmatpush1.bf16.msra.mxu0 %v7226_v32  ;;  %1462 = vmatpush1.bf16.msra.mxu1 %v7227_v33  ;;  %v5187_v29 = vld [vmem:[%s6816_s4 + $0x48] ss:$16 sps:$4 sm:$0xff]   ;;  %v5199_v32 = vld [vmem:[%s6816_s4 + $0x6c] ss:$16 sps:$4 sm:$0xff]   ;;  %v5205_v33 = vld [vmem:[%s6816_s4 + $0x60] ss:$16 sps:$4 sm:$0xff]  }
 0x243   :  { %v3762_v34 = vpop.eup %3761  ;;  %v1328_v35 = vmul.f32 %v3760_v31, %v3754_v23  ;;  %1422 = vmatprep.subr.bf16.mxu0 %v7228_v42  ;;  %1463 = vmatprep.subr.bf16.mxu1 %v7229_v43  ;;  %v5163_v23 = vld [vmem:[%s6816_s4 + $0x28] ss:$16 sps:$4 sm:$0xff]   ;;  %v5193_v31 = vld [vmem:[%s6816_s4 + $0x64] ss:$16 sps:$4 sm:$0xff]   ;;  %v5229_v42 = vld [vmem:[%s6816_s4 + $0x80] ss:$16 sps:$4 sm:$0xff]  }
 0x244   :  { %v1327_v44 = vmul.f32 %v3762_v34, %v4969_v5  ;;  %v7237_v5 = vld [vmem:[#allocation51_spill] sm:$0xff]  ;;  %v5211_v34 = vld [vmem:[%s6816_s4 + $0x68] ss:$16 sps:$4 sm:$0xff]   ;;  %7249 = vst [vmem:[#allocation7_spill] sm:$0xff] %v5229_v42 }
 0x245   :  { %v3764_v26 = vpop.eup %3763  ;;  %v5235_v43 = vld [vmem:[%s6816_s4 + $0x88] ss:$16 sps:$4 sm:$0xff]  }
 0x246   :  { %v5091_v45 = vadd.f32 %v1328_v35, %v1327_v44  ;;  %1423 = vmatpush1.bf16.msra.mxu0 %v7230_v46  ;;  %1464 = vmatpush1.bf16.msra.mxu1 %v7231_v51  ;;  %v5217_v35 = vld [vmem:[%s6816_s4 + $0x84] ss:$16 sps:$4 sm:$0xff]   ;;  %7250 = vst [vmem:[#allocation8_spill] sm:$0xff] %v5235_v43  ;;  %v5247_v46 = vld [vmem:[%s6816_s4 + $0xac] ss:$16 sps:$4 sm:$0xff]  }
 0x247   :  { %1424 = vmatprep.subr.bf16.mxu0 %v7232_v1  ;;  %1465 = vmatprep.subr.bf16.mxu1 %v7233_v3  ;;  %v5241_v44 = vld [vmem:[%s6816_s4 + $0xa4] ss:$16 sps:$4 sm:$0xff]   ;;  %7252 = vst [vmem:[#allocation10_spill] sm:$0xff] %v5247_v46  ;;  %v5253_v51 = vld [vmem:[%s6816_s4 + $0xa0] ss:$16 sps:$4 sm:$0xff]  }
 0x248   :  { %3765 = vtanh.f32 %v5091_v45  ;;  %7251 = vst [vmem:[#allocation9_spill] sm:$0xff] %v5241_v44  ;;  %7253 = vst [vmem:[#allocation11_spill] sm:$0xff] %v5253_v51  ;;  %v5259_v1 = vld [vmem:[%s6816_s4 + $0xa8] ss:$16 sps:$4 sm:$0xff]   ;;  %v5265_v3 = vld [vmem:[%s6816_s4 + $0xc4] ss:$16 sps:$4 sm:$0xff]  }
 0x249   :  { %7254 = vst [vmem:[#allocation12_spill] sm:$0xff] %v5259_v1  ;;  %7255 = vst [vmem:[#allocation13_spill] sm:$0xff] %v5265_v3 }
 0x24a   :  { %1425 = vmatpush1.bf16.msra.mxu0 %v7234_v48  ;;  %1466 = vmatpush1.bf16.msra.mxu1 %v7235_v17  ;;  %v5271_v48 = vld [vmem:[%s6816_s4 + $0xcc] ss:$16 sps:$4 sm:$0xff]   ;;  %v5277_v17 = vld [vmem:[%s6816_s4 + $0xc0] ss:$16 sps:$4 sm:$0xff]  }
 0x24b   :  { %1426 = vmatprep.subr.bf16.mxu0 %v7236_v16  ;;  %1467 = vmatprep.subr.bf16.mxu1 %v7237_v5  ;;  %7256 = vst [vmem:[#allocation14_spill] sm:$0xff] %v5271_v48  ;;  %7257 = vst [vmem:[#allocation15_spill] sm:$0xff] %v5277_v17  ;;  %v5283_v16 = vld [vmem:[%s6816_s4 + $0xc8] ss:$16 sps:$4 sm:$0xff]   ;;  %v5289_v5 = vld [vmem:[%s6816_s4 + $0xe4] ss:$16 sps:$4 sm:$0xff]  }
 0x24c   :  { %7258 = vst [vmem:[#allocation16_spill] sm:$0xff] %v5283_v16  ;;  %7259 = vst [vmem:[#allocation17_spill] sm:$0xff] %v5289_v5 }
 0x24e   :  { %1427 = vmatpush1.bf16.msra.mxu0 %v7238_v38  ;;  %1468 = vmatpush1.bf16.msra.mxu1 %v7239_v19  ;;  %v5295_v38 = vld [vmem:[%s6816_s4 + $0xec] ss:$16 sps:$4 sm:$0xff]   ;;  %v5301_v19 = vld [vmem:[%s6816_s4 + $0xe0] ss:$16 sps:$4 sm:$0xff]  }
 0x24f   :  { %1428 = vmatprep.subr.bf16.mxu0 %v7240_v37  ;;  %1469 = vmatprep.subr.bf16.mxu1 %v7241_v4  ;;  %7260 = vst [vmem:[#allocation18_spill] sm:$0xff] %v5295_v38  ;;  %7261 = vst [vmem:[#allocation19_spill] sm:$0xff] %v5301_v19  ;;  %v5307_v37 = vld [vmem:[%s6816_s4 + $0xe8] ss:$16 sps:$4 sm:$0xff]   ;;  %v5313_v4 = vld [vmem:[%s6819_s7 + $0x4] ss:$16 sps:$4 sm:$0xff]  }
 0x250   :  { %7262 = vst [vmem:[#allocation20_spill] sm:$0xff] %v5307_v37  ;;  %7263 = vst [vmem:[#allocation21_spill] sm:$0xff] %v5313_v4 }
 0x252   :  { %v3766_v30 = vpop.eup %3765  ;;  %1429 = vmatpush1.bf16.msra.mxu0 %v7242_v27  ;;  %1470 = vmatpush1.bf16.msra.mxu1 %v7243_v49  ;;  %v5333_v27 = vld [vmem:[%s6819_s7 + $0x8] ss:$16 sps:$4 sm:$0xff]   ;;  %v5339_v49 = vld [vmem:[%s6819_s7 + $0x24] ss:$16 sps:$4 sm:$0xff]  }
 0x253   :  { %1430 = vmatprep.subr.bf16.mxu0 %v7244_v10  ;;  %1471 = vmatprep.subr.bf16.mxu1 %v7245_v41  ;;  %v1331_v8 = vmul.f32 %v3766_v30, %v3764_v26  ;;  %v5319_v26 = vld [vmem:[%s6819_s7 + $0xc] ss:$16 sps:$4 sm:$0xff]   ;;  %v5327_v30 = vld [vmem:[%s6819_s7] ss:$16 sps:$4 sm:$0xff]   ;;  %7266 = vst [vmem:[#allocation24_spill] sm:$0xff] %v5333_v27  ;;  %7267 = vst [vmem:[#allocation25_spill] sm:$0xff] %v5339_v49 }
 0x254   :  { %7264 = vst [vmem:[#allocation22_spill] sm:$0xff] %v5319_v26  ;;  %7265 = vst [vmem:[#allocation23_spill] sm:$0xff] %v5327_v30  ;;  %v5345_v10 = vld [vmem:[%s6819_s7 + $0x2c] ss:$16 sps:$4 sm:$0xff]   ;;  %v5353_v41 = vld [vmem:[%s6819_s7 + $0x20] ss:$16 sps:$4 sm:$0xff]  }
 0x255   :  { %v5112_v9 = vpack.c.bf16 %v1331_v8, %v1331_v8  ;;  %7268 = vst [vmem:[#allocation26_spill] sm:$0xff] %v5345_v10  ;;  %7269 = vst [vmem:[#allocation27_spill] sm:$0xff] %v5353_v41  ;;  %v5359_v8 = vld [vmem:[%s6819_s7 + $0x28] ss:$16 sps:$4 sm:$0xff]  }
 0x256   :  { %1431 = vmatpush1.bf16.msra.mxu0 %v7246_v12  ;;  %1472 = vmatpush1.bf16.msra.mxu1 %v7247_v7  ;;  %7270 = vst [vmem:[#allocation28_spill] sm:$0xff] %v5359_v8  ;;  %v5365_v12 = vld [vmem:[%s6819_s7 + $0x44] ss:$16 sps:$4 sm:$0xff]   ;;  %v5371_v7 = vld [vmem:[%s6819_s7 + $0x4c] ss:$16 sps:$4 sm:$0xff]  }
 0x257   :  { %1534 = vmatprep.subr.bf16.mxu0 %v5117_v13  ;;  %1575 = vmatprep.subr.bf16.mxu1 %v5123_v11  ;;  %7271 = vst [vmem:[#allocation29_spill] sm:$0xff] %v5365_v12  ;;  %7272 = vst [vmem:[#allocation30_spill] sm:$0xff] %v5371_v7 }
 0x259   :  { %1449 = vmatmul.mubr.bf16.vlgmr.msra.gmra.mrb[36].mxu0 %v5112_v9  ;;  %1490 = vmatmul.mubr.bf16.vlgmr.msra.gmra.mrb[36].mxu1 %v5112_v9 }
 0x25a   :  { %1535 = vmatpush1.bf16.msra.mxu0 %v5131_v59  ;;  %1576 = vmatpush1.bf16.msra.mxu1 %v5137_v15 }
 0x25b   :  { %1536 = vmatprep.subr.bf16.mxu0 %v5143_v20  ;;  %1577 = vmatprep.subr.bf16.mxu1 %v5149_v21 }
 0x25c   :  { %1566 = vmatprep.mubr.bf16.mxu0 %v7126_v52  ;;  %1607 = vmatprep.mubr.bf16.mxu1 %v7126_v52 }
 0x25e   :  { %1537 = vmatpush1.bf16.msra.mxu0 %v5157_v22  ;;  %1578 = vmatpush1.bf16.msra.mxu1 %v5163_v23 }
 0x25f   :  { %1538 = vmatprep.subr.bf16.mxu0 %v5169_v24  ;;  %1579 = vmatprep.subr.bf16.mxu1 %v5175_v25 }
 0x262   :  { %1539 = vmatpush1.bf16.msra.mxu0 %v5181_v28  ;;  %1580 = vmatpush1.bf16.msra.mxu1 %v5187_v29 }
 0x263   :  { %1540 = vmatprep.subr.bf16.mxu0 %v5193_v31  ;;  %1581 = vmatprep.subr.bf16.mxu1 %v5199_v32 }
 0x266   :  { %1541 = vmatpush1.bf16.msra.mxu0 %v5205_v33  ;;  %1582 = vmatpush1.bf16.msra.mxu1 %v5211_v34 }
 0x267   :  { %1542 = vmatprep.subr.bf16.mxu0 %v5217_v35  ;;  %1583 = vmatprep.subr.bf16.mxu1 %v5223_v40 }
 0x26a   :  { %1543 = vmatpush1.bf16.msra.mxu0 %v5229_v42  ;;  %1584 = vmatpush1.bf16.msra.mxu1 %v5235_v43 }
 0x26b   :  { %1544 = vmatprep.subr.bf16.mxu0 %v5241_v44  ;;  %1585 = vmatprep.subr.bf16.mxu1 %v5247_v46 }
 0x26e   :  { %1545 = vmatpush1.bf16.msra.mxu0 %v5253_v51  ;;  %1586 = vmatpush1.bf16.msra.mxu1 %v5259_v1 }
 0x26f   :  { %1546 = vmatprep.subr.bf16.mxu0 %v5265_v3  ;;  %1587 = vmatprep.subr.bf16.mxu1 %v5271_v48 }
 0x272   :  { %1547 = vmatpush1.bf16.msra.mxu0 %v5277_v17  ;;  %1588 = vmatpush1.bf16.msra.mxu1 %v5283_v16 }
 0x273   :  { %1548 = vmatprep.subr.bf16.mxu0 %v5289_v5  ;;  %1589 = vmatprep.subr.bf16.mxu1 %v5295_v38 }
 0x276   :  { %1549 = vmatpush1.bf16.msra.mxu0 %v5301_v19  ;;  %1590 = vmatpush1.bf16.msra.mxu1 %v5307_v37 }
 0x277   :  { %1646 = vmatprep.subr.bf16.mxu0 %v5313_v4  ;;  %1687 = vmatprep.subr.bf16.mxu1 %v5319_v26 }
 0x279   :  { %1567 = vmatmul.mubr.bf16.vlgmr.msra.gmra.mrb[40].mxu0 %v5112_v9  ;;  %1608 = vmatmul.mubr.bf16.vlgmr.msra.gmra.mrb[40].mxu1 %v5112_v9  ;;  %v5377_v9 = vld [vmem:[%s6819_s7 + $0x40] ss:$16 sps:$4 sm:$0xff]  }
 0x27a   :  { %1647 = vmatpush1.bf16.msra.mxu0 %v5327_v30  ;;  %1688 = vmatpush1.bf16.msra.mxu1 %v5333_v27  ;;  %7273 = vst [vmem:[#allocation31_spill] sm:$0xff] %v5377_v9 }
 0x27b   :  { %1648 = vmatprep.subr.bf16.mxu0 %v5339_v49  ;;  %1689 = vmatprep.subr.bf16.mxu1 %v5345_v10 }
 0x27c   :  { %1678 = vmatprep.mubr.bf16.mxu0 %v7126_v52  ;;  %1719 = vmatprep.mubr.bf16.mxu1 %v7126_v52 }
 0x27e   :  { %1649 = vmatpush1.bf16.msra.mxu0 %v5353_v41  ;;  %1690 = vmatpush1.bf16.msra.mxu1 %v5359_v8  ;;  %v5383_v8 = vld [vmem:[%s6819_s7 + $0x48] ss:$16 sps:$4 sm:$0xff]  }
 0x27f   :  { %1650 = vmatprep.subr.bf16.mxu0 %v5365_v12  ;;  %1691 = vmatprep.subr.bf16.mxu1 %v5371_v7  ;;  %7274 = vst [vmem:[#allocation5_spill] sm:$0xff] %v5383_v8  ;;  %v5389_v12 = vld [vmem:[%s6819_s7 + $0x64] ss:$16 sps:$4 sm:$0xff]   ;;  %v5395_v7 = vld [vmem:[%s6819_s7 + $0x6c] ss:$16 sps:$4 sm:$0xff]  }
 0x280   :  { %7275 = vst [vmem:[#allocation62_spill] sm:$0xff] %v5389_v12  ;;  %7276 = vst [vmem:[#allocation63_spill] sm:$0xff] %v5395_v7 }
 0x282   :  { %1651 = vmatpush1.bf16.msra.mxu0 %v5377_v9  ;;  %1692 = vmatpush1.bf16.msra.mxu1 %v5383_v8  ;;  %v5401_v9 = vld [vmem:[%s6819_s7 + $0x60] ss:$16 sps:$4 sm:$0xff]   ;;  %v5407_v8 = vld [vmem:[%s6819_s7 + $0x68] ss:$16 sps:$4 sm:$0xff]  }
 0x283   :  { %1652 = vmatprep.subr.bf16.mxu0 %v5389_v12  ;;  %1693 = vmatprep.subr.bf16.mxu1 %v5395_v7  ;;  %7277 = vst [vmem:[#allocation64_spill] sm:$0xff] %v5401_v9  ;;  %7278 = vst [vmem:[#allocation65_spill] sm:$0xff] %v5407_v8  ;;  %v5413_v12 = vld [vmem:[%s6819_s7 + $0x84] ss:$16 sps:$4 sm:$0xff]   ;;  %v5419_v7 = vld [vmem:[%s6819_s7 + $0x8c] ss:$16 sps:$4 sm:$0xff]  }
 0x284   :  { %7279 = vst [vmem:[#allocation32_spill] sm:$0xff] %v5413_v12  ;;  %7280 = vst [vmem:[#allocation33_spill] sm:$0xff] %v5419_v7 }
 0x286   :  { %1653 = vmatpush1.bf16.msra.mxu0 %v5401_v9  ;;  %1694 = vmatpush1.bf16.msra.mxu1 %v5407_v8  ;;  %v5425_v9 = vld [vmem:[%s6819_s7 + $0x80] ss:$16 sps:$4 sm:$0xff]   ;;  %v5431_v8 = vld [vmem:[%s6819_s7 + $0x88] ss:$16 sps:$4 sm:$0xff]  }
 0x287   :  { %1654 = vmatprep.subr.bf16.mxu0 %v5413_v12  ;;  %1695 = vmatprep.subr.bf16.mxu1 %v5419_v7  ;;  %7281 = vst [vmem:[#allocation34_spill] sm:$0xff] %v5425_v9  ;;  %7282 = vst [vmem:[#allocation35_spill] sm:$0xff] %v5431_v8 }
 0x28a   :  { %1655 = vmatpush1.bf16.msra.mxu0 %v5425_v9  ;;  %1696 = vmatpush1.bf16.msra.mxu1 %v5431_v8 }
 0x28b   :  { %1656 = vmatprep.subr.bf16.mxu0 %v7195_v36  ;;  %1697 = vmatprep.subr.bf16.mxu1 %v7196_v39 }
 0x28e   :  { %1657 = vmatpush1.bf16.msra.mxu0 %v7197_v47  ;;  %1698 = vmatpush1.bf16.msra.mxu1 %v7198_v50 }
 0x28f   :  { %1658 = vmatprep.subr.bf16.mxu0 %v7199_v53  ;;  %1699 = vmatprep.subr.bf16.mxu1 %v7200_v54 }
 0x292   :  { %1659 = vmatpush1.bf16.msra.mxu0 %v7201_v55  ;;  %1700 = vmatpush1.bf16.msra.mxu1 %v7202_v56 }
 0x293   :  { %1660 = vmatprep.subr.bf16.mxu0 %v7203_v57  ;;  %1701 = vmatprep.subr.bf16.mxu1 %v7204_v58 }
 0x296   :  { %1661 = vmatpush1.bf16.msra.mxu0 %v7205_v61  ;;  %1702 = vmatpush1.bf16.msra.mxu1 %v7206_v62 }
 0x297   :  { %1728 = vmatprep.subr.bf16.mxu0 %v7207_v63  ;;  %1769 = vmatprep.subr.bf16.mxu1 %v7208_v0 }
 0x30c   :  { %v1368_v36 = vpop.f32.mrb[32].mxu0  ;;  %v1409_v39 = vpop.f32.mrb[32].mxu1 }
 0x30d   :  { %v1370_v47 = vpop.f32.mrb[33].mxu0  ;;  %v1411_v50 = vpop.f32.mrb[33].mxu1 }
 0x30e   :  { %v1372_v53 = vpop.f32.mrb[34].mxu0  ;;  %v1413_v54 = vpop.f32.mrb[34].mxu1 }
 0x30f   :  { %v1373_v55 = vpop.f32.mrb[35].mxu0  ;;  %v1414_v56 = vpop.f32.mrb[35].mxu1 }
 0x32c   :  { %v1450_v8 = vpop.f32.mrb[36].mxu0  ;;  %v1491_v57 = vpop.f32.mrb[36].mxu1 }
 0x32d   :  { %v1451_v9 = vadd.f32 %v1450_v8, %v1368_v36  ;;  %v1492_v58 = vadd.f32 %v1491_v57, %v1409_v39  ;;  %v1452_v7 = vpop.f32.mrb[37].mxu0  ;;  %v1493_v61 = vpop.f32.mrb[37].mxu1 }
 0x32e   :  { %v1453_v12 = vadd.f32 %v1452_v7, %v1370_v47  ;;  %v1494_v62 = vadd.f32 %v1493_v61, %v1411_v50  ;;  %v1454_v41 = vpop.f32.mrb[38].mxu0  ;;  %v1495_v63 = vpop.f32.mrb[38].mxu1 }
 0x32f   :  { %v1498_v0 = vadd.f32 %v1451_v9, %v5045_v6  ;;  %v1455_v10 = vpop.f32.mrb[39].mxu0  ;;  %v1496_v49 = vpop.f32.mrb[39].mxu1  ;;  %v1500_v36 = vadd.f32 %v1492_v58, %v5060_v14  ;;  %v7284_v63 = vld [vmem:[#allocation67_spill] sm:$0xff] }
 0x330   :  { %v1499_v27 = vadd.f32 %v1453_v12, %v5049_v60  ;;  %v1501_v55 = vadd.f32 %v1494_v62, %v5055_v18  ;;  %v7283_v62 = vld [vmem:[#allocation66_spill] sm:$0xff] }
 0x331   :  { %v3524_v53 = vmul.f32 -1.442695, %v1498_v0 }
 0x332   :  { %v3525_v54 = vmul.f32 -1.442695, %v1499_v27  ;;  %v3526_v8 = vmul.f32 -1.442695, %v1501_v55 }
 0x333   :  { %3767 = vpow2.f32 %v3524_v53 }
 0x334   :  { %3769 = vpow2.f32 %v3525_v54 }
 0x335   :  { %3771 = vpow2.f32 %v3526_v8  ;;  %v7285_v8 = vld [vmem:[#allocation68_spill] sm:$0xff] }
 0x336   :  { %3773 = vtanh.f32 %v1500_v36 }
 0x33d   :  { %v3768_v39 = vpop.eup %3767 }
 0x33e   :  { %v3770_v7 = vpop.eup %3769  ;;  %v1505_v47 = vadd.f32 1.0, %v3768_v39  ;;  %v7286_v39 = vld [vmem:[#allocation69_spill] sm:$0xff] }
 0x33f   :  { %v1511_v41 = vadd.f32 1.0, %v3770_v7  ;;  %v3772_v49 = vpop.eup %3771 }
 0x340   :  { %3775 = vrcp.f32 %v1505_v47  ;;  %v3774_v10 = vpop.eup %3773  ;;  %v1518_v50 = vadd.f32 1.0, %v3772_v49 }
 0x341   :  { %3777 = vrcp.f32 %v1511_v41 }
 0x342   :  { %3779 = vrcp.f32 %v1518_v50 }
 0x34a   :  { %v3776_v12 = vpop.eup %3775 }
 0x34b   :  { %v3778_v9 = vpop.eup %3777  ;;  %v1522_v27 = vmul.f32 %v3776_v12, %v3774_v10 }
 0x34c   :  { %v1521_v56 = vmul.f32 %v3778_v9, %v5068_v2  ;;  %v1568_v57 = vpop.f32.mrb[40].mxu0  ;;  %v1609_v61 = vpop.f32.mrb[40].mxu1 }
 0x34d   :  { %v1616_v58 = vadd.f32 %v1568_v57, %v7283_v62  ;;  %v1618_v0 = vadd.f32 %v1609_v61, %v7284_v63  ;;  %v1570_v53 = vpop.f32.mrb[41].mxu0  ;;  %v1611_v54 = vpop.f32.mrb[41].mxu1 }
 0x34e   :  { %v5455_v55 = vadd.f32 %v1522_v27, %v1521_v56  ;;  %v1617_v36 = vadd.f32 %v1570_v53, %v7285_v8  ;;  %v1619_v7 = vadd.f32 %v1611_v54, %v7286_v39  ;;  %v1572_v47 = vpop.f32.mrb[42].mxu0  ;;  %v1613_v41 = vpop.f32.mrb[42].mxu1  ;;  %v5475_v54 = vld [vmem:[%s6820_s6 + $0x24] ss:$16 sps:$4 sm:$0xff]   ;;  %v5481_v8 = vld [vmem:[%s6820_s6 + $0x2c] ss:$16 sps:$4 sm:$0xff]  }
 0x34f   :  { %v3528_v49 = vmul.f32 -1.442695, %v1616_v58  ;;  %v1573_v10 = vpop.f32.mrb[43].mxu0  ;;  %v1614_v2 = vpop.f32.mrb[43].mxu1  ;;  %v5463_v58 = vld [vmem:[%s6820_s6] ss:$16 sps:$4 sm:$0xff]  }
 0x350   :  { %v3529_v12 = vmul.f32 -1.442695, %v1617_v36  ;;  %3781 = vtanh.f32 %v5455_v55  ;;  %v3530_v9 = vmul.f32 -1.442695, %v1619_v7  ;;  %v3780_v57 = vpop.eup %3779  ;;  %v5489_v36 = vld [vmem:[%s6820_s6 + $0x20] ss:$16 sps:$4 sm:$0xff]  }
 0x351   :  { %3783 = vpow2.f32 %v3528_v49  ;;  %v5495_v39 = vld [vmem:[%s6820_s6 + $0x28] ss:$16 sps:$4 sm:$0xff]   ;;  %v5501_v47 = vld [vmem:[%s6820_s6 + $0x44] ss:$16 sps:$4 sm:$0xff]   ;;  %v5507_v41 = vld [vmem:[%s6820_s6 + $0x4c] ss:$16 sps:$4 sm:$0xff]  }
 0x352   :  { %3785 = vpow2.f32 %v3529_v12  ;;  %v5516_v12 = vld [vmem:[%s6820_s6 + $0x40] ss:$16 sps:$4 sm:$0xff]  }
 0x353   :  { %3787 = vtanh.f32 %v1618_v0  ;;  %v5469_v0 = vld [vmem:[%s6820_s6 + $0x8] ss:$16 sps:$4 sm:$0xff]  }
 0x354   :  { %3789 = vpow2.f32 %v3530_v9  ;;  %v5522_v9 = vld [vmem:[%s6820_s6 + $0x48] ss:$16 sps:$4 sm:$0xff]  }
 0x35a   :  { %v3782_v61 = vpop.eup %3781 }
 0x35b   :  { %v3784_v27 = vpop.eup %3783  ;;  %v1525_v56 = vmul.f32 %v3782_v61, %v3780_v57 }
 0x35c   :  { %v3786_v62 = vpop.eup %3785  ;;  %v1623_v63 = vadd.f32 1.0, %v3784_v27 }
 0x35d   :  { %v1629_v53 = vadd.f32 1.0, %v3786_v62  ;;  %3791 = vtanh.f32 %v1525_v56  ;;  %v1644_v50 = vpack.c.bf16 %v1525_v56, %v1525_v56  ;;  %v3788_v7 = vpop.eup %3787  ;;  %v5528_v56 = vld [vmem:[%s6820_s6 + $0x64] ss:$16 sps:$4 sm:$0xff]   ;;  %v5534_v62 = vld [vmem:[%s6820_s6 + $0x6c] ss:$16 sps:$4 sm:$0xff]  }
 0x35e   :  { %3793 = vrcp.f32 %v1623_v63  ;;  %v3790_v49 = vpop.eup %3789 }
 0x35f   :  { %3795 = vrcp.f32 %v1629_v53  ;;  %1679 = vmatmul.mubr.bf16.vlgmr.msra.gmra.mrb[44].mxu0 %v1644_v50  ;;  %1720 = vmatmul.mubr.bf16.vlgmr.msra.gmra.mrb[44].mxu1 %v1644_v50  ;;  %v1636_v27 = vadd.f32 1.0, %v3790_v49  ;;  %v5543_v50 = vld [vmem:[%s6820_s6 + $0x60] ss:$16 sps:$4 sm:$0xff]   ;;  %v5561_v49 = vld [vmem:[%s6820_s6 + $0x8c] ss:$16 sps:$4 sm:$0xff]  }
 0x360   :  { %1729 = vmatpush1.bf16.msra.mxu0 %v5463_v58  ;;  %1770 = vmatpush1.bf16.msra.mxu1 %v5469_v0  ;;  %7287 = vst [vmem:[#allocation36_spill] sm:$0xff] %v5561_v49 }
 0x361   :  { %1730 = vmatprep.subr.bf16.mxu0 %v5475_v54  ;;  %1771 = vmatprep.subr.bf16.mxu1 %v5481_v8  ;;  %3797 = vrcp.f32 %v1636_v27  ;;  %v5592_v27 = vld [vmem:[%s6820_s6 + $0xa0] ss:$16 sps:$4 sm:$0xff]  }
 0x362   :  { %1760 = vmatprep.mubr.bf16.mxu0 %v7126_v52  ;;  %1801 = vmatprep.mubr.bf16.mxu1 %v7126_v52  ;;  %7292 = vst [vmem:[#allocation41_spill] sm:$0xff] %v5592_v27 }
 0x364   :  { %1731 = vmatpush1.bf16.msra.mxu0 %v5489_v36  ;;  %1772 = vmatpush1.bf16.msra.mxu1 %v5495_v39 }
 0x365   :  { %1732 = vmatprep.subr.bf16.mxu0 %v5501_v47  ;;  %1773 = vmatprep.subr.bf16.mxu1 %v5507_v41 }
 0x367   :  { %v3792_v10 = vpop.eup %3791 }
 0x368   :  { %v3794_v2 = vpop.eup %3793  ;;  %3527 = vst [vmem:[%s6824_s9 + $0x8] sm:$0xff] %v3792_v10  ;;  %1733 = vmatpush1.bf16.msra.mxu0 %v5516_v12  ;;  %1774 = vmatpush1.bf16.msra.mxu1 %v5522_v9  ;;  %v5568_v10 = vld [vmem:[%s6820_s6 + $0x80] ss:$16 sps:$4 sm:$0xff]  }
 0x369   :  { %v3796_v57 = vpop.eup %3795  ;;  %v1640_v61 = vmul.f32 %v3794_v2, %v3788_v7  ;;  %1734 = vmatprep.subr.bf16.mxu0 %v5528_v56  ;;  %1775 = vmatprep.subr.bf16.mxu1 %v5534_v62  ;;  %v5549_v7 = vld [vmem:[%s6820_s6 + $0x68] ss:$16 sps:$4 sm:$0xff]   ;;  %7288 = vst [vmem:[#allocation37_spill] sm:$0xff] %v5568_v10 }
 0x36a   :  { %v1639_v63 = vmul.f32 %v3796_v57, %v5091_v45  ;;  %v5555_v45 = vld [vmem:[%s6820_s6 + $0x84] ss:$16 sps:$4 sm:$0xff]   ;;  %v5574_v2 = vld [vmem:[%s6820_s6 + $0x88] ss:$16 sps:$4 sm:$0xff]  }
 0x36b   :  { %7289 = vst [vmem:[#allocation38_spill] sm:$0xff] %v5574_v2  ;;  %v5580_v57 = vld [vmem:[%s6820_s6 + $0xa4] ss:$16 sps:$4 sm:$0xff]  }
 0x36c   :  { %v5538_v53 = vadd.f32 %v1640_v61, %v1639_v63  ;;  %1735 = vmatpush1.bf16.msra.mxu0 %v5543_v50  ;;  %1776 = vmatpush1.bf16.msra.mxu1 %v5549_v7  ;;  %7290 = vst [vmem:[#allocation39_spill] sm:$0xff] %v5580_v57  ;;  %v5586_v61 = vld [vmem:[%s6820_s6 + $0xac] ss:$16 sps:$4 sm:$0xff]   ;;  %v5598_v63 = vld [vmem:[%s6820_s6 + $0xa8] ss:$16 sps:$4 sm:$0xff]  }
 0x36d   :  { %1736 = vmatprep.subr.bf16.mxu0 %v5555_v45  ;;  %1777 = vmatprep.subr.bf16.mxu1 %v5561_v49  ;;  %7291 = vst [vmem:[#allocation40_spill] sm:$0xff] %v5586_v61  ;;  %7293 = vst [vmem:[#allocation42_spill] sm:$0xff] %v5598_v63 }
 0x36e   :  { %3799 = vtanh.f32 %v5538_v53 }
 0x370   :  { %1737 = vmatpush1.bf16.msra.mxu0 %v5568_v10  ;;  %1778 = vmatpush1.bf16.msra.mxu1 %v5574_v2  ;;  %v5634_v10 = vld [vmem:[%s6820_s6 + $0xec] ss:$16 sps:$4 sm:$0xff]  }
 0x371   :  { %1738 = vmatprep.subr.bf16.mxu0 %v5580_v57  ;;  %1779 = vmatprep.subr.bf16.mxu1 %v5586_v61  ;;  %v5604_v57 = vld [vmem:[%s6820_s6 + $0xc4] ss:$16 sps:$4 sm:$0xff]   ;;  %v5610_v61 = vld [vmem:[%s6820_s6 + $0xcc] ss:$16 sps:$4 sm:$0xff]  }
 0x372   :  { %7294 = vst [vmem:[#allocation43_spill] sm:$0xff] %v5604_v57  ;;  %7295 = vst [vmem:[#allocation44_spill] sm:$0xff] %v5610_v61 }
 0x374   :  { %1739 = vmatpush1.bf16.msra.mxu0 %v5592_v27  ;;  %1780 = vmatpush1.bf16.msra.mxu1 %v5598_v63  ;;  %v3798_v27 = vpop.eup %3797  ;;  %v5616_v63 = vld [vmem:[%s6820_s6 + $0xc0] ss:$16 sps:$4 sm:$0xff]  }
 0x375   :  { %1740 = vmatprep.subr.bf16.mxu0 %v5604_v57  ;;  %1781 = vmatprep.subr.bf16.mxu1 %v5610_v61  ;;  %7296 = vst [vmem:[#allocation45_spill] sm:$0xff] %v5616_v63  ;;  %v5622_v57 = vld [vmem:[%s6820_s6 + $0xc8] ss:$16 sps:$4 sm:$0xff]   ;;  %v5628_v61 = vld [vmem:[%s6820_s6 + $0xe4] ss:$16 sps:$4 sm:$0xff]  }
 0x376   :  { %7297 = vst [vmem:[#allocation46_spill] sm:$0xff] %v5622_v57  ;;  %7298 = vst [vmem:[#allocation47_spill] sm:$0xff] %v5628_v61 }
 0x378   :  { %v3800_v2 = vpop.eup %3799  ;;  %1741 = vmatpush1.bf16.msra.mxu0 %v5616_v63  ;;  %1782 = vmatpush1.bf16.msra.mxu1 %v5622_v57  ;;  %v5640_v57 = vld [vmem:[%s6820_s6 + $0xe0] ss:$16 sps:$4 sm:$0xff]  }
 0x379   :  { %1742 = vmatprep.subr.bf16.mxu0 %v5628_v61  ;;  %1783 = vmatprep.subr.bf16.mxu1 %v5634_v10  ;;  %v1643_v63 = vmul.f32 %v3800_v2, %v3798_v27  ;;  %v5646_v61 = vld [vmem:[%s6820_s6 + $0xe8] ss:$16 sps:$4 sm:$0xff]   ;;  %v7300_v27 = vld [vmem:[#allocation25_spill] sm:$0xff] }
 0x37a   :  { %v7299_v2 = vld [vmem:[#allocation24_spill] sm:$0xff] }
 0x37b   :  { %v1645_v49 = vpack.c.bf16 %v1643_v63, %v1643_v63  ;;  %v7301_v63 = vld [vmem:[#allocation26_spill] sm:$0xff] }
 0x37c   :  { %1743 = vmatpush1.bf16.msra.mxu0 %v5640_v57  ;;  %1784 = vmatpush1.bf16.msra.mxu1 %v5646_v61 }
 0x37d   :  { %1846 = vmatprep.subr.bf16.mxu0 %v5117_v13  ;;  %1887 = vmatprep.subr.bf16.mxu1 %v5123_v11 }
 0x37f   :  { %1761 = vmatmul.mubr.bf16.vlgmr.msra.gmra.mrb[48].mxu0 %v1645_v49  ;;  %1802 = vmatmul.mubr.bf16.vlgmr.msra.gmra.mrb[48].mxu1 %v1645_v49 }
 0x380   :  { %1847 = vmatpush1.bf16.msra.mxu0 %v5131_v59  ;;  %1888 = vmatpush1.bf16.msra.mxu1 %v5137_v15 }
 0x381   :  { %1848 = vmatprep.subr.bf16.mxu0 %v5143_v20  ;;  %1889 = vmatprep.subr.bf16.mxu1 %v5149_v21 }
 0x382   :  { %1878 = vmatprep.mubr.bf16.mxu0 %v7126_v52  ;;  %1919 = vmatprep.mubr.bf16.mxu1 %v7126_v52 }
 0x384   :  { %1849 = vmatpush1.bf16.msra.mxu0 %v5157_v22  ;;  %1890 = vmatpush1.bf16.msra.mxu1 %v5163_v23 }
 0x385   :  { %1850 = vmatprep.subr.bf16.mxu0 %v5169_v24  ;;  %1891 = vmatprep.subr.bf16.mxu1 %v5175_v25 }
 0x388   :  { %1851 = vmatpush1.bf16.msra.mxu0 %v5181_v28  ;;  %1892 = vmatpush1.bf16.msra.mxu1 %v5187_v29 }
 0x389   :  { %1852 = vmatprep.subr.bf16.mxu0 %v5193_v31  ;;  %1893 = vmatprep.subr.bf16.mxu1 %v5199_v32 }
 0x38c   :  { %1853 = vmatpush1.bf16.msra.mxu0 %v5205_v33  ;;  %1894 = vmatpush1.bf16.msra.mxu1 %v5211_v34 }
 0x38d   :  { %1854 = vmatprep.subr.bf16.mxu0 %v5217_v35  ;;  %1895 = vmatprep.subr.bf16.mxu1 %v5223_v40 }
 0x390   :  { %1855 = vmatpush1.bf16.msra.mxu0 %v5229_v42  ;;  %1896 = vmatpush1.bf16.msra.mxu1 %v5235_v43 }
 0x391   :  { %1856 = vmatprep.subr.bf16.mxu0 %v5241_v44  ;;  %1897 = vmatprep.subr.bf16.mxu1 %v5247_v46 }
 0x394   :  { %1857 = vmatpush1.bf16.msra.mxu0 %v5253_v51  ;;  %1898 = vmatpush1.bf16.msra.mxu1 %v5259_v1 }
 0x395   :  { %1858 = vmatprep.subr.bf16.mxu0 %v5265_v3  ;;  %1899 = vmatprep.subr.bf16.mxu1 %v5271_v48 }
 0x398   :  { %1859 = vmatpush1.bf16.msra.mxu0 %v5277_v17  ;;  %1900 = vmatpush1.bf16.msra.mxu1 %v5283_v16 }
 0x399   :  { %1860 = vmatprep.subr.bf16.mxu0 %v5289_v5  ;;  %1901 = vmatprep.subr.bf16.mxu1 %v5295_v38  ;;  %v7311_v38 = vld [vmem:[#allocation65_spill] sm:$0xff]  ;;  %v7312_v5 = vld [vmem:[#allocation32_spill] sm:$0xff] }
 0x39c   :  { %1861 = vmatpush1.bf16.msra.mxu0 %v5301_v19  ;;  %1902 = vmatpush1.bf16.msra.mxu1 %v5307_v37  ;;  %v7302_v19 = vld [vmem:[#allocation27_spill] sm:$0xff]  ;;  %v7303_v37 = vld [vmem:[#allocation28_spill] sm:$0xff] }
 0x39d   :  { %1958 = vmatprep.subr.bf16.mxu0 %v5313_v4  ;;  %1999 = vmatprep.subr.bf16.mxu1 %v5319_v26  ;;  %v7304_v4 = vld [vmem:[#allocation29_spill] sm:$0xff]  ;;  %v7305_v26 = vld [vmem:[#allocation30_spill] sm:$0xff] }
 0x39f   :  { %1879 = vmatmul.mubr.bf16.vlgmr.msra.gmra.mrb[52].mxu0 %v1645_v49  ;;  %1920 = vmatmul.mubr.bf16.vlgmr.msra.gmra.mrb[52].mxu1 %v1645_v49  ;;  %v7306_v49 = vld [vmem:[#allocation31_spill] sm:$0xff] }
 0x3a0   :  { %1959 = vmatpush1.bf16.msra.mxu0 %v5327_v30  ;;  %2000 = vmatpush1.bf16.msra.mxu1 %v7299_v2  ;;  %v7307_v30 = vld [vmem:[#allocation5_spill] sm:$0xff]  ;;  %v7308_v2 = vld [vmem:[#allocation62_spill] sm:$0xff] }
 0x3a1   :  { %1960 = vmatprep.subr.bf16.mxu0 %v7300_v27  ;;  %2001 = vmatprep.subr.bf16.mxu1 %v7301_v63  ;;  %v7309_v27 = vld [vmem:[#allocation63_spill] sm:$0xff]  ;;  %v7310_v63 = vld [vmem:[#allocation64_spill] sm:$0xff] }
 0x3a2   :  { %1990 = vmatprep.mubr.bf16.mxu0 %v7126_v52  ;;  %2031 = vmatprep.mubr.bf16.mxu1 %v7126_v52 }
 0x3a4   :  { %1961 = vmatpush1.bf16.msra.mxu0 %v7302_v19  ;;  %2002 = vmatpush1.bf16.msra.mxu1 %v7303_v37  ;;  %v7313_v19 = vld [vmem:[#allocation33_spill] sm:$0xff]  ;;  %v7314_v37 = vld [vmem:[#allocation34_spill] sm:$0xff] }
 0x3a5   :  { %1962 = vmatprep.subr.bf16.mxu0 %v7304_v4  ;;  %2003 = vmatprep.subr.bf16.mxu1 %v7305_v26  ;;  %v7315_v4 = vld [vmem:[#allocation35_spill] sm:$0xff] }
 0x3a8   :  { %1963 = vmatpush1.bf16.msra.mxu0 %v7306_v49  ;;  %2004 = vmatpush1.bf16.msra.mxu1 %v7307_v30  ;;  %v5708_v30 = vld [vmem:[%s6819_s7 + $0xa4] ss:$16 sps:$4 sm:$0xff]  }
 0x3a9   :  { %1964 = vmatprep.subr.bf16.mxu0 %v7308_v2  ;;  %2005 = vmatprep.subr.bf16.mxu1 %v7309_v27  ;;  %7316 = vst [vmem:[#allocation48_spill] sm:$0xff] %v5708_v30 }
 0x3ac   :  { %1965 = vmatpush1.bf16.msra.mxu0 %v7310_v63  ;;  %2006 = vmatpush1.bf16.msra.mxu1 %v7311_v38  ;;  %v5714_v63 = vld [vmem:[%s6819_s7 + $0xac] ss:$16 sps:$4 sm:$0xff]  }
 0x3ad   :  { %1966 = vmatprep.subr.bf16.mxu0 %v7312_v5  ;;  %2007 = vmatprep.subr.bf16.mxu1 %v7313_v19  ;;  %7317 = vst [vmem:[#allocation49_spill] sm:$0xff] %v5714_v63 }
 0x3b0   :  { %1967 = vmatpush1.bf16.msra.mxu0 %v7314_v37  ;;  %2008 = vmatpush1.bf16.msra.mxu1 %v7315_v4  ;;  %v5720_v37 = vld [vmem:[%s6819_s7 + $0xa0] ss:$16 sps:$4 sm:$0xff]   ;;  %v5726_v4 = vld [vmem:[%s6819_s7 + $0xa8] ss:$16 sps:$4 sm:$0xff]  }
 0x3b1   :  { %1968 = vmatprep.subr.bf16.mxu0 %v5708_v30  ;;  %2009 = vmatprep.subr.bf16.mxu1 %v5714_v63  ;;  %7318 = vst [vmem:[#allocation50_spill] sm:$0xff] %v5720_v37  ;;  %7319 = vst [vmem:[#allocation51_spill] sm:$0xff] %v5726_v4  ;;  %v5732_v30 = vld [vmem:[%s6819_s7 + $0xc4] ss:$16 sps:$4 sm:$0xff]   ;;  %v5738_v63 = vld [vmem:[%s6819_s7 + $0xcc] ss:$16 sps:$4 sm:$0xff]  }
 0x3b2   :  { %7320 = vst [vmem:[#allocation52_spill] sm:$0xff] %v5732_v30  ;;  %7321 = vst [vmem:[#allocation53_spill] sm:$0xff] %v5738_v63 }
 0x3b4   :  { %1969 = vmatpush1.bf16.msra.mxu0 %v5720_v37  ;;  %2010 = vmatpush1.bf16.msra.mxu1 %v5726_v4  ;;  %v5744_v37 = vld [vmem:[%s6819_s7 + $0xc0] ss:$16 sps:$4 sm:$0xff]   ;;  %v5750_v4 = vld [vmem:[%s6819_s7 + $0xc8] ss:$16 sps:$4 sm:$0xff]  }
 0x3b5   :  { %1970 = vmatprep.subr.bf16.mxu0 %v5732_v30  ;;  %2011 = vmatprep.subr.bf16.mxu1 %v5738_v63  ;;  %7322 = vst [vmem:[#allocation54_spill] sm:$0xff] %v5744_v37  ;;  %7323 = vst [vmem:[#allocation55_spill] sm:$0xff] %v5750_v4  ;;  %v5756_v30 = vld [vmem:[%s6819_s7 + $0xe4] ss:$16 sps:$4 sm:$0xff]   ;;  %v5762_v63 = vld [vmem:[%s6819_s7 + $0xec] ss:$16 sps:$4 sm:$0xff]  }
 0x3b6   :  { %7324 = vst [vmem:[#allocation56_spill] sm:$0xff] %v5756_v30  ;;  %7325 = vst [vmem:[#allocation57_spill] sm:$0xff] %v5762_v63 }
 0x3b8   :  { %1971 = vmatpush1.bf16.msra.mxu0 %v5744_v37  ;;  %2012 = vmatpush1.bf16.msra.mxu1 %v5750_v4  ;;  %v5768_v37 = vld [vmem:[%s6819_s7 + $0xe0] ss:$16 sps:$4 sm:$0xff]   ;;  %v5774_v4 = vld [vmem:[%s6819_s7 + $0xe8] ss:$16 sps:$4 sm:$0xff]  }
 0x3b9   :  { %1972 = vmatprep.subr.bf16.mxu0 %v5756_v30  ;;  %2013 = vmatprep.subr.bf16.mxu1 %v5762_v63  ;;  %7326 = vst [vmem:[#allocation58_spill] sm:$0xff] %v5768_v37  ;;  %7327 = vst [vmem:[#allocation59_spill] sm:$0xff] %v5774_v4  ;;  %v5780_v30 = vld [vmem:[%s6820_s6 + $0x4] ss:$16 sps:$4 sm:$0xff]   ;;  %v5786_v63 = vld [vmem:[%s6820_s6 + $0xc] ss:$16 sps:$4 sm:$0xff]  }
 0x3ba   :  { %7328 = vst [vmem:[#allocation60_spill] sm:$0xff] %v5780_v30  ;;  %7329 = vst [vmem:[#allocation61_spill] sm:$0xff] %v5786_v63 }
 0x3bc   :  { %1973 = vmatpush1.bf16.msra.mxu0 %v5768_v37  ;;  %2014 = vmatpush1.bf16.msra.mxu1 %v5774_v4 }
 0x3bd   :  { %2040 = vmatprep.subr.bf16.mxu0 %v5780_v30  ;;  %2081 = vmatprep.subr.bf16.mxu1 %v5786_v63 }
 0x432   :  { %v1680_v37 = vpop.f32.mrb[44].mxu0  ;;  %v1721_v19 = vpop.f32.mrb[44].mxu1 }
 0x433   :  { %v1682_v5 = vpop.f32.mrb[45].mxu0  ;;  %v1723_v38 = vpop.f32.mrb[45].mxu1 }
 0x434   :  { %v1684_v27 = vpop.f32.mrb[46].mxu0  ;;  %v1725_v4 = vpop.f32.mrb[46].mxu1 }
 0x435   :  { %v1685_v2 = vpop.f32.mrb[47].mxu0  ;;  %v1726_v49 = vpop.f32.mrb[47].mxu1 }
 0x452   :  { %v1762_v26 = vpop.f32.mrb[48].mxu0  ;;  %v1803_v16 = vpop.f32.mrb[48].mxu1 }
 0x453   :  { %v1763_v17 = vadd.f32 %v1762_v26, %v1680_v37  ;;  %v1804_v48 = vadd.f32 %v1803_v16, %v1721_v19  ;;  %v1764_v30 = vpop.f32.mrb[49].mxu0  ;;  %v1805_v3 = vpop.f32.mrb[49].mxu1 }
 0x454   :  { %v1765_v1 = vadd.f32 %v1764_v30, %v1682_v5  ;;  %v1806_v51 = vadd.f32 %v1805_v3, %v1723_v38  ;;  %v1766_v46 = vpop.f32.mrb[50].mxu0  ;;  %v1807_v44 = vpop.f32.mrb[50].mxu1  ;;  %v7330_v30 = vld [vmem:[#allocation70_spill] sm:$0xff] }
 0x455   :  { %v1810_v63 = vadd.f32 %v1763_v17, %v5045_v6  ;;  %v1767_v43 = vpop.f32.mrb[51].mxu0  ;;  %v1808_v42 = vpop.f32.mrb[51].mxu1  ;;  %v1812_v16 = vadd.f32 %v1804_v48, %v5060_v14 }
 0x456   :  { %v1811_v40 = vadd.f32 %v1765_v1, %v5049_v60  ;;  %v1813_v2 = vadd.f32 %v1806_v51, %v5055_v18 }
 0x457   :  { %v3531_v27 = vmul.f32 -1.442695, %v1810_v63  ;;  %v7331_v63 = vld [vmem:[#allocation71_spill] sm:$0xff] }
 0x458   :  { %v3532_v4 = vmul.f32 -1.442695, %v1811_v40  ;;  %v3533_v37 = vmul.f32 -1.442695, %v1813_v2 }
 0x459   :  { %3801 = vpow2.f32 %v3531_v27 }
 0x45a   :  { %3803 = vpow2.f32 %v3532_v4 }
 0x45b   :  { %3805 = vpow2.f32 %v3533_v37  ;;  %v7332_v37 = vld [vmem:[#allocation72_spill] sm:$0xff] }
 0x45c   :  { %3807 = vtanh.f32 %v1812_v16 }
 0x463   :  { %v3802_v19 = vpop.eup %3801 }
 0x464   :  { %v3804_v5 = vpop.eup %3803  ;;  %v1817_v3 = vadd.f32 1.0, %v3802_v19  ;;  %v7333_v19 = vld [vmem:[#allocation73_spill] sm:$0xff] }
 0x465   :  { %v1823_v44 = vadd.f32 1.0, %v3804_v5  ;;  %v3806_v42 = vpop.eup %3805 }
 0x466   :  { %3809 = vrcp.f32 %v1817_v3  ;;  %v3808_v43 = vpop.eup %3807  ;;  %v1830_v17 = vadd.f32 1.0, %v3806_v42 }
 0x467   :  { %3811 = vrcp.f32 %v1823_v44 }
 0x468   :  { %3813 = vrcp.f32 %v1830_v17 }
 0x470   :  { %v3810_v46 = vpop.eup %3809 }
 0x471   :  { %v3812_v1 = vpop.eup %3811  ;;  %v1834_v40 = vmul.f32 %v3810_v46, %v3808_v43 }
 0x472   :  { %v1833_v38 = vmul.f32 %v3812_v1, %v5455_v55  ;;  %v1880_v51 = vpop.f32.mrb[52].mxu0  ;;  %v1921_v26 = vpop.f32.mrb[52].mxu1 }
 0x473   :  { %v1928_v48 = vadd.f32 %v1880_v51, %v7330_v30  ;;  %v1930_v49 = vadd.f32 %v1921_v26, %v7331_v63  ;;  %v1882_v27 = vpop.f32.mrb[53].mxu0  ;;  %v1923_v4 = vpop.f32.mrb[53].mxu1 }
 0x474   :  { %v5796_v2 = vadd.f32 %v1834_v40, %v1833_v38  ;;  %v1929_v16 = vadd.f32 %v1882_v27, %v7332_v37  ;;  %v1931_v5 = vadd.f32 %v1923_v4, %v7333_v19  ;;  %v1884_v3 = vpop.f32.mrb[54].mxu0  ;;  %v1925_v44 = vpop.f32.mrb[54].mxu1 }
 0x475   :  { %v3535_v42 = vmul.f32 -1.442695, %v1928_v48  ;;  %v1885_v43 = vpop.f32.mrb[55].mxu0  ;;  %v1926_v55 = vpop.f32.mrb[55].mxu1 }
 0x476   :  { %v3536_v46 = vmul.f32 -1.442695, %v1929_v16  ;;  %3815 = vtanh.f32 %v5796_v2  ;;  %v3537_v1 = vmul.f32 -1.442695, %v1931_v5  ;;  %v3814_v51 = vpop.eup %3813  ;;  %v7335_v43 = vld [vmem:[#allocation37_spill] sm:$0xff]  ;;  %v7336_v55 = vld [vmem:[#allocation38_spill] sm:$0xff] }
 0x477   :  { %3817 = vpow2.f32 %v3535_v42  ;;  %v7334_v42 = vld [vmem:[#allocation36_spill] sm:$0xff] }
 0x478   :  { %3819 = vpow2.f32 %v3536_v46  ;;  %v7337_v46 = vld [vmem:[#allocation39_spill] sm:$0xff] }
 0x479   :  { %3821 = vtanh.f32 %v1930_v49 }
 0x47a   :  { %3823 = vpow2.f32 %v3537_v1  ;;  %v7339_v1 = vld [vmem:[#allocation41_spill] sm:$0xff] }
 0x480   :  { %v3816_v26 = vpop.eup %3815 }
 0x481   :  { %v3818_v40 = vpop.eup %3817  ;;  %v1837_v38 = vmul.f32 %v3816_v26, %v3814_v51  ;;  %v7340_v51 = vld [vmem:[#allocation42_spill] sm:$0xff]  ;;  %v7341_v26 = vld [vmem:[#allocation43_spill] sm:$0xff] }
 0x482   :  { %v3820_v30 = vpop.eup %3819  ;;  %v1935_v63 = vadd.f32 1.0, %v3818_v40  ;;  %v7342_v40 = vld [vmem:[#allocation44_spill] sm:$0xff] }
 0x483   :  { %v1941_v27 = vadd.f32 1.0, %v3820_v30  ;;  %3825 = vtanh.f32 %v1837_v38  ;;  %v1956_v17 = vpack.c.bf16 %v1837_v38, %v1837_v38  ;;  %v3822_v48 = vpop.eup %3821 }
 0x484   :  { %3827 = vrcp.f32 %v1935_v63  ;;  %v3824_v49 = vpop.eup %3823  ;;  %v7343_v63 = vld [vmem:[#allocation45_spill] sm:$0xff] }
 0x485   :  { %3829 = vrcp.f32 %v1941_v27  ;;  %1991 = vmatmul.mubr.bf16.vlgmr.msra.gmra.mrb[56].mxu0 %v1956_v17  ;;  %2032 = vmatmul.mubr.bf16.vlgmr.msra.gmra.mrb[56].mxu1 %v1956_v17  ;;  %v1948_v5 = vadd.f32 1.0, %v3824_v49  ;;  %v7344_v27 = vld [vmem:[#allocation46_spill] sm:$0xff]  ;;  %v7345_v17 = vld [vmem:[#allocation47_spill] sm:$0xff] }
 0x486   :  { %2041 = vmatpush1.bf16.msra.mxu0 %v5463_v58  ;;  %2082 = vmatpush1.bf16.msra.mxu1 %v5469_v0 }
 0x487   :  { %2042 = vmatprep.subr.bf16.mxu0 %v5475_v54  ;;  %2083 = vmatprep.subr.bf16.mxu1 %v5481_v8  ;;  %3831 = vrcp.f32 %v1948_v5  ;;  %v7367_v5 = vld [vmem:[#allocation27_spill] sm:$0xff] }
 0x488   :  { %2072 = vmatprep.mubr.bf16.mxu0 %v7126_v52  ;;  %2113 = vmatprep.mubr.bf16.mxu1 %v7126_v52 }
 0x48a   :  { %2043 = vmatpush1.bf16.msra.mxu0 %v5489_v36  ;;  %2084 = vmatpush1.bf16.msra.mxu1 %v5495_v39 }
 0x48b   :  { %2044 = vmatprep.subr.bf16.mxu0 %v5501_v47  ;;  %2085 = vmatprep.subr.bf16.mxu1 %v5507_v41 }
 0x48d   :  { %v3826_v4 = vpop.eup %3825 }
 0x48e   :  { %v3828_v37 = vpop.eup %3827  ;;  %3534 = vst [vmem:[%s6824_s9 + $0x10] sm:$0xff] %v3826_v4  ;;  %2045 = vmatpush1.bf16.msra.mxu0 %v5516_v12  ;;  %2086 = vmatpush1.bf16.msra.mxu1 %v5522_v9  ;;  %v7363_v4 = vld [vmem:[#allocation23_spill] sm:$0xff] }
 0x48f   :  { %v3830_v16 = vpop.eup %3829  ;;  %v1952_v19 = vmul.f32 %v3828_v37, %v3822_v48  ;;  %2046 = vmatprep.subr.bf16.mxu0 %v5528_v56  ;;  %2087 = vmatprep.subr.bf16.mxu1 %v5534_v62  ;;  %v7364_v37 = vld [vmem:[#allocation24_spill] sm:$0xff] }
 0x490   :  { %v1951_v3 = vmul.f32 %v3830_v16, %v5538_v53  ;;  %v7338_v53 = vld [vmem:[#allocation40_spill] sm:$0xff]  ;;  %v7365_v16 = vld [vmem:[#allocation25_spill] sm:$0xff] }
 0x491   :  { %v3832_v38 = vpop.eup %3831 }
 0x492   :  { %v5819_v44 = vadd.f32 %v1952_v19, %v1951_v3  ;;  %2047 = vmatpush1.bf16.msra.mxu0 %v5543_v50  ;;  %2088 = vmatpush1.bf16.msra.mxu1 %v5549_v7  ;;  %v7366_v19 = vld [vmem:[#allocation26_spill] sm:$0xff]  ;;  %v7368_v3 = vld [vmem:[#allocation28_spill] sm:$0xff] }
 0x493   :  { %2048 = vmatprep.subr.bf16.mxu0 %v5555_v45  ;;  %2089 = vmatprep.subr.bf16.mxu1 %v7334_v42 }
 0x494   :  { %3833 = vtanh.f32 %v5819_v44 }
 0x496   :  { %2049 = vmatpush1.bf16.msra.mxu0 %v7335_v43  ;;  %2090 = vmatpush1.bf16.msra.mxu1 %v7336_v55 }
 0x497   :  { %2050 = vmatprep.subr.bf16.mxu0 %v7337_v46  ;;  %2091 = vmatprep.subr.bf16.mxu1 %v7338_v53 }
 0x49a   :  { %2051 = vmatpush1.bf16.msra.mxu0 %v7339_v1  ;;  %2092 = vmatpush1.bf16.msra.mxu1 %v7340_v51 }
 0x49b   :  { %2052 = vmatprep.subr.bf16.mxu0 %v7341_v26  ;;  %2093 = vmatprep.subr.bf16.mxu1 %v7342_v40 }
 0x49e   :  { %v3834_v30 = vpop.eup %3833  ;;  %2053 = vmatpush1.bf16.msra.mxu0 %v7343_v63  ;;  %2094 = vmatpush1.bf16.msra.mxu1 %v7344_v27 }
 0x49f   :  { %2054 = vmatprep.subr.bf16.mxu0 %v7345_v17  ;;  %2095 = vmatprep.subr.bf16.mxu1 %v5634_v10  ;;  %v1955_v48 = vmul.f32 %v3834_v30, %v3832_v38  ;;  %v7369_v38 = vld [vmem:[#allocation29_spill] sm:$0xff]  ;;  %v7370_v30 = vld [vmem:[#allocation30_spill] sm:$0xff] }
 0x4a1   :  { %v1957_v49 = vpack.c.bf16 %v1955_v48, %v1955_v48  ;;  %v7371_v48 = vld [vmem:[#allocation31_spill] sm:$0xff] }
 0x4a2   :  { %2055 = vmatpush1.bf16.msra.mxu0 %v5640_v57  ;;  %2096 = vmatpush1.bf16.msra.mxu1 %v5646_v61 }
 0x4a3   :  { %2158 = vmatprep.subr.bf16.mxu0 %v5117_v13  ;;  %2199 = vmatprep.subr.bf16.mxu1 %v5123_v11  ;;  %v7346_v13 = vld [vmem:[#allocation6_spill] sm:$0xff]  ;;  %v7347_v11 = vld [vmem:[#allocation7_spill] sm:$0xff] }
 0x4a5   :  { %2073 = vmatmul.mubr.bf16.vlgmr.msra.gmra.mrb[60].mxu0 %v1957_v49  ;;  %2114 = vmatmul.mubr.bf16.vlgmr.msra.gmra.mrb[60].mxu1 %v1957_v49 }
 0x4a6   :  { %2159 = vmatpush1.bf16.msra.mxu0 %v5131_v59  ;;  %2200 = vmatpush1.bf16.msra.mxu1 %v5137_v15  ;;  %v7348_v59 = vld [vmem:[#allocation8_spill] sm:$0xff]  ;;  %v7349_v15 = vld [vmem:[#allocation9_spill] sm:$0xff] }
 0x4a7   :  { %2160 = vmatprep.subr.bf16.mxu0 %v5143_v20  ;;  %2201 = vmatprep.subr.bf16.mxu1 %v5149_v21  ;;  %v7350_v20 = vld [vmem:[#allocation10_spill] sm:$0xff]  ;;  %v7351_v21 = vld [vmem:[#allocation11_spill] sm:$0xff] }
 0x4a8   :  { %2190 = vmatprep.mubr.bf16.mxu0 %v7126_v52  ;;  %2231 = vmatprep.mubr.bf16.mxu1 %v7126_v52 }
 0x4aa   :  { %2161 = vmatpush1.bf16.msra.mxu0 %v5157_v22  ;;  %2202 = vmatpush1.bf16.msra.mxu1 %v5163_v23  ;;  %v7352_v22 = vld [vmem:[#allocation12_spill] sm:$0xff]  ;;  %v7353_v23 = vld [vmem:[#allocation13_spill] sm:$0xff] }
 0x4ab   :  { %2162 = vmatprep.subr.bf16.mxu0 %v5169_v24  ;;  %2203 = vmatprep.subr.bf16.mxu1 %v5175_v25  ;;  %v7354_v24 = vld [vmem:[#allocation14_spill] sm:$0xff]  ;;  %v7355_v25 = vld [vmem:[#allocation15_spill] sm:$0xff] }
 0x4ae   :  { %2163 = vmatpush1.bf16.msra.mxu0 %v5181_v28  ;;  %2204 = vmatpush1.bf16.msra.mxu1 %v5187_v29  ;;  %v7356_v28 = vld [vmem:[#allocation16_spill] sm:$0xff]  ;;  %v7357_v29 = vld [vmem:[#allocation17_spill] sm:$0xff] }
 0x4af   :  { %2164 = vmatprep.subr.bf16.mxu0 %v5193_v31  ;;  %2205 = vmatprep.subr.bf16.mxu1 %v5199_v32  ;;  %v7358_v31 = vld [vmem:[#allocation18_spill] sm:$0xff]  ;;  %v7359_v32 = vld [vmem:[#allocation19_spill] sm:$0xff] }
 0x4b2   :  { %2165 = vmatpush1.bf16.msra.mxu0 %v5205_v33  ;;  %2206 = vmatpush1.bf16.msra.mxu1 %v5211_v34  ;;  %v7360_v33 = vld [vmem:[#allocation20_spill] sm:$0xff]  ;;  %v7361_v34 = vld [vmem:[#allocation21_spill] sm:$0xff] }
 0x4b3   :  { %2166 = vmatprep.subr.bf16.mxu0 %v5217_v35  ;;  %2207 = vmatprep.subr.bf16.mxu1 %v7346_v13  ;;  %v7362_v35 = vld [vmem:[#allocation22_spill] sm:$0xff] }
 0x4b4   :  { %v7373_v13 = vld [vmem:[#allocation62_spill] sm:$0xff] }
 0x4b6   :  { %2167 = vmatpush1.bf16.msra.mxu0 %v7347_v11  ;;  %2208 = vmatpush1.bf16.msra.mxu1 %v7348_v59  ;;  %v7374_v11 = vld [vmem:[#allocation63_spill] sm:$0xff]  ;;  %v7375_v59 = vld [vmem:[#allocation64_spill] sm:$0xff] }
 0x4b7   :  { %2168 = vmatprep.subr.bf16.mxu0 %v7349_v15  ;;  %2209 = vmatprep.subr.bf16.mxu1 %v7350_v20  ;;  %v7376_v15 = vld [vmem:[#allocation65_spill] sm:$0xff]  ;;  %v7377_v20 = vld [vmem:[#allocation32_spill] sm:$0xff] }
 0x4ba   :  { %2169 = vmatpush1.bf16.msra.mxu0 %v7351_v21  ;;  %2210 = vmatpush1.bf16.msra.mxu1 %v7352_v22  ;;  %v7378_v21 = vld [vmem:[#allocation33_spill] sm:$0xff]  ;;  %v7379_v22 = vld [vmem:[#allocation34_spill] sm:$0xff] }
 0x4bb   :  { %2170 = vmatprep.subr.bf16.mxu0 %v7353_v23  ;;  %2211 = vmatprep.subr.bf16.mxu1 %v7354_v24  ;;  %v7380_v23 = vld [vmem:[#allocation35_spill] sm:$0xff]  ;;  %v7381_v24 = vld [vmem:[#allocation48_spill] sm:$0xff] }
 0x4be   :  { %2171 = vmatpush1.bf16.msra.mxu0 %v7355_v25  ;;  %2212 = vmatpush1.bf16.msra.mxu1 %v7356_v28  ;;  %v7382_v25 = vld [vmem:[#allocation49_spill] sm:$0xff]  ;;  %v7383_v28 = vld [vmem:[#allocation50_spill] sm:$0xff] }
 0x4bf   :  { %2172 = vmatprep.subr.bf16.mxu0 %v7357_v29  ;;  %2213 = vmatprep.subr.bf16.mxu1 %v7358_v31  ;;  %v7384_v29 = vld [vmem:[#allocation51_spill] sm:$0xff]  ;;  %v7385_v31 = vld [vmem:[#allocation52_spill] sm:$0xff] }
 0x4c2   :  { %2173 = vmatpush1.bf16.msra.mxu0 %v7359_v32  ;;  %2214 = vmatpush1.bf16.msra.mxu1 %v7360_v33  ;;  %v7386_v32 = vld [vmem:[#allocation53_spill] sm:$0xff]  ;;  %v7387_v33 = vld [vmem:[#allocation54_spill] sm:$0xff] }
 0x4c3   :  { %2270 = vmatprep.subr.bf16.mxu0 %v7361_v34  ;;  %2311 = vmatprep.subr.bf16.mxu1 %v7362_v35  ;;  %v7388_v34 = vld [vmem:[#allocation55_spill] sm:$0xff]  ;;  %v7389_v35 = vld [vmem:[#allocation56_spill] sm:$0xff] }
 0x4c5   :  { %2191 = vmatmul.mubr.bf16.vlgmr.msra.gmra.mrb[64].mxu0 %v1957_v49  ;;  %2232 = vmatmul.mubr.bf16.vlgmr.msra.gmra.mrb[64].mxu1 %v1957_v49  ;;  %v7372_v49 = vld [vmem:[#allocation5_spill] sm:$0xff] }
 0x4c6   :  { %2271 = vmatpush1.bf16.msra.mxu0 %v7363_v4  ;;  %2312 = vmatpush1.bf16.msra.mxu1 %v7364_v37  ;;  %v7390_v4 = vld [vmem:[#allocation57_spill] sm:$0xff]  ;;  %v7391_v37 = vld [vmem:[#allocation58_spill] sm:$0xff] }
 0x4c7   :  { %2272 = vmatprep.subr.bf16.mxu0 %v7365_v16  ;;  %2313 = vmatprep.subr.bf16.mxu1 %v7366_v19  ;;  %v7392_v16 = vld [vmem:[#allocation59_spill] sm:$0xff]  ;;  %v7393_v19 = vld [vmem:[#allocation60_spill] sm:$0xff] }
 0x4c8   :  { %2302 = vmatprep.mubr.bf16.mxu0 %v7126_v52  ;;  %2343 = vmatprep.mubr.bf16.mxu1 %v7126_v52 }
 0x4ca   :  { %2273 = vmatpush1.bf16.msra.mxu0 %v7367_v5  ;;  %2314 = vmatpush1.bf16.msra.mxu1 %v7368_v3  ;;  %v7394_v5 = vld [vmem:[#allocation61_spill] sm:$0xff] }
 0x4cb   :  { %2274 = vmatprep.subr.bf16.mxu0 %v7369_v38  ;;  %2315 = vmatprep.subr.bf16.mxu1 %v7370_v30 }
 0x4ce   :  { %2275 = vmatpush1.bf16.msra.mxu0 %v7371_v48  ;;  %2316 = vmatpush1.bf16.msra.mxu1 %v7372_v49 }
 0x4cf   :  { %2276 = vmatprep.subr.bf16.mxu0 %v7373_v13  ;;  %2317 = vmatprep.subr.bf16.mxu1 %v7374_v11 }
 0x4d2   :  { %2277 = vmatpush1.bf16.msra.mxu0 %v7375_v59  ;;  %2318 = vmatpush1.bf16.msra.mxu1 %v7376_v15 }
 0x4d3   :  { %2278 = vmatprep.subr.bf16.mxu0 %v7377_v20  ;;  %2319 = vmatprep.subr.bf16.mxu1 %v7378_v21 }
 0x4d6   :  { %2279 = vmatpush1.bf16.msra.mxu0 %v7379_v22  ;;  %2320 = vmatpush1.bf16.msra.mxu1 %v7380_v23 }
 0x4d7   :  { %2280 = vmatprep.subr.bf16.mxu0 %v7381_v24  ;;  %2321 = vmatprep.subr.bf16.mxu1 %v7382_v25 }
 0x4da   :  { %2281 = vmatpush1.bf16.msra.mxu0 %v7383_v28  ;;  %2322 = vmatpush1.bf16.msra.mxu1 %v7384_v29 }
 0x4db   :  { %2282 = vmatprep.subr.bf16.mxu0 %v7385_v31  ;;  %2323 = vmatprep.subr.bf16.mxu1 %v7386_v32 }
 0x4de   :  { %2283 = vmatpush1.bf16.msra.mxu0 %v7387_v33  ;;  %2324 = vmatpush1.bf16.msra.mxu1 %v7388_v34 }
 0x4df   :  { %2284 = vmatprep.subr.bf16.mxu0 %v7389_v35  ;;  %2325 = vmatprep.subr.bf16.mxu1 %v7390_v4 }
 0x4e2   :  { %2285 = vmatpush1.bf16.msra.mxu0 %v7391_v37  ;;  %2326 = vmatpush1.bf16.msra.mxu1 %v7392_v16 }
 0x4e3   :  { %2352 = vmatprep.subr.bf16.mxu0 %v7393_v19  ;;  %2393 = vmatprep.subr.bf16.mxu1 %v7394_v5 }
 0x558   :  { %v1992_v3 = vpop.f32.mrb[56].mxu0  ;;  %v2033_v38 = vpop.f32.mrb[56].mxu1 }
 0x559   :  { %v1994_v30 = vpop.f32.mrb[57].mxu0  ;;  %v2035_v48 = vpop.f32.mrb[57].mxu1 }
 0x55a   :  { %v1996_v49 = vpop.f32.mrb[58].mxu0  ;;  %v2037_v13 = vpop.f32.mrb[58].mxu1 }
 0x55b   :  { %v1997_v11 = vpop.f32.mrb[59].mxu0  ;;  %v2038_v59 = vpop.f32.mrb[59].mxu1 }
 0x578   :  { %v2074_v15 = vpop.f32.mrb[60].mxu0  ;;  %v2115_v20 = vpop.f32.mrb[60].mxu1 }
 0x579   :  { %v2075_v21 = vadd.f32 %v2074_v15, %v1992_v3  ;;  %v2116_v22 = vadd.f32 %v2115_v20, %v2033_v38  ;;  %v2076_v23 = vpop.f32.mrb[61].mxu0  ;;  %v2117_v37 = vpop.f32.mrb[61].mxu1  ;;  %v7395_v20 = vld [vmem:[#allocation74_spill] sm:$0xff] }
 0x57a   :  { %v2077_v4 = vadd.f32 %v2076_v23, %v1994_v30  ;;  %v2118_v16 = vadd.f32 %v2117_v37, %v2035_v48  ;;  %v2078_v35 = vpop.f32.mrb[62].mxu0  ;;  %v2119_v19 = vpop.f32.mrb[62].mxu1 }
 0x57b   :  { %v2122_v5 = vadd.f32 %v2075_v21, %v5045_v6  ;;  %v2079_v34 = vpop.f32.mrb[63].mxu0  ;;  %v2120_v33 = vpop.f32.mrb[63].mxu1  ;;  %v2124_v38 = vadd.f32 %v2116_v22, %v5060_v14  ;;  %v7396_v22 = vld [vmem:[#allocation75_spill] sm:$0xff] }
 0x57c   :  { %v2123_v32 = vadd.f32 %v2077_v4, %v5049_v60  ;;  %v2125_v11 = vadd.f32 %v2118_v16, %v5055_v18 }
 0x57d   :  { %v3538_v49 = vmul.f32 -1.442695, %v2122_v5 }
 0x57e   :  { %v3539_v13 = vmul.f32 -1.442695, %v2123_v32  ;;  %v3540_v3 = vmul.f32 -1.442695, %v2125_v11 }
 0x57f   :  { %3835 = vpow2.f32 %v3538_v49 }
 0x580   :  { %3837 = vpow2.f32 %v3539_v13 }
 0x581   :  { %3839 = vpow2.f32 %v3540_v3  ;;  %v7397_v3 = vld [vmem:[#allocation76_spill] sm:$0xff] }
 0x582   :  { %3841 = vtanh.f32 %v2124_v38 }
 0x589   :  { %v3836_v59 = vpop.eup %3835 }
 0x58a   :  { %v3838_v30 = vpop.eup %3837  ;;  %v2129_v37 = vadd.f32 1.0, %v3836_v59  ;;  %v7398_v59 = vld [vmem:[#allocation77_spill] sm:$0xff] }
 0x58b   :  { %v2135_v35 = vadd.f32 1.0, %v3838_v30  ;;  %v3840_v33 = vpop.eup %3839 }
 0x58c   :  { %3843 = vrcp.f32 %v2129_v37  ;;  %v3842_v34 = vpop.eup %3841  ;;  %v2142_v5 = vadd.f32 1.0, %v3840_v33 }
 0x58d   :  { %3845 = vrcp.f32 %v2135_v35 }
 0x58e   :  { %3847 = vrcp.f32 %v2142_v5 }
 0x596   :  { %v3844_v4 = vpop.eup %3843 }
 0x597   :  { %v3846_v19 = vpop.eup %3845  ;;  %v2146_v32 = vmul.f32 %v3844_v4, %v3842_v34 }
 0x598   :  { %v2145_v48 = vmul.f32 %v3846_v19, %v5796_v2  ;;  %v2192_v16 = vpop.f32.mrb[64].mxu0  ;;  %v2233_v15 = vpop.f32.mrb[64].mxu1 }
 0x599   :  { %v2240_v21 = vadd.f32 %v2192_v16, %v7395_v20  ;;  %v2242_v23 = vadd.f32 %v2233_v15, %v7396_v22  ;;  %v2194_v49 = vpop.f32.mrb[65].mxu0  ;;  %v2235_v13 = vpop.f32.mrb[65].mxu1 }
 0x59a   :  { %v5917_v11 = vadd.f32 %v2146_v32, %v2145_v48  ;;  %v2241_v38 = vadd.f32 %v2194_v49, %v7397_v3  ;;  %v2243_v30 = vadd.f32 %v2235_v13, %v7398_v59  ;;  %v2196_v37 = vpop.f32.mrb[66].mxu0  ;;  %v2237_v35 = vpop.f32.mrb[66].mxu1  ;;  %v6090_v13 = vld [vmem:[%s6816_s4 + $0xa4] ss:$16 sps:$4 sm:$0xff]   ;;  %v6096_v3 = vld [vmem:[%s6816_s4 + $0xac] ss:$16 sps:$4 sm:$0xff]  }
 0x59b   :  { %v3542_v33 = vmul.f32 -1.442695, %v2240_v21  ;;  %v2197_v34 = vpop.f32.mrb[67].mxu0  ;;  %v2238_v2 = vpop.f32.mrb[67].mxu1  ;;  %7402 = vst [vmem:[#allocation69_spill] sm:$0xff] %v6090_v13  ;;  %7403 = vst [vmem:[#allocation70_spill] sm:$0xff] %v6096_v3 }
 0x59c   :  { %v3543_v4 = vmul.f32 -1.442695, %v2241_v38  ;;  %3849 = vtanh.f32 %v5917_v11  ;;  %v3544_v19 = vmul.f32 -1.442695, %v2243_v30  ;;  %v3848_v16 = vpop.eup %3847  ;;  %v6102_v38 = vld [vmem:[%s6816_s4 + $0xa0] ss:$16 sps:$4 sm:$0xff]  }
 0x59d   :  { %3851 = vpow2.f32 %v3542_v33  ;;  %7404 = vst [vmem:[#allocation71_spill] sm:$0xff] %v6102_v38  ;;  %v6108_v59 = vld [vmem:[%s6816_s4 + $0xa8] ss:$16 sps:$4 sm:$0xff]   ;;  %v6114_v30 = vld [vmem:[%s6816_s4 + $0xc4] ss:$16 sps:$4 sm:$0xff]  }
 0x59e   :  { %3853 = vpow2.f32 %v3543_v4  ;;  %7405 = vst [vmem:[#allocation72_spill] sm:$0xff] %v6108_v59  ;;  %7406 = vst [vmem:[#allocation73_spill] sm:$0xff] %v6114_v30  ;;  %v6120_v37 = vld [vmem:[%s6816_s4 + $0xcc] ss:$16 sps:$4 sm:$0xff]   ;;  %v6126_v35 = vld [vmem:[%s6816_s4 + $0xc0] ss:$16 sps:$4 sm:$0xff]  }
 0x59f   :  { %3855 = vtanh.f32 %v2242_v23  ;;  %7407 = vst [vmem:[#allocation36_spill] sm:$0xff] %v6120_v37  ;;  %7408 = vst [vmem:[#allocation37_spill] sm:$0xff] %v6126_v35  ;;  %v6132_v33 = vld [vmem:[%s6816_s4 + $0xc8] ss:$16 sps:$4 sm:$0xff]   ;;  %v6138_v34 = vld [vmem:[%s6816_s4 + $0xe4] ss:$16 sps:$4 sm:$0xff]  }
 0x5a0   :  { %3857 = vpow2.f32 %v3544_v19  ;;  %7409 = vst [vmem:[#allocation38_spill] sm:$0xff] %v6132_v33  ;;  %7410 = vst [vmem:[#allocation39_spill] sm:$0xff] %v6138_v34  ;;  %v6144_v2 = vld [vmem:[%s6816_s4 + $0xec] ss:$16 sps:$4 sm:$0xff]   ;;  %v6150_v4 = vld [vmem:[%s6816_s4 + $0xe0] ss:$16 sps:$4 sm:$0xff]  }
 0x5a1   :  { %7411 = vst [vmem:[#allocation40_spill] sm:$0xff] %v6144_v2  ;;  %7412 = vst [vmem:[#allocation41_spill] sm:$0xff] %v6150_v4  ;;  %v6156_v19 = vld [vmem:[%s6816_s4 + $0xe8] ss:$16 sps:$4 sm:$0xff]  }
 0x5a2   :  { %7413 = vst [vmem:[#allocation42_spill] sm:$0xff] %v6156_v19 }
 0x5a6   :  { %v3850_v15 = vpop.eup %3849 }
 0x5a7   :  { %v3852_v32 = vpop.eup %3851  ;;  %v2149_v48 = vmul.f32 %v3850_v15, %v3848_v16  ;;  %v6162_v16 = vld [vmem:[%s6819_s7 + $0x4] ss:$16 sps:$4 sm:$0xff]   ;;  %v6168_v15 = vld [vmem:[%s6819_s7 + $0xc] ss:$16 sps:$4 sm:$0xff]  }
 0x5a8   :  { %v3854_v20 = vpop.eup %3853  ;;  %v2247_v22 = vadd.f32 1.0, %v3852_v32  ;;  %7414 = vst [vmem:[#allocation43_spill] sm:$0xff] %v6162_v16  ;;  %7415 = vst [vmem:[#allocation44_spill] sm:$0xff] %v6168_v15  ;;  %v6176_v32 = vld [vmem:[%s6819_s7] ss:$16 sps:$4 sm:$0xff]  }
 0x5a9   :  { %v2253_v49 = vadd.f32 1.0, %v3854_v20  ;;  %3859 = vtanh.f32 %v2149_v48  ;;  %v2268_v5 = vpack.c.bf16 %v2149_v48, %v2149_v48  ;;  %v3856_v21 = vpop.eup %3855  ;;  %7416 = vst [vmem:[#allocation45_spill] sm:$0xff] %v6176_v32  ;;  %v6182_v48 = vld [vmem:[%s6819_s7 + $0x8] ss:$16 sps:$4 sm:$0xff]   ;;  %v6188_v20 = vld [vmem:[%s6819_s7 + $0x24] ss:$16 sps:$4 sm:$0xff]  }
 0x5aa   :  { %3861 = vrcp.f32 %v2247_v22  ;;  %7417 = vst [vmem:[#allocation46_spill] sm:$0xff] %v6182_v48  ;;  %7418 = vst [vmem:[#allocation47_spill] sm:$0xff] %v6188_v20  ;;  %v6194_v22 = vld [vmem:[%s6819_s7 + $0x2c] ss:$16 sps:$4 sm:$0xff]  }
 0x5ab   :  { %3863 = vrcp.f32 %v2253_v49  ;;  %2303 = vmatmul.mubr.bf16.vlgmr.msra.gmra.mrb[68].mxu0 %v2268_v5  ;;  %2344 = vmatmul.mubr.bf16.vlgmr.msra.gmra.mrb[68].mxu1 %v2268_v5  ;;  %7419 = vst [vmem:[#allocation6_spill] sm:$0xff] %v6194_v22  ;;  %v6202_v49 = vld [vmem:[%s6819_s7 + $0x20] ss:$16 sps:$4 sm:$0xff]   ;;  %v6208_v5 = vld [vmem:[%s6819_s7 + $0x28] ss:$16 sps:$4 sm:$0xff]  }
 0x5ac   :  { %2353 = vmatpush1.bf16.msra.mxu0 %v5463_v58  ;;  %2394 = vmatpush1.bf16.msra.mxu1 %v5469_v0  ;;  %v3858_v58 = vpop.eup %3857  ;;  %7420 = vst [vmem:[#allocation7_spill] sm:$0xff] %v6202_v49  ;;  %7421 = vst [vmem:[#allocation8_spill] sm:$0xff] %v6208_v5 }
 0x5ad   :  { %2354 = vmatprep.subr.bf16.mxu0 %v5475_v54  ;;  %2395 = vmatprep.subr.bf16.mxu1 %v5481_v8 }
 0x5ae   :  { %2384 = vmatprep.mubr.bf16.mxu0 %v7126_v52  ;;  %2425 = vmatprep.mubr.bf16.mxu1 %v7126_v52 }
 0x5b0   :  { %2355 = vmatpush1.bf16.msra.mxu0 %v5489_v36  ;;  %2396 = vmatpush1.bf16.msra.mxu1 %v5495_v39  ;;  %v2260_v36 = vadd.f32 1.0, %v3858_v58  ;;  %v6220_v58 = vld [vmem:[%s6819_s7 + $0x4c] ss:$16 sps:$4 sm:$0xff]  }
 0x5b1   :  { %2356 = vmatprep.subr.bf16.mxu0 %v5501_v47  ;;  %2397 = vmatprep.subr.bf16.mxu1 %v5507_v41  ;;  %7423 = vst [vmem:[#allocation10_spill] sm:$0xff] %v6220_v58 }
 0x5b2   :  { %3865 = vrcp.f32 %v2260_v36  ;;  %v6250_v36 = vld [vmem:[%s6819_s7 + $0x60] ss:$16 sps:$4 sm:$0xff]  }
 0x5b3   :  { %v3860_v23 = vpop.eup %3859  ;;  %7428 = vst [vmem:[#allocation15_spill] sm:$0xff] %v6250_v36 }
 0x5b4   :  { %v3862_v0 = vpop.eup %3861  ;;  %3541 = vst [vmem:[%s6824_s9 + $0x18] sm:$0xff] %v3860_v23  ;;  %2357 = vmatpush1.bf16.msra.mxu0 %v5516_v12  ;;  %2398 = vmatpush1.bf16.msra.mxu1 %v5522_v9  ;;  %v6226_v23 = vld [vmem:[%s6819_s7 + $0x40] ss:$16 sps:$4 sm:$0xff]  }
 0x5b5   :  { %v3864_v54 = vpop.eup %3863  ;;  %v2264_v8 = vmul.f32 %v3862_v0, %v3856_v21  ;;  %2358 = vmatprep.subr.bf16.mxu0 %v5528_v56  ;;  %2399 = vmatprep.subr.bf16.mxu1 %v5534_v62  ;;  %v5966_v62 = vld [vmem:[%s6816_s4 + $0x4] ss:$16 sps:$4 sm:$0xff]   ;;  %7424 = vst [vmem:[#allocation11_spill] sm:$0xff] %v6226_v23  ;;  %v6232_v0 = vld [vmem:[%s6819_s7 + $0x48] ss:$16 sps:$4 sm:$0xff]  }
 0x5b6   :  { %v2263_v39 = vmul.f32 %v3864_v54, %v5819_v44  ;;  %v6012_v44 = vld [vmem:[%s6816_s4 + $0x28] ss:$16 sps:$4 sm:$0xff]   ;;  %v6214_v21 = vld [vmem:[%s6819_s7 + $0x44] ss:$16 sps:$4 sm:$0xff]   ;;  %7425 = vst [vmem:[#allocation12_spill] sm:$0xff] %v6232_v0 }
 0x5b7   :  { %7422 = vst [vmem:[#allocation9_spill] sm:$0xff] %v6214_v21  ;;  %v6238_v54 = vld [vmem:[%s6819_s7 + $0x64] ss:$16 sps:$4 sm:$0xff]  }
 0x5b8   :  { %v5940_v47 = vadd.f32 %v2264_v8, %v2263_v39  ;;  %2359 = vmatpush1.bf16.msra.mxu0 %v5543_v50  ;;  %2400 = vmatpush1.bf16.msra.mxu1 %v5549_v7  ;;  %v5972_v50 = vld [vmem:[%s6816_s4 + $0xc] ss:$16 sps:$4 sm:$0xff]   ;;  %v5980_v7 = vld [vmem:[%s6816_s4] ss:$16 sps:$4 sm:$0xff]   ;;  %7426 = vst [vmem:[#allocation13_spill] sm:$0xff] %v6238_v54 }
 0x5b9   :  { %2360 = vmatprep.subr.bf16.mxu0 %v5555_v45  ;;  %2401 = vmatprep.subr.bf16.mxu1 %v7334_v42  ;;  %v5986_v45 = vld [vmem:[%s6816_s4 + $0x8] ss:$16 sps:$4 sm:$0xff]   ;;  %v6018_v42 = vld [vmem:[%s6816_s4 + $0x44] ss:$16 sps:$4 sm:$0xff]   ;;  %v6244_v8 = vld [vmem:[%s6819_s7 + $0x6c] ss:$16 sps:$4 sm:$0xff]  }
 0x5ba   :  { %3867 = vtanh.f32 %v5940_v47  ;;  %7427 = vst [vmem:[#allocation14_spill] sm:$0xff] %v6244_v8  ;;  %v6256_v39 = vld [vmem:[%s6819_s7 + $0x68] ss:$16 sps:$4 sm:$0xff]  }
 0x5bb   :  { %7429 = vst [vmem:[#allocation16_spill] sm:$0xff] %v6256_v39 }
 0x5bc   :  { %2361 = vmatpush1.bf16.msra.mxu0 %v7335_v43  ;;  %2402 = vmatpush1.bf16.msra.mxu1 %v7336_v55  ;;  %v3866_v41 = vpop.eup %3865  ;;  %v6024_v43 = vld [vmem:[%s6816_s4 + $0x4c] ss:$16 sps:$4 sm:$0xff]   ;;  %v6030_v55 = vld [vmem:[%s6816_s4 + $0x40] ss:$16 sps:$4 sm:$0xff]  }
 0x5bd   :  { %2362 = vmatprep.subr.bf16.mxu0 %v7337_v46  ;;  %2403 = vmatprep.subr.bf16.mxu1 %v7338_v53  ;;  %v6036_v46 = vld [vmem:[%s6816_s4 + $0x48] ss:$16 sps:$4 sm:$0xff]   ;;  %v6042_v53 = vld [vmem:[%s6816_s4 + $0x64] ss:$16 sps:$4 sm:$0xff]  }
 0x5c0   :  { %2363 = vmatpush1.bf16.msra.mxu0 %v7339_v1  ;;  %2404 = vmatpush1.bf16.msra.mxu1 %v7340_v51  ;;  %v6048_v1 = vld [vmem:[%s6816_s4 + $0x6c] ss:$16 sps:$4 sm:$0xff]   ;;  %v6054_v51 = vld [vmem:[%s6816_s4 + $0x60] ss:$16 sps:$4 sm:$0xff]  }
 0x5c1   :  { %2364 = vmatprep.subr.bf16.mxu0 %v7341_v26  ;;  %2405 = vmatprep.subr.bf16.mxu1 %v7342_v40  ;;  %v6060_v26 = vld [vmem:[%s6816_s4 + $0x68] ss:$16 sps:$4 sm:$0xff]   ;;  %v6066_v40 = vld [vmem:[%s6816_s4 + $0x84] ss:$16 sps:$4 sm:$0xff]  }
 0x5c4   :  { %v3868_v12 = vpop.eup %3867  ;;  %2365 = vmatpush1.bf16.msra.mxu0 %v7343_v63  ;;  %2406 = vmatpush1.bf16.msra.mxu1 %v7344_v27  ;;  %v6072_v63 = vld [vmem:[%s6816_s4 + $0x8c] ss:$16 sps:$4 sm:$0xff]   ;;  %v6078_v27 = vld [vmem:[%s6816_s4 + $0x80] ss:$16 sps:$4 sm:$0xff]  }
 0x5c5   :  { %2366 = vmatprep.subr.bf16.mxu0 %v7345_v17  ;;  %2407 = vmatprep.subr.bf16.mxu1 %v5634_v10  ;;  %v2267_v9 = vmul.f32 %v3868_v12, %v3866_v41  ;;  %v5992_v10 = vld [vmem:[%s6816_s4 + $0x24] ss:$16 sps:$4 sm:$0xff]   ;;  %7399 = vst [vmem:[#allocation66_spill] sm:$0xff] %v6072_v63  ;;  %7400 = vst [vmem:[#allocation67_spill] sm:$0xff] %v6078_v27  ;;  %v6084_v17 = vld [vmem:[%s6816_s4 + $0x88] ss:$16 sps:$4 sm:$0xff]  }
 0x5c6   :  { %7401 = vst [vmem:[#allocation68_spill] sm:$0xff] %v6084_v17  ;;  %v6262_v41 = vld [vmem:[%s6819_s7 + $0x84] ss:$16 sps:$4 sm:$0xff]   ;;  %v6268_v12 = vld [vmem:[%s6819_s7 + $0x8c] ss:$16 sps:$4 sm:$0xff]  }
 0x5c7   :  { %v5959_v56 = vpack.c.bf16 %v2267_v9, %v2267_v9  ;;  %7430 = vst [vmem:[#allocation17_spill] sm:$0xff] %v6262_v41  ;;  %7431 = vst [vmem:[#allocation18_spill] sm:$0xff] %v6268_v12  ;;  %v6274_v9 = vld [vmem:[%s6819_s7 + $0x80] ss:$16 sps:$4 sm:$0xff]  }
 0x5c8   :  { %2367 = vmatpush1.bf16.msra.mxu0 %v5640_v57  ;;  %2408 = vmatpush1.bf16.msra.mxu1 %v5646_v61  ;;  %v5998_v57 = vld [vmem:[%s6816_s4 + $0x2c] ss:$16 sps:$4 sm:$0xff]   ;;  %v6006_v61 = vld [vmem:[%s6816_s4 + $0x20] ss:$16 sps:$4 sm:$0xff]   ;;  %7432 = vst [vmem:[#allocation19_spill] sm:$0xff] %v6274_v9 }
 0x5c9   :  { %2470 = vmatprep.subr.bf16.mxu0 %v5966_v62  ;;  %2511 = vmatprep.subr.bf16.mxu1 %v5972_v50 }
 0x5cb   :  { %2385 = vmatmul.mubr.bf16.vlgmr.msra.gmra.mrb[72].mxu0 %v5959_v56  ;;  %2426 = vmatmul.mubr.bf16.vlgmr.msra.gmra.mrb[72].mxu1 %v5959_v56 }
 0x5cc   :  { %2471 = vmatpush1.bf16.msra.mxu0 %v5980_v7  ;;  %2512 = vmatpush1.bf16.msra.mxu1 %v5986_v45 }
 0x5cd   :  { %2472 = vmatprep.subr.bf16.mxu0 %v5992_v10  ;;  %2513 = vmatprep.subr.bf16.mxu1 %v5998_v57 }
 0x5ce   :  { %2502 = vmatprep.mubr.bf16.mxu0 %v7126_v52  ;;  %2543 = vmatprep.mubr.bf16.mxu1 %v7126_v52 }
 0x5d0   :  { %2473 = vmatpush1.bf16.msra.mxu0 %v6006_v61  ;;  %2514 = vmatpush1.bf16.msra.mxu1 %v6012_v44 }
 0x5d1   :  { %2474 = vmatprep.subr.bf16.mxu0 %v6018_v42  ;;  %2515 = vmatprep.subr.bf16.mxu1 %v6024_v43 }
 0x5d4   :  { %2475 = vmatpush1.bf16.msra.mxu0 %v6030_v55  ;;  %2516 = vmatpush1.bf16.msra.mxu1 %v6036_v46 }
 0x5d5   :  { %2476 = vmatprep.subr.bf16.mxu0 %v6042_v53  ;;  %2517 = vmatprep.subr.bf16.mxu1 %v6048_v1 }
 0x5d8   :  { %2477 = vmatpush1.bf16.msra.mxu0 %v6054_v51  ;;  %2518 = vmatpush1.bf16.msra.mxu1 %v6060_v26 }
 0x5d9   :  { %2478 = vmatprep.subr.bf16.mxu0 %v6066_v40  ;;  %2519 = vmatprep.subr.bf16.mxu1 %v6072_v63 }
 0x5dc   :  { %2479 = vmatpush1.bf16.msra.mxu0 %v6078_v27  ;;  %2520 = vmatpush1.bf16.msra.mxu1 %v6084_v17 }
 0x5dd   :  { %2480 = vmatprep.subr.bf16.mxu0 %v6090_v13  ;;  %2521 = vmatprep.subr.bf16.mxu1 %v6096_v3 }
 0x5e0   :  { %2481 = vmatpush1.bf16.msra.mxu0 %v6102_v38  ;;  %2522 = vmatpush1.bf16.msra.mxu1 %v6108_v59 }
 0x5e1   :  { %2482 = vmatprep.subr.bf16.mxu0 %v6114_v30  ;;  %2523 = vmatprep.subr.bf16.mxu1 %v6120_v37 }
 0x5e4   :  { %2483 = vmatpush1.bf16.msra.mxu0 %v6126_v35  ;;  %2524 = vmatpush1.bf16.msra.mxu1 %v6132_v33 }
 0x5e5   :  { %2484 = vmatprep.subr.bf16.mxu0 %v6138_v34  ;;  %2525 = vmatprep.subr.bf16.mxu1 %v6144_v2 }
 0x5e8   :  { %2485 = vmatpush1.bf16.msra.mxu0 %v6150_v4  ;;  %2526 = vmatpush1.bf16.msra.mxu1 %v6156_v19 }
 0x5e9   :  { %2582 = vmatprep.subr.bf16.mxu0 %v6162_v16  ;;  %2623 = vmatprep.subr.bf16.mxu1 %v6168_v15 }
 0x5eb   :  { %2503 = vmatmul.mubr.bf16.vlgmr.msra.gmra.mrb[76].mxu0 %v5959_v56  ;;  %2544 = vmatmul.mubr.bf16.vlgmr.msra.gmra.mrb[76].mxu1 %v5959_v56  ;;  %v6280_v56 = vld [vmem:[%s6819_s7 + $0x88] ss:$16 sps:$4 sm:$0xff]  }
 0x5ec   :  { %2583 = vmatpush1.bf16.msra.mxu0 %v6176_v32  ;;  %2624 = vmatpush1.bf16.msra.mxu1 %v6182_v48  ;;  %7433 = vst [vmem:[#allocation20_spill] sm:$0xff] %v6280_v56 }
 0x5ed   :  { %2584 = vmatprep.subr.bf16.mxu0 %v6188_v20  ;;  %2625 = vmatprep.subr.bf16.mxu1 %v6194_v22 }
 0x5ee   :  { %2614 = vmatprep.mubr.bf16.mxu0 %v7126_v52  ;;  %2655 = vmatprep.mubr.bf16.mxu1 %v7126_v52 }
 0x5f0   :  { %2585 = vmatpush1.bf16.msra.mxu0 %v6202_v49  ;;  %2626 = vmatpush1.bf16.msra.mxu1 %v6208_v5 }
 0x5f1   :  { %2586 = vmatprep.subr.bf16.mxu0 %v6214_v21  ;;  %2627 = vmatprep.subr.bf16.mxu1 %v6220_v58 }
 0x5f4   :  { %2587 = vmatpush1.bf16.msra.mxu0 %v6226_v23  ;;  %2628 = vmatpush1.bf16.msra.mxu1 %v6232_v0 }
 0x5f5   :  { %2588 = vmatprep.subr.bf16.mxu0 %v6238_v54  ;;  %2629 = vmatprep.subr.bf16.mxu1 %v6244_v8 }
 0x5f8   :  { %2589 = vmatpush1.bf16.msra.mxu0 %v6250_v36  ;;  %2630 = vmatpush1.bf16.msra.mxu1 %v6256_v39  ;;  %v7437_v39 = vld [vmem:[#allocation56_spill] sm:$0xff]  ;;  %v7438_v36 = vld [vmem:[#allocation57_spill] sm:$0xff] }
 0x5f9   :  { %2590 = vmatprep.subr.bf16.mxu0 %v6262_v41  ;;  %2631 = vmatprep.subr.bf16.mxu1 %v6268_v12  ;;  %v7434_v12 = vld [vmem:[#allocation53_spill] sm:$0xff]  ;;  %v7436_v41 = vld [vmem:[#allocation55_spill] sm:$0xff] }
 0x5fc   :  { %2591 = vmatpush1.bf16.msra.mxu0 %v6274_v9  ;;  %2632 = vmatpush1.bf16.msra.mxu1 %v6280_v56  ;;  %v7435_v9 = vld [vmem:[#allocation54_spill] sm:$0xff] }
 0x5fd   :  { %2592 = vmatprep.subr.bf16.mxu0 %v7381_v24  ;;  %2633 = vmatprep.subr.bf16.mxu1 %v7382_v25  ;;  %v7439_v56 = vld [vmem:[#allocation58_spill] sm:$0xff]  ;;  %v7440_v24 = vld [vmem:[#allocation59_spill] sm:$0xff]  ;;  %v7441_v25 = vld [vmem:[#allocation60_spill] sm:$0xff] }
 0x600   :  { %2593 = vmatpush1.bf16.msra.mxu0 %v7383_v28  ;;  %2634 = vmatpush1.bf16.msra.mxu1 %v7384_v29  ;;  %v7442_v28 = vld [vmem:[#allocation61_spill] sm:$0xff] }
 0x601   :  { %2594 = vmatprep.subr.bf16.mxu0 %v7385_v31  ;;  %2635 = vmatprep.subr.bf16.mxu1 %v7434_v12 }
 0x604   :  { %2595 = vmatpush1.bf16.msra.mxu0 %v7435_v9  ;;  %2636 = vmatpush1.bf16.msra.mxu1 %v7436_v41 }
 0x605   :  { %2596 = vmatprep.subr.bf16.mxu0 %v7437_v39  ;;  %2637 = vmatprep.subr.bf16.mxu1 %v7438_v36 }
 0x608   :  { %2597 = vmatpush1.bf16.msra.mxu0 %v7439_v56  ;;  %2638 = vmatpush1.bf16.msra.mxu1 %v7440_v24 }
 0x609   :  { %2664 = vmatprep.subr.bf16.mxu0 %v7441_v25  ;;  %2705 = vmatprep.subr.bf16.mxu1 %v7442_v28 }
 0x67e   :  { %v2304_v29 = vpop.f32.mrb[68].mxu0  ;;  %v2345_v31 = vpop.f32.mrb[68].mxu1 }
 0x67f   :  { %v2306_v8 = vpop.f32.mrb[69].mxu0  ;;  %v2347_v12 = vpop.f32.mrb[69].mxu1 }
 0x680   :  { %v2308_v54 = vpop.f32.mrb[70].mxu0  ;;  %v2349_v9 = vpop.f32.mrb[70].mxu1 }
 0x681   :  { %v2309_v0 = vpop.f32.mrb[71].mxu0  ;;  %v2350_v41 = vpop.f32.mrb[71].mxu1 }
 0x69e   :  { %v2386_v23 = vpop.f32.mrb[72].mxu0  ;;  %v2427_v39 = vpop.f32.mrb[72].mxu1 }
 0x69f   :  { %v2387_v58 = vadd.f32 %v2386_v23, %v2304_v29  ;;  %v2428_v36 = vadd.f32 %v2427_v39, %v2345_v31  ;;  %v2388_v21 = vpop.f32.mrb[73].mxu0  ;;  %v2429_v56 = vpop.f32.mrb[73].mxu1 }
 0x6a0   :  { %v2389_v5 = vadd.f32 %v2388_v21, %v2306_v8  ;;  %v2430_v24 = vadd.f32 %v2429_v56, %v2347_v12  ;;  %v2390_v49 = vpop.f32.mrb[74].mxu0  ;;  %v2431_v25 = vpop.f32.mrb[74].mxu1 }
 0x6a1   :  { %v2434_v28 = vadd.f32 %v2387_v58, %v5045_v6  ;;  %v2391_v22 = vpop.f32.mrb[75].mxu0  ;;  %v2432_v20 = vpop.f32.mrb[75].mxu1  ;;  %v2436_v29 = vadd.f32 %v2428_v36, %v5060_v14  ;;  %v7444_v25 = vld [vmem:[#allocation79_spill] sm:$0xff] }
 0x6a2   :  { %v2435_v48 = vadd.f32 %v2389_v5, %v5049_v60  ;;  %v2437_v0 = vadd.f32 %v2430_v24, %v5055_v18  ;;  %v7443_v24 = vld [vmem:[#allocation78_spill] sm:$0xff] }
 0x6a3   :  { %v3545_v54 = vmul.f32 -1.442695, %v2434_v28 }
 0x6a4   :  { %v3546_v9 = vmul.f32 -1.442695, %v2435_v48  ;;  %v3547_v23 = vmul.f32 -1.442695, %v2437_v0 }
 0x6a5   :  { %3869 = vpow2.f32 %v3545_v54 }
 0x6a6   :  { %3871 = vpow2.f32 %v3546_v9 }
 0x6a7   :  { %3873 = vpow2.f32 %v3547_v23  ;;  %v7445_v23 = vld [vmem:[#allocation80_spill] sm:$0xff] }
 0x6a8   :  { %3875 = vtanh.f32 %v2436_v29 }
 0x6af   :  { %v3870_v31 = vpop.eup %3869 }
 0x6b0   :  { %v3872_v21 = vpop.eup %3871  ;;  %v2441_v8 = vadd.f32 1.0, %v3870_v31  ;;  %v7446_v31 = vld [vmem:[#allocation81_spill] sm:$0xff] }
 0x6b1   :  { %v2447_v49 = vadd.f32 1.0, %v3872_v21  ;;  %v3874_v20 = vpop.eup %3873 }
 0x6b2   :  { %3877 = vrcp.f32 %v2441_v8  ;;  %v3876_v22 = vpop.eup %3875  ;;  %v2454_v12 = vadd.f32 1.0, %v3874_v20 }
 0x6b3   :  { %3879 = vrcp.f32 %v2447_v49 }
 0x6b4   :  { %3881 = vrcp.f32 %v2454_v12 }
 0x6bc   :  { %v3878_v5 = vpop.eup %3877 }
 0x6bd   :  { %v3880_v58 = vpop.eup %3879  ;;  %v2458_v48 = vmul.f32 %v3878_v5, %v3876_v22 }
 0x6be   :  { %v2457_v41 = vmul.f32 %v3880_v58, %v5917_v11  ;;  %v2504_v39 = vpop.f32.mrb[76].mxu0  ;;  %v2545_v56 = vpop.f32.mrb[76].mxu1 }
 0x6bf   :  { %v2552_v36 = vadd.f32 %v2504_v39, %v7443_v24  ;;  %v2554_v28 = vadd.f32 %v2545_v56, %v7444_v25  ;;  %v2506_v54 = vpop.f32.mrb[77].mxu0  ;;  %v2547_v9 = vpop.f32.mrb[77].mxu1 }
 0x6c0   :  { %v6304_v0 = vadd.f32 %v2458_v48, %v2457_v41  ;;  %v2553_v29 = vadd.f32 %v2506_v54, %v7445_v23  ;;  %v2555_v21 = vadd.f32 %v2547_v9, %v7446_v31  ;;  %v2508_v8 = vpop.f32.mrb[78].mxu0  ;;  %v2549_v49 = vpop.f32.mrb[78].mxu1  ;;  %v6324_v9 = vld [vmem:[%s6820_s6 + $0x24] ss:$16 sps:$4 sm:$0xff]   ;;  %v6330_v23 = vld [vmem:[%s6820_s6 + $0x2c] ss:$16 sps:$4 sm:$0xff]  }
 0x6c1   :  { %v3549_v20 = vmul.f32 -1.442695, %v2552_v36  ;;  %v2509_v22 = vpop.f32.mrb[79].mxu0  ;;  %v2550_v11 = vpop.f32.mrb[79].mxu1  ;;  %v6312_v36 = vld [vmem:[%s6820_s6] ss:$16 sps:$4 sm:$0xff]  }
 0x6c2   :  { %v3550_v5 = vmul.f32 -1.442695, %v2553_v29  ;;  %3883 = vtanh.f32 %v6304_v0  ;;  %v3551_v58 = vmul.f32 -1.442695, %v2555_v21  ;;  %v3882_v39 = vpop.eup %3881  ;;  %v6338_v29 = vld [vmem:[%s6820_s6 + $0x20] ss:$16 sps:$4 sm:$0xff]  }
 0x6c3   :  { %3885 = vpow2.f32 %v3549_v20  ;;  %v6344_v31 = vld [vmem:[%s6820_s6 + $0x28] ss:$16 sps:$4 sm:$0xff]   ;;  %v6350_v8 = vld [vmem:[%s6820_s6 + $0x44] ss:$16 sps:$4 sm:$0xff]   ;;  %v6356_v49 = vld [vmem:[%s6820_s6 + $0x4c] ss:$16 sps:$4 sm:$0xff]  }
 0x6c4   :  { %3887 = vpow2.f32 %v3550_v5  ;;  %v6365_v5 = vld [vmem:[%s6820_s6 + $0x40] ss:$16 sps:$4 sm:$0xff]  }
 0x6c5   :  { %3889 = vtanh.f32 %v2554_v28  ;;  %v6318_v28 = vld [vmem:[%s6820_s6 + $0x8] ss:$16 sps:$4 sm:$0xff]  }
 0x6c6   :  { %3891 = vpow2.f32 %v3551_v58  ;;  %v6371_v58 = vld [vmem:[%s6820_s6 + $0x48] ss:$16 sps:$4 sm:$0xff]  }
 0x6cc   :  { %v3884_v56 = vpop.eup %3883 }
 0x6cd   :  { %v3886_v48 = vpop.eup %3885  ;;  %v2461_v41 = vmul.f32 %v3884_v56, %v3882_v39 }
 0x6ce   :  { %v3888_v24 = vpop.eup %3887  ;;  %v2559_v25 = vadd.f32 1.0, %v3886_v48 }
 0x6cf   :  { %v2565_v54 = vadd.f32 1.0, %v3888_v24  ;;  %3893 = vtanh.f32 %v2461_v41  ;;  %v2580_v12 = vpack.c.bf16 %v2461_v41, %v2461_v41  ;;  %v3890_v21 = vpop.eup %3889  ;;  %v6377_v41 = vld [vmem:[%s6820_s6 + $0x64] ss:$16 sps:$4 sm:$0xff]   ;;  %v6383_v24 = vld [vmem:[%s6820_s6 + $0x6c] ss:$16 sps:$4 sm:$0xff]  }
 0x6d0   :  { %3895 = vrcp.f32 %v2559_v25  ;;  %v3892_v20 = vpop.eup %3891 }
 0x6d1   :  { %3897 = vrcp.f32 %v2565_v54  ;;  %2615 = vmatmul.mubr.bf16.vlgmr.msra.gmra.mrb[80].mxu0 %v2580_v12  ;;  %2656 = vmatmul.mubr.bf16.vlgmr.msra.gmra.mrb[80].mxu1 %v2580_v12  ;;  %v2572_v48 = vadd.f32 1.0, %v3892_v20  ;;  %v6392_v12 = vld [vmem:[%s6820_s6 + $0x60] ss:$16 sps:$4 sm:$0xff]   ;;  %v6410_v20 = vld [vmem:[%s6820_s6 + $0x8c] ss:$16 sps:$4 sm:$0xff]  }
 0x6d2   :  { %2665 = vmatpush1.bf16.msra.mxu0 %v6312_v36  ;;  %2706 = vmatpush1.bf16.msra.mxu1 %v6318_v28  ;;  %7447 = vst [vmem:[#allocation21_spill] sm:$0xff] %v6410_v20 }
 0x6d3   :  { %2666 = vmatprep.subr.bf16.mxu0 %v6324_v9  ;;  %2707 = vmatprep.subr.bf16.mxu1 %v6330_v23  ;;  %3899 = vrcp.f32 %v2572_v48  ;;  %v6441_v48 = vld [vmem:[%s6820_s6 + $0xa0] ss:$16 sps:$4 sm:$0xff]  }
 0x6d4   :  { %2696 = vmatprep.mubr.bf16.mxu0 %v7126_v52  ;;  %2737 = vmatprep.mubr.bf16.mxu1 %v7126_v52  ;;  %7452 = vst [vmem:[#allocation26_spill] sm:$0xff] %v6441_v48 }
 0x6d6   :  { %2667 = vmatpush1.bf16.msra.mxu0 %v6338_v29  ;;  %2708 = vmatpush1.bf16.msra.mxu1 %v6344_v31 }
 0x6d7   :  { %2668 = vmatprep.subr.bf16.mxu0 %v6350_v8  ;;  %2709 = vmatprep.subr.bf16.mxu1 %v6356_v49 }
 0x6d9   :  { %v3894_v22 = vpop.eup %3893 }
 0x6da   :  { %v3896_v11 = vpop.eup %3895  ;;  %3548 = vst [vmem:[%s6824_s9 + $0x20] sm:$0xff] %v3894_v22  ;;  %2669 = vmatpush1.bf16.msra.mxu0 %v6365_v5  ;;  %2710 = vmatpush1.bf16.msra.mxu1 %v6371_v58  ;;  %v6417_v22 = vld [vmem:[%s6820_s6 + $0x80] ss:$16 sps:$4 sm:$0xff]  }
 0x6db   :  { %v3898_v39 = vpop.eup %3897  ;;  %v2576_v56 = vmul.f32 %v3896_v11, %v3890_v21  ;;  %2670 = vmatprep.subr.bf16.mxu0 %v6377_v41  ;;  %2711 = vmatprep.subr.bf16.mxu1 %v6383_v24  ;;  %v6398_v21 = vld [vmem:[%s6820_s6 + $0x68] ss:$16 sps:$4 sm:$0xff]   ;;  %7448 = vst [vmem:[#allocation22_spill] sm:$0xff] %v6417_v22 }
 0x6dc   :  { %v2575_v25 = vmul.f32 %v3898_v39, %v5940_v47  ;;  %v6404_v47 = vld [vmem:[%s6820_s6 + $0x84] ss:$16 sps:$4 sm:$0xff]   ;;  %v6423_v11 = vld [vmem:[%s6820_s6 + $0x88] ss:$16 sps:$4 sm:$0xff]  }
 0x6dd   :  { %7449 = vst [vmem:[#allocation23_spill] sm:$0xff] %v6423_v11  ;;  %v6429_v39 = vld [vmem:[%s6820_s6 + $0xa4] ss:$16 sps:$4 sm:$0xff]  }
 0x6de   :  { %v6387_v54 = vadd.f32 %v2576_v56, %v2575_v25  ;;  %2671 = vmatpush1.bf16.msra.mxu0 %v6392_v12  ;;  %2712 = vmatpush1.bf16.msra.mxu1 %v6398_v21  ;;  %7450 = vst [vmem:[#allocation24_spill] sm:$0xff] %v6429_v39  ;;  %v6435_v56 = vld [vmem:[%s6820_s6 + $0xac] ss:$16 sps:$4 sm:$0xff]   ;;  %v6447_v25 = vld [vmem:[%s6820_s6 + $0xa8] ss:$16 sps:$4 sm:$0xff]  }
 0x6df   :  { %2672 = vmatprep.subr.bf16.mxu0 %v6404_v47  ;;  %2713 = vmatprep.subr.bf16.mxu1 %v6410_v20  ;;  %7451 = vst [vmem:[#allocation25_spill] sm:$0xff] %v6435_v56  ;;  %7453 = vst [vmem:[#allocation27_spill] sm:$0xff] %v6447_v25 }
 0x6e0   :  { %3901 = vtanh.f32 %v6387_v54 }
 0x6e2   :  { %2673 = vmatpush1.bf16.msra.mxu0 %v6417_v22  ;;  %2714 = vmatpush1.bf16.msra.mxu1 %v6423_v11  ;;  %v6483_v22 = vld [vmem:[%s6820_s6 + $0xec] ss:$16 sps:$4 sm:$0xff]  }
 0x6e3   :  { %2674 = vmatprep.subr.bf16.mxu0 %v6429_v39  ;;  %2715 = vmatprep.subr.bf16.mxu1 %v6435_v56  ;;  %v6453_v39 = vld [vmem:[%s6820_s6 + $0xc4] ss:$16 sps:$4 sm:$0xff]   ;;  %v6459_v56 = vld [vmem:[%s6820_s6 + $0xcc] ss:$16 sps:$4 sm:$0xff]  }
 0x6e4   :  { %7454 = vst [vmem:[#allocation28_spill] sm:$0xff] %v6453_v39  ;;  %7455 = vst [vmem:[#allocation29_spill] sm:$0xff] %v6459_v56 }
 0x6e6   :  { %2675 = vmatpush1.bf16.msra.mxu0 %v6441_v48  ;;  %2716 = vmatpush1.bf16.msra.mxu1 %v6447_v25  ;;  %v3900_v48 = vpop.eup %3899  ;;  %v6465_v25 = vld [vmem:[%s6820_s6 + $0xc0] ss:$16 sps:$4 sm:$0xff]  }
 0x6e7   :  { %2676 = vmatprep.subr.bf16.mxu0 %v6453_v39  ;;  %2717 = vmatprep.subr.bf16.mxu1 %v6459_v56  ;;  %7456 = vst [vmem:[#allocation30_spill] sm:$0xff] %v6465_v25  ;;  %v6471_v39 = vld [vmem:[%s6820_s6 + $0xc8] ss:$16 sps:$4 sm:$0xff]   ;;  %v6477_v56 = vld [vmem:[%s6820_s6 + $0xe4] ss:$16 sps:$4 sm:$0xff]  }
 0x6e8   :  { %7457 = vst [vmem:[#allocation31_spill] sm:$0xff] %v6471_v39  ;;  %7458 = vst [vmem:[#allocation5_spill] sm:$0xff] %v6477_v56 }
 0x6ea   :  { %v3902_v11 = vpop.eup %3901  ;;  %2677 = vmatpush1.bf16.msra.mxu0 %v6465_v25  ;;  %2718 = vmatpush1.bf16.msra.mxu1 %v6471_v39  ;;  %v6489_v39 = vld [vmem:[%s6820_s6 + $0xe0] ss:$16 sps:$4 sm:$0xff]  }
 0x6eb   :  { %2678 = vmatprep.subr.bf16.mxu0 %v6477_v56  ;;  %2719 = vmatprep.subr.bf16.mxu1 %v6483_v22  ;;  %v2579_v25 = vmul.f32 %v3902_v11, %v3900_v48  ;;  %v6495_v56 = vld [vmem:[%s6820_s6 + $0xe8] ss:$16 sps:$4 sm:$0xff]   ;;  %v7460_v48 = vld [vmem:[#allocation47_spill] sm:$0xff] }
 0x6ec   :  { %v7459_v11 = vld [vmem:[#allocation46_spill] sm:$0xff] }
 0x6ed   :  { %v2581_v20 = vpack.c.bf16 %v2579_v25, %v2579_v25  ;;  %v7461_v25 = vld [vmem:[#allocation6_spill] sm:$0xff] }
 0x6ee   :  { %2679 = vmatpush1.bf16.msra.mxu0 %v6489_v39  ;;  %2720 = vmatpush1.bf16.msra.mxu1 %v6495_v56 }
 0x6ef   :  { %2782 = vmatprep.subr.bf16.mxu0 %v5966_v62  ;;  %2823 = vmatprep.subr.bf16.mxu1 %v5972_v50 }
 0x6f1   :  { %2697 = vmatmul.mubr.bf16.vlgmr.msra.gmra.mrb[84].mxu0 %v2581_v20  ;;  %2738 = vmatmul.mubr.bf16.vlgmr.msra.gmra.mrb[84].mxu1 %v2581_v20 }
 0x6f2   :  { %2783 = vmatpush1.bf16.msra.mxu0 %v5980_v7  ;;  %2824 = vmatpush1.bf16.msra.mxu1 %v5986_v45 }
 0x6f3   :  { %2784 = vmatprep.subr.bf16.mxu0 %v5992_v10  ;;  %2825 = vmatprep.subr.bf16.mxu1 %v5998_v57 }
 0x6f4   :  { %2814 = vmatprep.mubr.bf16.mxu0 %v7126_v52  ;;  %2855 = vmatprep.mubr.bf16.mxu1 %v7126_v52 }
 0x6f6   :  { %2785 = vmatpush1.bf16.msra.mxu0 %v6006_v61  ;;  %2826 = vmatpush1.bf16.msra.mxu1 %v6012_v44 }
 0x6f7   :  { %2786 = vmatprep.subr.bf16.mxu0 %v6018_v42  ;;  %2827 = vmatprep.subr.bf16.mxu1 %v6024_v43 }
 0x6fa   :  { %2787 = vmatpush1.bf16.msra.mxu0 %v6030_v55  ;;  %2828 = vmatpush1.bf16.msra.mxu1 %v6036_v46 }
 0x6fb   :  { %2788 = vmatprep.subr.bf16.mxu0 %v6042_v53  ;;  %2829 = vmatprep.subr.bf16.mxu1 %v6048_v1 }
 0x6fe   :  { %2789 = vmatpush1.bf16.msra.mxu0 %v6054_v51  ;;  %2830 = vmatpush1.bf16.msra.mxu1 %v6060_v26 }
 0x6ff   :  { %2790 = vmatprep.subr.bf16.mxu0 %v6066_v40  ;;  %2831 = vmatprep.subr.bf16.mxu1 %v6072_v63 }
 0x702   :  { %2791 = vmatpush1.bf16.msra.mxu0 %v6078_v27  ;;  %2832 = vmatpush1.bf16.msra.mxu1 %v6084_v17 }
 0x703   :  { %2792 = vmatprep.subr.bf16.mxu0 %v6090_v13  ;;  %2833 = vmatprep.subr.bf16.mxu1 %v6096_v3 }
 0x706   :  { %2793 = vmatpush1.bf16.msra.mxu0 %v6102_v38  ;;  %2834 = vmatpush1.bf16.msra.mxu1 %v6108_v59 }
 0x707   :  { %2794 = vmatprep.subr.bf16.mxu0 %v6114_v30  ;;  %2835 = vmatprep.subr.bf16.mxu1 %v6120_v37 }
 0x70a   :  { %2795 = vmatpush1.bf16.msra.mxu0 %v6126_v35  ;;  %2836 = vmatpush1.bf16.msra.mxu1 %v6132_v33 }
 0x70b   :  { %2796 = vmatprep.subr.bf16.mxu0 %v6138_v34  ;;  %2837 = vmatprep.subr.bf16.mxu1 %v6144_v2  ;;  %v7471_v2 = vld [vmem:[#allocation16_spill] sm:$0xff]  ;;  %v7472_v34 = vld [vmem:[#allocation17_spill] sm:$0xff] }
 0x70e   :  { %2797 = vmatpush1.bf16.msra.mxu0 %v6150_v4  ;;  %2838 = vmatpush1.bf16.msra.mxu1 %v6156_v19  ;;  %v7462_v4 = vld [vmem:[#allocation7_spill] sm:$0xff]  ;;  %v7463_v19 = vld [vmem:[#allocation8_spill] sm:$0xff] }
 0x70f   :  { %2894 = vmatprep.subr.bf16.mxu0 %v6162_v16  ;;  %2935 = vmatprep.subr.bf16.mxu1 %v6168_v15  ;;  %v7464_v16 = vld [vmem:[#allocation9_spill] sm:$0xff]  ;;  %v7465_v15 = vld [vmem:[#allocation10_spill] sm:$0xff] }
 0x711   :  { %2815 = vmatmul.mubr.bf16.vlgmr.msra.gmra.mrb[88].mxu0 %v2581_v20  ;;  %2856 = vmatmul.mubr.bf16.vlgmr.msra.gmra.mrb[88].mxu1 %v2581_v20  ;;  %v7466_v20 = vld [vmem:[#allocation11_spill] sm:$0xff] }
 0x712   :  { %2895 = vmatpush1.bf16.msra.mxu0 %v6176_v32  ;;  %2936 = vmatpush1.bf16.msra.mxu1 %v7459_v11  ;;  %v7467_v32 = vld [vmem:[#allocation12_spill] sm:$0xff]  ;;  %v7468_v11 = vld [vmem:[#allocation13_spill] sm:$0xff] }
 0x713   :  { %2896 = vmatprep.subr.bf16.mxu0 %v7460_v48  ;;  %2937 = vmatprep.subr.bf16.mxu1 %v7461_v25  ;;  %v7469_v48 = vld [vmem:[#allocation14_spill] sm:$0xff]  ;;  %v7470_v25 = vld [vmem:[#allocation15_spill] sm:$0xff] }
 0x714   :  { %2926 = vmatprep.mubr.bf16.mxu0 %v7126_v52  ;;  %2967 = vmatprep.mubr.bf16.mxu1 %v7126_v52 }
 0x716   :  { %2897 = vmatpush1.bf16.msra.mxu0 %v7462_v4  ;;  %2938 = vmatpush1.bf16.msra.mxu1 %v7463_v19  ;;  %v7473_v4 = vld [vmem:[#allocation18_spill] sm:$0xff]  ;;  %v7474_v19 = vld [vmem:[#allocation19_spill] sm:$0xff] }
 0x717   :  { %2898 = vmatprep.subr.bf16.mxu0 %v7464_v16  ;;  %2939 = vmatprep.subr.bf16.mxu1 %v7465_v15  ;;  %v7475_v16 = vld [vmem:[#allocation20_spill] sm:$0xff] }
 0x71a   :  { %2899 = vmatpush1.bf16.msra.mxu0 %v7466_v20  ;;  %2940 = vmatpush1.bf16.msra.mxu1 %v7467_v32  ;;  %v6557_v32 = vld [vmem:[%s6819_s7 + $0xa4] ss:$16 sps:$4 sm:$0xff]  }
 0x71b   :  { %2900 = vmatprep.subr.bf16.mxu0 %v7468_v11  ;;  %2941 = vmatprep.subr.bf16.mxu1 %v7469_v48  ;;  %7476 = vst [vmem:[#allocation62_spill] sm:$0xff] %v6557_v32 }
 0x71e   :  { %2901 = vmatpush1.bf16.msra.mxu0 %v7470_v25  ;;  %2942 = vmatpush1.bf16.msra.mxu1 %v7471_v2  ;;  %v6563_v25 = vld [vmem:[%s6819_s7 + $0xac] ss:$16 sps:$4 sm:$0xff]  }
 0x71f   :  { %2902 = vmatprep.subr.bf16.mxu0 %v7472_v34  ;;  %2943 = vmatprep.subr.bf16.mxu1 %v7473_v4  ;;  %7477 = vst [vmem:[#allocation63_spill] sm:$0xff] %v6563_v25 }
 0x722   :  { %2903 = vmatpush1.bf16.msra.mxu0 %v7474_v19  ;;  %2944 = vmatpush1.bf16.msra.mxu1 %v7475_v16  ;;  %v6569_v19 = vld [vmem:[%s6819_s7 + $0xa0] ss:$16 sps:$4 sm:$0xff]   ;;  %v6575_v16 = vld [vmem:[%s6819_s7 + $0xa8] ss:$16 sps:$4 sm:$0xff]  }
 0x723   :  { %2904 = vmatprep.subr.bf16.mxu0 %v6557_v32  ;;  %2945 = vmatprep.subr.bf16.mxu1 %v6563_v25  ;;  %7478 = vst [vmem:[#allocation64_spill] sm:$0xff] %v6569_v19  ;;  %7479 = vst [vmem:[#allocation65_spill] sm:$0xff] %v6575_v16  ;;  %v6581_v32 = vld [vmem:[%s6819_s7 + $0xc4] ss:$16 sps:$4 sm:$0xff]   ;;  %v6587_v25 = vld [vmem:[%s6819_s7 + $0xcc] ss:$16 sps:$4 sm:$0xff]  }
 0x724   :  { %7480 = vst [vmem:[#allocation32_spill] sm:$0xff] %v6581_v32  ;;  %7481 = vst [vmem:[#allocation33_spill] sm:$0xff] %v6587_v25 }
 0x726   :  { %2905 = vmatpush1.bf16.msra.mxu0 %v6569_v19  ;;  %2946 = vmatpush1.bf16.msra.mxu1 %v6575_v16  ;;  %v6593_v19 = vld [vmem:[%s6819_s7 + $0xc0] ss:$16 sps:$4 sm:$0xff]   ;;  %v6599_v16 = vld [vmem:[%s6819_s7 + $0xc8] ss:$16 sps:$4 sm:$0xff]  }
 0x727   :  { %2906 = vmatprep.subr.bf16.mxu0 %v6581_v32  ;;  %2947 = vmatprep.subr.bf16.mxu1 %v6587_v25  ;;  %7482 = vst [vmem:[#allocation34_spill] sm:$0xff] %v6593_v19  ;;  %7483 = vst [vmem:[#allocation35_spill] sm:$0xff] %v6599_v16  ;;  %v6605_v32 = vld [vmem:[%s6819_s7 + $0xe4] ss:$16 sps:$4 sm:$0xff]   ;;  %v6611_v25 = vld [vmem:[%s6819_s7 + $0xec] ss:$16 sps:$4 sm:$0xff]  }
 0x728   :  { %7484 = vst [vmem:[#allocation48_spill] sm:$0xff] %v6605_v32  ;;  %7485 = vst [vmem:[#allocation49_spill] sm:$0xff] %v6611_v25 }
 0x72a   :  { %2907 = vmatpush1.bf16.msra.mxu0 %v6593_v19  ;;  %2948 = vmatpush1.bf16.msra.mxu1 %v6599_v16  ;;  %v6617_v19 = vld [vmem:[%s6819_s7 + $0xe0] ss:$16 sps:$4 sm:$0xff]   ;;  %v6623_v16 = vld [vmem:[%s6819_s7 + $0xe8] ss:$16 sps:$4 sm:$0xff]  }
 0x72b   :  { %2908 = vmatprep.subr.bf16.mxu0 %v6605_v32  ;;  %2949 = vmatprep.subr.bf16.mxu1 %v6611_v25  ;;  %7486 = vst [vmem:[#allocation50_spill] sm:$0xff] %v6617_v19  ;;  %7487 = vst [vmem:[#allocation51_spill] sm:$0xff] %v6623_v16  ;;  %v6629_v32 = vld [vmem:[%s6820_s6 + $0x4] ss:$16 sps:$4 sm:$0xff]   ;;  %v6635_v25 = vld [vmem:[%s6820_s6 + $0xc] ss:$16 sps:$4 sm:$0xff]  }
 0x72c   :  { %7488 = vst [vmem:[#allocation52_spill] sm:$0xff] %v6629_v32  ;;  %7489 = vst [vmem:[#allocation74_spill] sm:$0xff] %v6635_v25 }
 0x72e   :  { %2909 = vmatpush1.bf16.msra.mxu0 %v6617_v19  ;;  %2950 = vmatpush1.bf16.msra.mxu1 %v6623_v16 }
 0x72f   :  { %2976 = vmatprep.subr.bf16.mxu0 %v6629_v32  ;;  %3017 = vmatprep.subr.bf16.mxu1 %v6635_v25 }
 0x7a4   :  { %v2616_v19 = vpop.f32.mrb[80].mxu0  ;;  %v2657_v4 = vpop.f32.mrb[80].mxu1 }
 0x7a5   :  { %v2618_v34 = vpop.f32.mrb[81].mxu0  ;;  %v2659_v2 = vpop.f32.mrb[81].mxu1 }
 0x7a6   :  { %v2620_v48 = vpop.f32.mrb[82].mxu0  ;;  %v2661_v16 = vpop.f32.mrb[82].mxu1 }
 0x7a7   :  { %v2621_v11 = vpop.f32.mrb[83].mxu0  ;;  %v2662_v20 = vpop.f32.mrb[83].mxu1 }
 0x7c4   :  { %v2698_v15 = vpop.f32.mrb[84].mxu0  ;;  %v2739_v33 = vpop.f32.mrb[84].mxu1 }
 0x7c5   :  { %v2699_v35 = vadd.f32 %v2698_v15, %v2616_v19  ;;  %v2740_v37 = vadd.f32 %v2739_v33, %v2657_v4  ;;  %v2700_v32 = vpop.f32.mrb[85].mxu0  ;;  %v2741_v30 = vpop.f32.mrb[85].mxu1 }
 0x7c6   :  { %v2701_v59 = vadd.f32 %v2700_v32, %v2618_v34  ;;  %v2742_v38 = vadd.f32 %v2741_v30, %v2659_v2  ;;  %v2702_v3 = vpop.f32.mrb[86].mxu0  ;;  %v2743_v13 = vpop.f32.mrb[86].mxu1  ;;  %v7490_v32 = vld [vmem:[#allocation82_spill] sm:$0xff] }
 0x7c7   :  { %v2746_v25 = vadd.f32 %v2699_v35, %v5045_v6  ;;  %v2703_v17 = vpop.f32.mrb[87].mxu0  ;;  %v2744_v27 = vpop.f32.mrb[87].mxu1  ;;  %v2748_v33 = vadd.f32 %v2740_v37, %v5060_v14 }
 0x7c8   :  { %v2747_v63 = vadd.f32 %v2701_v59, %v5049_v60  ;;  %v2749_v11 = vadd.f32 %v2742_v38, %v5055_v18 }
 0x7c9   :  { %v3552_v48 = vmul.f32 -1.442695, %v2746_v25  ;;  %v7491_v25 = vld [vmem:[#allocation83_spill] sm:$0xff] }
 0x7ca   :  { %v3553_v16 = vmul.f32 -1.442695, %v2747_v63  ;;  %v3554_v19 = vmul.f32 -1.442695, %v2749_v11 }
 0x7cb   :  { %3903 = vpow2.f32 %v3552_v48 }
 0x7cc   :  { %3905 = vpow2.f32 %v3553_v16 }
 0x7cd   :  { %3907 = vpow2.f32 %v3554_v19  ;;  %v7492_v19 = vld [vmem:[#allocation84_spill] sm:$0xff] }
 0x7ce   :  { %3909 = vtanh.f32 %v2748_v33 }
 0x7d5   :  { %v3904_v4 = vpop.eup %3903 }
 0x7d6   :  { %v3906_v34 = vpop.eup %3905  ;;  %v2753_v30 = vadd.f32 1.0, %v3904_v4  ;;  %v7493_v4 = vld [vmem:[#allocation85_spill] sm:$0xff] }
 0x7d7   :  { %v2759_v13 = vadd.f32 1.0, %v3906_v34  ;;  %v3908_v27 = vpop.eup %3907 }
 0x7d8   :  { %3911 = vrcp.f32 %v2753_v30  ;;  %v3910_v17 = vpop.eup %3909  ;;  %v2766_v35 = vadd.f32 1.0, %v3908_v27 }
 0x7d9   :  { %3913 = vrcp.f32 %v2759_v13 }
 0x7da   :  { %3915 = vrcp.f32 %v2766_v35 }
 0x7e2   :  { %v3912_v3 = vpop.eup %3911 }
 0x7e3   :  { %v3914_v59 = vpop.eup %3913  ;;  %v2770_v63 = vmul.f32 %v3912_v3, %v3910_v17 }
 0x7e4   :  { %v2769_v2 = vmul.f32 %v3914_v59, %v6304_v0  ;;  %v2816_v38 = vpop.f32.mrb[88].mxu0  ;;  %v2857_v15 = vpop.f32.mrb[88].mxu1 }
 0x7e5   :  { %v2864_v37 = vadd.f32 %v2816_v38, %v7490_v32  ;;  %v2866_v20 = vadd.f32 %v2857_v15, %v7491_v25  ;;  %v2818_v48 = vpop.f32.mrb[89].mxu0  ;;  %v2859_v16 = vpop.f32.mrb[89].mxu1 }
 0x7e6   :  { %v6645_v11 = vadd.f32 %v2770_v63, %v2769_v2  ;;  %v2865_v33 = vadd.f32 %v2818_v48, %v7492_v19  ;;  %v2867_v34 = vadd.f32 %v2859_v16, %v7493_v4  ;;  %v2820_v30 = vpop.f32.mrb[90].mxu0  ;;  %v2861_v13 = vpop.f32.mrb[90].mxu1 }
 0x7e7   :  { %v3556_v27 = vmul.f32 -1.442695, %v2864_v37  ;;  %v2821_v17 = vpop.f32.mrb[91].mxu0  ;;  %v2862_v0 = vpop.f32.mrb[91].mxu1 }
 0x7e8   :  { %v3557_v3 = vmul.f32 -1.442695, %v2865_v33  ;;  %3917 = vtanh.f32 %v6645_v11  ;;  %v3558_v59 = vmul.f32 -1.442695, %v2867_v34  ;;  %v3916_v38 = vpop.eup %3915  ;;  %v7495_v17 = vld [vmem:[#allocation22_spill] sm:$0xff]  ;;  %v7496_v0 = vld [vmem:[#allocation23_spill] sm:$0xff] }
 0x7e9   :  { %3919 = vpow2.f32 %v3556_v27  ;;  %v7494_v27 = vld [vmem:[#allocation21_spill] sm:$0xff] }
 0x7ea   :  { %3921 = vpow2.f32 %v3557_v3  ;;  %v7497_v3 = vld [vmem:[#allocation24_spill] sm:$0xff] }
 0x7eb   :  { %3923 = vtanh.f32 %v2866_v20 }
 0x7ec   :  { %3925 = vpow2.f32 %v3558_v59  ;;  %v7499_v59 = vld [vmem:[#allocation26_spill] sm:$0xff] }
 0x7f2   :  { %v3918_v15 = vpop.eup %3917 }
 0x7f3   :  { %v3920_v63 = vpop.eup %3919  ;;  %v2773_v2 = vmul.f32 %v3918_v15, %v3916_v38  ;;  %v7500_v38 = vld [vmem:[#allocation27_spill] sm:$0xff]  ;;  %v7501_v15 = vld [vmem:[#allocation28_spill] sm:$0xff] }
 0x7f4   :  { %v3922_v32 = vpop.eup %3921  ;;  %v2871_v25 = vadd.f32 1.0, %v3920_v63  ;;  %v7502_v63 = vld [vmem:[#allocation29_spill] sm:$0xff] }
 0x7f5   :  { %v2877_v48 = vadd.f32 1.0, %v3922_v32  ;;  %3927 = vtanh.f32 %v2773_v2  ;;  %v2892_v35 = vpack.c.bf16 %v2773_v2, %v2773_v2  ;;  %v3924_v37 = vpop.eup %3923 }
 0x7f6   :  { %3929 = vrcp.f32 %v2871_v25  ;;  %v3926_v20 = vpop.eup %3925  ;;  %v7503_v25 = vld [vmem:[#allocation30_spill] sm:$0xff] }
 0x7f7   :  { %3931 = vrcp.f32 %v2877_v48  ;;  %2927 = vmatmul.mubr.bf16.vlgmr.msra.gmra.mrb[92].mxu0 %v2892_v35  ;;  %2968 = vmatmul.mubr.bf16.vlgmr.msra.gmra.mrb[92].mxu1 %v2892_v35  ;;  %v2884_v34 = vadd.f32 1.0, %v3926_v20  ;;  %v7504_v48 = vld [vmem:[#allocation31_spill] sm:$0xff]  ;;  %v7505_v35 = vld [vmem:[#allocation5_spill] sm:$0xff] }
 0x7f8   :  { %2977 = vmatpush1.bf16.msra.mxu0 %v6312_v36  ;;  %3018 = vmatpush1.bf16.msra.mxu1 %v6318_v28 }
 0x7f9   :  { %2978 = vmatprep.subr.bf16.mxu0 %v6324_v9  ;;  %3019 = vmatprep.subr.bf16.mxu1 %v6330_v23  ;;  %3933 = vrcp.f32 %v2884_v34  ;;  %v7527_v34 = vld [vmem:[#allocation7_spill] sm:$0xff] }
 0x7fa   :  { %3008 = vmatprep.mubr.bf16.mxu0 %v7126_v52  ;;  %3049 = vmatprep.mubr.bf16.mxu1 %v7126_v52 }
 0x7fc   :  { %2979 = vmatpush1.bf16.msra.mxu0 %v6338_v29  ;;  %3020 = vmatpush1.bf16.msra.mxu1 %v6344_v31 }
 0x7fd   :  { %2980 = vmatprep.subr.bf16.mxu0 %v6350_v8  ;;  %3021 = vmatprep.subr.bf16.mxu1 %v6356_v49 }
 0x7ff   :  { %v3928_v16 = vpop.eup %3927 }
 0x800   :  { %v3930_v19 = vpop.eup %3929  ;;  %3555 = vst [vmem:[%s6824_s9 + $0x28] sm:$0xff] %v3928_v16  ;;  %2981 = vmatpush1.bf16.msra.mxu0 %v6365_v5  ;;  %3022 = vmatpush1.bf16.msra.mxu1 %v6371_v58  ;;  %v7523_v16 = vld [vmem:[#allocation45_spill] sm:$0xff] }
 0x801   :  { %v3932_v33 = vpop.eup %3931  ;;  %v2888_v4 = vmul.f32 %v3930_v19, %v3924_v37  ;;  %2982 = vmatprep.subr.bf16.mxu0 %v6377_v41  ;;  %3023 = vmatprep.subr.bf16.mxu1 %v6383_v24  ;;  %v7524_v19 = vld [vmem:[#allocation46_spill] sm:$0xff] }
 0x802   :  { %v2887_v30 = vmul.f32 %v3932_v33, %v6387_v54  ;;  %v7498_v54 = vld [vmem:[#allocation25_spill] sm:$0xff]  ;;  %v7525_v33 = vld [vmem:[#allocation47_spill] sm:$0xff] }
 0x803   :  { %v3934_v2 = vpop.eup %3933 }
 0x804   :  { %v6668_v13 = vadd.f32 %v2888_v4, %v2887_v30  ;;  %2983 = vmatpush1.bf16.msra.mxu0 %v6392_v12  ;;  %3024 = vmatpush1.bf16.msra.mxu1 %v6398_v21  ;;  %v7526_v4 = vld [vmem:[#allocation6_spill] sm:$0xff]  ;;  %v7528_v30 = vld [vmem:[#allocation8_spill] sm:$0xff] }
 0x805   :  { %2984 = vmatprep.subr.bf16.mxu0 %v6404_v47  ;;  %3025 = vmatprep.subr.bf16.mxu1 %v7494_v27 }
 0x806   :  { %3935 = vtanh.f32 %v6668_v13 }
 0x808   :  { %2985 = vmatpush1.bf16.msra.mxu0 %v7495_v17  ;;  %3026 = vmatpush1.bf16.msra.mxu1 %v7496_v0 }
 0x809   :  { %2986 = vmatprep.subr.bf16.mxu0 %v7497_v3  ;;  %3027 = vmatprep.subr.bf16.mxu1 %v7498_v54 }
 0x80c   :  { %2987 = vmatpush1.bf16.msra.mxu0 %v7499_v59  ;;  %3028 = vmatpush1.bf16.msra.mxu1 %v7500_v38 }
 0x80d   :  { %2988 = vmatprep.subr.bf16.mxu0 %v7501_v15  ;;  %3029 = vmatprep.subr.bf16.mxu1 %v7502_v63 }
 0x810   :  { %v3936_v32 = vpop.eup %3935  ;;  %2989 = vmatpush1.bf16.msra.mxu0 %v7503_v25  ;;  %3030 = vmatpush1.bf16.msra.mxu1 %v7504_v48 }
 0x811   :  { %2990 = vmatprep.subr.bf16.mxu0 %v7505_v35  ;;  %3031 = vmatprep.subr.bf16.mxu1 %v6483_v22  ;;  %v2891_v37 = vmul.f32 %v3936_v32, %v3934_v2  ;;  %v7529_v2 = vld [vmem:[#allocation9_spill] sm:$0xff]  ;;  %v7530_v32 = vld [vmem:[#allocation10_spill] sm:$0xff] }
 0x813   :  { %v2893_v20 = vpack.c.bf16 %v2891_v37, %v2891_v37  ;;  %v7531_v37 = vld [vmem:[#allocation11_spill] sm:$0xff] }
 0x814   :  { %2991 = vmatpush1.bf16.msra.mxu0 %v6489_v39  ;;  %3032 = vmatpush1.bf16.msra.mxu1 %v6495_v56 }
 0x815   :  { %3094 = vmatprep.subr.bf16.mxu0 %v5966_v62  ;;  %3135 = vmatprep.subr.bf16.mxu1 %v5972_v50  ;;  %v7506_v62 = vld [vmem:[#allocation66_spill] sm:$0xff]  ;;  %v7507_v50 = vld [vmem:[#allocation67_spill] sm:$0xff] }
 0x817   :  { %3009 = vmatmul.mubr.bf16.vlgmr.msra.gmra.mrb[96].mxu0 %v2893_v20  ;;  %3050 = vmatmul.mubr.bf16.vlgmr.msra.gmra.mrb[96].mxu1 %v2893_v20 }
 0x818   :  { %3095 = vmatpush1.bf16.msra.mxu0 %v5980_v7  ;;  %3136 = vmatpush1.bf16.msra.mxu1 %v5986_v45  ;;  %v7508_v7 = vld [vmem:[#allocation68_spill] sm:$0xff]  ;;  %v7509_v45 = vld [vmem:[#allocation69_spill] sm:$0xff] }
 0x819   :  { %3096 = vmatprep.subr.bf16.mxu0 %v5992_v10  ;;  %3137 = vmatprep.subr.bf16.mxu1 %v5998_v57  ;;  %v7510_v10 = vld [vmem:[#allocation70_spill] sm:$0xff]  ;;  %v7511_v57 = vld [vmem:[#allocation71_spill] sm:$0xff] }
 0x81a   :  { %3126 = vmatprep.mubr.bf16.mxu0 %v7126_v52  ;;  %3167 = vmatprep.mubr.bf16.mxu1 %v7126_v52 }
 0x81c   :  { %3097 = vmatpush1.bf16.msra.mxu0 %v6006_v61  ;;  %3138 = vmatpush1.bf16.msra.mxu1 %v6012_v44  ;;  %v7512_v61 = vld [vmem:[#allocation72_spill] sm:$0xff]  ;;  %v7513_v44 = vld [vmem:[#allocation73_spill] sm:$0xff] }
 0x81d   :  { %3098 = vmatprep.subr.bf16.mxu0 %v6018_v42  ;;  %3139 = vmatprep.subr.bf16.mxu1 %v6024_v43  ;;  %v7514_v42 = vld [vmem:[#allocation36_spill] sm:$0xff]  ;;  %v7515_v43 = vld [vmem:[#allocation37_spill] sm:$0xff] }
 0x820   :  { %3099 = vmatpush1.bf16.msra.mxu0 %v6030_v55  ;;  %3140 = vmatpush1.bf16.msra.mxu1 %v6036_v46  ;;  %v7516_v55 = vld [vmem:[#allocation38_spill] sm:$0xff]  ;;  %v7517_v46 = vld [vmem:[#allocation39_spill] sm:$0xff] }
 0x821   :  { %3100 = vmatprep.subr.bf16.mxu0 %v6042_v53  ;;  %3141 = vmatprep.subr.bf16.mxu1 %v6048_v1  ;;  %v7518_v53 = vld [vmem:[#allocation40_spill] sm:$0xff]  ;;  %v7519_v1 = vld [vmem:[#allocation41_spill] sm:$0xff] }
 0x824   :  { %3101 = vmatpush1.bf16.msra.mxu0 %v6054_v51  ;;  %3142 = vmatpush1.bf16.msra.mxu1 %v6060_v26  ;;  %v7520_v51 = vld [vmem:[#allocation42_spill] sm:$0xff]  ;;  %v7521_v26 = vld [vmem:[#allocation43_spill] sm:$0xff] }
 0x825   :  { %3102 = vmatprep.subr.bf16.mxu0 %v6066_v40  ;;  %3143 = vmatprep.subr.bf16.mxu1 %v7506_v62  ;;  %v7522_v40 = vld [vmem:[#allocation44_spill] sm:$0xff]  ;;  %v7533_v62 = vld [vmem:[#allocation13_spill] sm:$0xff] }
 0x828   :  { %3103 = vmatpush1.bf16.msra.mxu0 %v7507_v50  ;;  %3144 = vmatpush1.bf16.msra.mxu1 %v7508_v7  ;;  %v7534_v50 = vld [vmem:[#allocation14_spill] sm:$0xff]  ;;  %v7535_v7 = vld [vmem:[#allocation15_spill] sm:$0xff] }
 0x829   :  { %3104 = vmatprep.subr.bf16.mxu0 %v7509_v45  ;;  %3145 = vmatprep.subr.bf16.mxu1 %v7510_v10  ;;  %v7536_v45 = vld [vmem:[#allocation16_spill] sm:$0xff]  ;;  %v7537_v10 = vld [vmem:[#allocation17_spill] sm:$0xff] }
 0x82c   :  { %3105 = vmatpush1.bf16.msra.mxu0 %v7511_v57  ;;  %3146 = vmatpush1.bf16.msra.mxu1 %v7512_v61  ;;  %v7538_v57 = vld [vmem:[#allocation18_spill] sm:$0xff]  ;;  %v7539_v61 = vld [vmem:[#allocation19_spill] sm:$0xff] }
 0x82d   :  { %3106 = vmatprep.subr.bf16.mxu0 %v7513_v44  ;;  %3147 = vmatprep.subr.bf16.mxu1 %v7514_v42  ;;  %v7540_v44 = vld [vmem:[#allocation20_spill] sm:$0xff]  ;;  %v7541_v42 = vld [vmem:[#allocation62_spill] sm:$0xff] }
 0x830   :  { %3107 = vmatpush1.bf16.msra.mxu0 %v7515_v43  ;;  %3148 = vmatpush1.bf16.msra.mxu1 %v7516_v55  ;;  %v7542_v43 = vld [vmem:[#allocation63_spill] sm:$0xff]  ;;  %v7543_v55 = vld [vmem:[#allocation64_spill] sm:$0xff] }
 0x831   :  { %3108 = vmatprep.subr.bf16.mxu0 %v7517_v46  ;;  %3149 = vmatprep.subr.bf16.mxu1 %v7518_v53  ;;  %v7544_v46 = vld [vmem:[#allocation65_spill] sm:$0xff]  ;;  %v7545_v53 = vld [vmem:[#allocation32_spill] sm:$0xff] }
 0x834   :  { %3109 = vmatpush1.bf16.msra.mxu0 %v7519_v1  ;;  %3150 = vmatpush1.bf16.msra.mxu1 %v7520_v51  ;;  %v7546_v1 = vld [vmem:[#allocation33_spill] sm:$0xff]  ;;  %v7547_v51 = vld [vmem:[#allocation34_spill] sm:$0xff] }
 0x835   :  { %3206 = vmatprep.subr.bf16.mxu0 %v7521_v26  ;;  %3247 = vmatprep.subr.bf16.mxu1 %v7522_v40  ;;  %v7548_v26 = vld [vmem:[#allocation35_spill] sm:$0xff]  ;;  %v7549_v40 = vld [vmem:[#allocation48_spill] sm:$0xff] }
 0x837   :  { %3127 = vmatmul.mubr.bf16.vlgmr.msra.gmra.mrb[100].mxu0 %v2893_v20  ;;  %3168 = vmatmul.mubr.bf16.vlgmr.msra.gmra.mrb[100].mxu1 %v2893_v20  ;;  %v7532_v20 = vld [vmem:[#allocation12_spill] sm:$0xff] }
 0x838   :  { %3207 = vmatpush1.bf16.msra.mxu0 %v7523_v16  ;;  %3248 = vmatpush1.bf16.msra.mxu1 %v7524_v19  ;;  %v7550_v16 = vld [vmem:[#allocation49_spill] sm:$0xff]  ;;  %v7551_v19 = vld [vmem:[#allocation50_spill] sm:$0xff] }
 0x839   :  { %3208 = vmatprep.subr.bf16.mxu0 %v7525_v33  ;;  %3249 = vmatprep.subr.bf16.mxu1 %v7526_v4  ;;  %v7552_v33 = vld [vmem:[#allocation51_spill] sm:$0xff]  ;;  %v7553_v4 = vld [vmem:[#allocation52_spill] sm:$0xff] }
 0x83a   :  { %3238 = vmatprep.mubr.bf16.mxu0 %v7126_v52  ;;  %3279 = vmatprep.mubr.bf16.mxu1 %v7126_v52 }
 0x83c   :  { %3209 = vmatpush1.bf16.msra.mxu0 %v7527_v34  ;;  %3250 = vmatpush1.bf16.msra.mxu1 %v7528_v30  ;;  %v7554_v34 = vld [vmem:[#allocation74_spill] sm:$0xff] }
 0x83d   :  { %3210 = vmatprep.subr.bf16.mxu0 %v7529_v2  ;;  %3251 = vmatprep.subr.bf16.mxu1 %v7530_v32 }
 0x840   :  { %3211 = vmatpush1.bf16.msra.mxu0 %v7531_v37  ;;  %3252 = vmatpush1.bf16.msra.mxu1 %v7532_v20 }
 0x841   :  { %3212 = vmatprep.subr.bf16.mxu0 %v7533_v62  ;;  %3253 = vmatprep.subr.bf16.mxu1 %v7534_v50 }
 0x844   :  { %3213 = vmatpush1.bf16.msra.mxu0 %v7535_v7  ;;  %3254 = vmatpush1.bf16.msra.mxu1 %v7536_v45 }
 0x845   :  { %3214 = vmatprep.subr.bf16.mxu0 %v7537_v10  ;;  %3255 = vmatprep.subr.bf16.mxu1 %v7538_v57 }
 0x848   :  { %3215 = vmatpush1.bf16.msra.mxu0 %v7539_v61  ;;  %3256 = vmatpush1.bf16.msra.mxu1 %v7540_v44 }
 0x849   :  { %3216 = vmatprep.subr.bf16.mxu0 %v7541_v42  ;;  %3257 = vmatprep.subr.bf16.mxu1 %v7542_v43 }
 0x84c   :  { %3217 = vmatpush1.bf16.msra.mxu0 %v7543_v55  ;;  %3258 = vmatpush1.bf16.msra.mxu1 %v7544_v46 }
 0x84d   :  { %3218 = vmatprep.subr.bf16.mxu0 %v7545_v53  ;;  %3259 = vmatprep.subr.bf16.mxu1 %v7546_v1 }
 0x850   :  { %3219 = vmatpush1.bf16.msra.mxu0 %v7547_v51  ;;  %3260 = vmatpush1.bf16.msra.mxu1 %v7548_v26 }
 0x851   :  { %3220 = vmatprep.subr.bf16.mxu0 %v7549_v40  ;;  %3261 = vmatprep.subr.bf16.mxu1 %v7550_v16 }
 0x854   :  { %3221 = vmatpush1.bf16.msra.mxu0 %v7551_v19  ;;  %3262 = vmatpush1.bf16.msra.mxu1 %v7552_v33 }
 0x855   :  { %3288 = vmatprep.subr.bf16.mxu0 %v7553_v4  ;;  %3329 = vmatprep.subr.bf16.mxu1 %v7554_v34 }
 0x8ca   :  { %v2928_v30 = vpop.f32.mrb[92].mxu0  ;;  %v2969_v2 = vpop.f32.mrb[92].mxu1 }
 0x8cb   :  { %v2930_v32 = vpop.f32.mrb[93].mxu0  ;;  %v2971_v37 = vpop.f32.mrb[93].mxu1 }
 0x8cc   :  { %v2932_v20 = vpop.f32.mrb[94].mxu0  ;;  %v2973_v62 = vpop.f32.mrb[94].mxu1 }
 0x8cd   :  { %v2933_v50 = vpop.f32.mrb[95].mxu0  ;;  %v2974_v7 = vpop.f32.mrb[95].mxu1 }
 0x8ea   :  { %v3010_v45 = vpop.f32.mrb[96].mxu0  ;;  %v3051_v10 = vpop.f32.mrb[96].mxu1 }
 0x8eb   :  { %v3011_v57 = vadd.f32 %v3010_v45, %v2928_v30  ;;  %v3052_v61 = vadd.f32 %v3051_v10, %v2969_v2  ;;  %v3012_v44 = vpop.f32.mrb[97].mxu0  ;;  %v3053_v42 = vpop.f32.mrb[97].mxu1 }
 0x8ec   :  { %v3013_v43 = vadd.f32 %v3012_v44, %v2930_v32  ;;  %v3054_v55 = vadd.f32 %v3053_v42, %v2971_v37  ;;  %v3014_v46 = vpop.f32.mrb[98].mxu0  ;;  %v3055_v53 = vpop.f32.mrb[98].mxu1 }
 0x8ed   :  { %v3058_v1 = vadd.f32 %v3011_v57, %v5045_v6  ;;  %v3015_v51 = vpop.f32.mrb[99].mxu0  ;;  %v3056_v26 = vpop.f32.mrb[99].mxu1  ;;  %v3060_v34 = vadd.f32 %v3052_v61, %v5060_v14 }
 0x8ee   :  { %v3059_v40 = vadd.f32 %v3013_v43, %v5049_v60  ;;  %v3061_v33 = vadd.f32 %v3054_v55, %v5055_v18  ;;  %v7555_v43 = vld [vmem:[#allocation86_spill] sm:$0xff]  ;;  %v7556_v55 = vld [vmem:[#allocation87_spill] sm:$0xff]  ;;  %v7557_v26 = vld [vmem:[#allocation88_spill] sm:$0xff] }
 0x8ef   :  { %v3559_v16 = vmul.f32 -1.442695, %v3058_v1 }
 0x8f0   :  { %v3560_v19 = vmul.f32 -1.442695, %v3059_v40  ;;  %v3561_v4 = vmul.f32 -1.442695, %v3061_v33 }
 0x8f1   :  { %3937 = vpow2.f32 %v3559_v16  ;;  %v7558_v16 = vld [vmem:[#allocation89_spill] sm:$0xff] }
 0x8f2   :  { %3939 = vpow2.f32 %v3560_v19 }
 0x8f3   :  { %3941 = vpow2.f32 %v3561_v4 }
 0x8f4   :  { %3943 = vtanh.f32 %v3060_v34 }
 0x8fb   :  { %v3938_v30 = vpop.eup %3937 }
 0x8fc   :  { %v3940_v2 = vpop.eup %3939  ;;  %v3065_v32 = vadd.f32 1.0, %v3938_v30 }
 0x8fd   :  { %v3071_v37 = vadd.f32 1.0, %v3940_v2  ;;  %v3942_v20 = vpop.eup %3941 }
 0x8fe   :  { %3945 = vrcp.f32 %v3065_v32  ;;  %v3944_v62 = vpop.eup %3943  ;;  %v3078_v10 = vadd.f32 1.0, %v3942_v20 }
 0x8ff   :  { %3947 = vrcp.f32 %v3071_v37 }
 0x900   :  { %3949 = vrcp.f32 %v3078_v10 }
 0x908   :  { %v3946_v50 = vpop.eup %3945 }
 0x909   :  { %v3948_v7 = vpop.eup %3947  ;;  %v3082_v45 = vmul.f32 %v3946_v50, %v3944_v62 }
 0x90a   :  { %v3081_v57 = vmul.f32 %v3948_v7, %v6645_v11  ;;  %v3128_v44 = vpop.f32.mrb[100].mxu0  ;;  %v3169_v42 = vpop.f32.mrb[100].mxu1 }
 0x90b   :  { %v3176_v61 = vadd.f32 %v3128_v44, %v7555_v43  ;;  %v3178_v46 = vadd.f32 %v3169_v42, %v7556_v55  ;;  %v3130_v53 = vpop.f32.mrb[101].mxu0  ;;  %v3171_v1 = vpop.f32.mrb[101].mxu1 }
 0x90c   :  { %v6766_v51 = vadd.f32 %v3082_v45, %v3081_v57  ;;  %v3177_v40 = vadd.f32 %v3130_v53, %v7557_v26  ;;  %v3179_v19 = vadd.f32 %v3171_v1, %v7558_v16  ;;  %v3132_v33 = vpop.f32.mrb[102].mxu0  ;;  %v3173_v4 = vpop.f32.mrb[102].mxu1 }
 0x90d   :  { %v3563_v34 = vmul.f32 -1.442695, %v3176_v61  ;;  %v3133_v30 = vpop.f32.mrb[103].mxu0  ;;  %v3174_v11 = vpop.f32.mrb[103].mxu1 }
 0x90e   :  { %v3564_v2 = vmul.f32 -1.442695, %v3177_v40  ;;  %3951 = vtanh.f32 %v6766_v51  ;;  %v3565_v32 = vmul.f32 -1.442695, %v3179_v19  ;;  %v3950_v37 = vpop.eup %3949 }
 0x90f   :  { %3953 = vpow2.f32 %v3563_v34 }
 0x910   :  { %3955 = vpow2.f32 %v3564_v2 }
 0x911   :  { %3957 = vtanh.f32 %v3178_v46 }
 0x912   :  { %3959 = vpow2.f32 %v3565_v32 }
 0x918   :  { %v3952_v20 = vpop.eup %3951 }
 0x919   :  { %v3954_v62 = vpop.eup %3953  ;;  %v3085_v50 = vmul.f32 %v3952_v20, %v3950_v37 }
 0x91a   :  { %v3956_v7 = vpop.eup %3955  ;;  %v3183_v45 = vadd.f32 1.0, %v3954_v62 }
 0x91b   :  { %v3189_v57 = vadd.f32 1.0, %v3956_v7  ;;  %3961 = vtanh.f32 %v3085_v50  ;;  %v3204_v10 = vpack.c.bf16 %v3085_v50, %v3085_v50  ;;  %v3958_v44 = vpop.eup %3957 }
 0x91c   :  { %3963 = vrcp.f32 %v3183_v45 }
 0x91d   :  { %3965 = vrcp.f32 %v3189_v57  ;;  %3239 = vmatmul.mubr.bf16.vlgmr.msra.gmra.mrb[104].mxu0 %v3204_v10  ;;  %3280 = vmatmul.mubr.bf16.vlgmr.msra.gmra.mrb[104].mxu1 %v3204_v10 }
 0x91e   :  { %3289 = vmatpush1.bf16.msra.mxu0 %v6312_v36  ;;  %3330 = vmatpush1.bf16.msra.mxu1 %v6318_v28  ;;  %v3960_v36 = vpop.eup %3959 }
 0x91f   :  { %3290 = vmatprep.subr.bf16.mxu0 %v6324_v9  ;;  %3331 = vmatprep.subr.bf16.mxu1 %v6330_v23  ;;  %v3196_v23 = vadd.f32 1.0, %v3960_v36 }
 0x920   :  { %3320 = vmatprep.mubr.bf16.mxu0 %v7126_v52  ;;  %3361 = vmatprep.mubr.bf16.mxu1 %v7126_v52 }
 0x921   :  { %3967 = vrcp.f32 %v3196_v23 }
 0x922   :  { %3291 = vmatpush1.bf16.msra.mxu0 %v6338_v29  ;;  %3332 = vmatpush1.bf16.msra.mxu1 %v6344_v31 }
 0x923   :  { %3292 = vmatprep.subr.bf16.mxu0 %v6350_v8  ;;  %3333 = vmatprep.subr.bf16.mxu1 %v6356_v49 }
 0x925   :  { %v3962_v42 = vpop.eup %3961 }
 0x926   :  { %v3964_v28 = vpop.eup %3963  ;;  %3562 = vst [vmem:[%s6824_s9 + $0x30] sm:$0xff] %v3962_v42  ;;  %3293 = vmatpush1.bf16.msra.mxu0 %v6365_v5  ;;  %3334 = vmatpush1.bf16.msra.mxu1 %v6371_v58 }
 0x927   :  { %v3966_v52 = vpop.eup %3965  ;;  %v3200_v9 = vmul.f32 %v3964_v28, %v3958_v44  ;;  %3294 = vmatprep.subr.bf16.mxu0 %v6377_v41  ;;  %3335 = vmatprep.subr.bf16.mxu1 %v6383_v24 }
 0x928   :  { %v3199_v29 = vmul.f32 %v3966_v52, %v6668_v13 }
 0x92a   :  { %v3201_v31 = vadd.f32 %v3200_v9, %v3199_v29  ;;  %3295 = vmatpush1.bf16.msra.mxu0 %v6392_v12  ;;  %3336 = vmatpush1.bf16.msra.mxu1 %v6398_v21 }
 0x92b   :  { %3296 = vmatprep.subr.bf16.mxu0 %v6404_v47  ;;  %3337 = vmatprep.subr.bf16.mxu1 %v7494_v27  ;;  %v3968_v8 = vpop.eup %3967 }
 0x92c   :  { %3969 = vtanh.f32 %v3201_v31 }
 0x92e   :  { %3297 = vmatpush1.bf16.msra.mxu0 %v7495_v17  ;;  %3338 = vmatpush1.bf16.msra.mxu1 %v7496_v0 }
 0x92f   :  { %3298 = vmatprep.subr.bf16.mxu0 %v7497_v3  ;;  %3339 = vmatprep.subr.bf16.mxu1 %v7498_v54 }
 0x932   :  { %3299 = vmatpush1.bf16.msra.mxu0 %v7499_v59  ;;  %3340 = vmatpush1.bf16.msra.mxu1 %v7500_v38 }
 0x933   :  { %3300 = vmatprep.subr.bf16.mxu0 %v7501_v15  ;;  %3341 = vmatprep.subr.bf16.mxu1 %v7502_v63 }
 0x936   :  { %v3970_v49 = vpop.eup %3969  ;;  %3301 = vmatpush1.bf16.msra.mxu0 %v7503_v25  ;;  %3342 = vmatpush1.bf16.msra.mxu1 %v7504_v48 }
 0x937   :  { %3302 = vmatprep.subr.bf16.mxu0 %v7505_v35  ;;  %3343 = vmatprep.subr.bf16.mxu1 %v6483_v22  ;;  %v3203_v5 = vmul.f32 %v3970_v49, %v3968_v8 }
 0x939   :  { %v3205_v58 = vpack.c.bf16 %v3203_v5, %v3203_v5 }
 0x93a   :  { %3303 = vmatpush1.bf16.msra.mxu0 %v6489_v39  ;;  %3344 = vmatpush1.bf16.msra.mxu1 %v6495_v56 }
 0x93d   :  { %3321 = vmatmul.mubr.bf16.vlgmr.msra.gmra.mrb[108].mxu0 %v3205_v58  ;;  %3362 = vmatmul.mubr.bf16.vlgmr.msra.gmra.mrb[108].mxu1 %v3205_v58 }
 0x9f0   :  { %v3240_v41 = vpop.f32.mrb[104].mxu0  ;;  %v3281_v24 = vpop.f32.mrb[104].mxu1 }
 0x9f1   :  { %v3242_v12 = vpop.f32.mrb[105].mxu0  ;;  %v3283_v21 = vpop.f32.mrb[105].mxu1 }
 0x9f2   :  { %v3244_v47 = vpop.f32.mrb[106].mxu0  ;;  %v3285_v13 = vpop.f32.mrb[106].mxu1 }
 0x9f3   :  { %v3245_v27 = vpop.f32.mrb[107].mxu0  ;;  %v3286_v17 = vpop.f32.mrb[107].mxu1 }
 0xa10   :  { %v3322_v0 = vpop.f32.mrb[108].mxu0  ;;  %v3363_v3 = vpop.f32.mrb[108].mxu1 }
 0xa11   :  { %v3323_v54 = vadd.f32 %v3322_v0, %v3240_v41  ;;  %v3364_v22 = vadd.f32 %v3363_v3, %v3281_v24  ;;  %v3324_v59 = vpop.f32.mrb[109].mxu0  ;;  %v3365_v38 = vpop.f32.mrb[109].mxu1 }
 0xa12   :  { %v3325_v15 = vadd.f32 %v3324_v59, %v3242_v12  ;;  %v3366_v39 = vadd.f32 %v3365_v38, %v3283_v21  ;;  %v3326_v63 = vpop.f32.mrb[110].mxu0  ;;  %v3367_v56 = vpop.f32.mrb[110].mxu1 }
 0xa13   :  { %v3370_v25 = vadd.f32 %v3323_v54, %v5045_v6  ;;  %v3327_v48 = vpop.f32.mrb[111].mxu0  ;;  %v3368_v35 = vpop.f32.mrb[111].mxu1  ;;  %v3372_v1 = vadd.f32 %v3364_v22, %v5060_v14 }
 0xa14   :  { %v3371_v43 = vadd.f32 %v3325_v15, %v5049_v60  ;;  %v3373_v46 = vadd.f32 %v3366_v39, %v5055_v18 }
 0xa15   :  { %v3566_v61 = vmul.f32 -1.442695, %v3370_v25 }
 0xa16   :  { %v3567_v55 = vmul.f32 -1.442695, %v3371_v43  ;;  %v3568_v53 = vmul.f32 -1.442695, %v3373_v46 }
 0xa17   :  { %3971 = vpow2.f32 %v3566_v61 }
 0xa18   :  { %3973 = vpow2.f32 %v3567_v55 }
 0xa19   :  { %3975 = vpow2.f32 %v3568_v53 }
 0xa1a   :  { %3977 = vtanh.f32 %v3372_v1 }
 0xa21   :  { %v3972_v26 = vpop.eup %3971 }
 0xa22   :  { %v3974_v40 = vpop.eup %3973  ;;  %v3377_v16 = vadd.f32 1.0, %v3972_v26 }
 0xa23   :  { %v3383_v19 = vadd.f32 1.0, %v3974_v40  ;;  %v3976_v6 = vpop.eup %3975 }
 0xa24   :  { %3979 = vrcp.f32 %v3377_v16  ;;  %v3978_v33 = vpop.eup %3977  ;;  %v3390_v30 = vadd.f32 1.0, %v3976_v6 }
 0xa25   :  { %3981 = vrcp.f32 %v3383_v19 }
 0xa26   :  { %3983 = vrcp.f32 %v3390_v30 }
 0xa2e   :  { %v3980_v60 = vpop.eup %3979 }
 0xa2f   :  { %v3982_v4 = vpop.eup %3981  ;;  %v3394_v34 = vmul.f32 %v3980_v60, %v3978_v33 }
 0xa30   :  { %v3393_v11 = vmul.f32 %v3982_v4, %v6766_v51  ;;  %v3984_v14 = vpop.eup %3983 }
 0xa32   :  { %v3395_v18 = vadd.f32 %v3394_v34, %v3393_v11 }
 0xa34   :  { %3985 = vtanh.f32 %v3395_v18 }
 0xa3e   :  { %v3986_v2 = vpop.eup %3985 }
 0xa3f   :  { %v3397_v32 = vmul.f32 %v3986_v2, %v3984_v14 }
 0xa41   :  { %3987 = vtanh.f32 %v3397_v32 }
 0xa4b   :  { %v3988_v37 = vpop.eup %3987 }
 0xa4c   :  { %3569 = vst [vmem:[%s6824_s9 + $0x38] sm:$0xff] %v3988_v37 }

</bundles_post_ra>
